<compile_context>
chip_gen: v6e
topology: v6e:2x2x1
jax: 0.10.0
libtpu: 0.0.40
codegen_flags: <defaults>
</compile_context>

<pallas_src>
import functools

import numpy as np

import jax
import jax.numpy as jnp
from jax.experimental import pallas as pl
from jax.experimental.pallas import tpu as pltpu

_VMEM_LIMIT = 32 * 1024 * 1024   # actual worst-case per-call usage is ~12 MiB
_BN_EPS = 1e-5
_FUSE_MAX_M = 2048               # single-tile fully fused BN path up to this M


def _round_up(x, m):
    return ((x + m - 1) // m) * m


# ----------------------------------------------------------------------------
# Pallas kernels
# ----------------------------------------------------------------------------
def _fused_conv_bn_relu_kernel(a_ref, w_ref, b_ref, g_ref, be_ref, o_ref, *,
                               m_true, phases, cout):
    """One-shot conv-as-matmul + BatchNorm (batch stats) + ReLU.

    The whole M dimension is resident in this tile, so per-channel batch
    statistics are computed in-kernel (mean-centered variance for stability)
    and applied immediately -- no stats output, no second pass, no f32 y in HBM.
    For deconv layers the 4 sub-pixel phase column-groups are pooled per channel.
    """
    acc = jnp.dot(a_ref[...], w_ref[...], preferred_element_type=jnp.float32)
    acc = acc + b_ref[...]
    tm = acc.shape[0]

    if m_true != tm:   # rows that only exist because of M padding
        row = jax.lax.broadcasted_iota(jnp.int32, (tm, 1), 0)
        valid = (row < m_true).astype(jnp.float32)
    else:
        valid = None
    count = float(m_true * phases)

    def _pool(v):      # (1, phases*cout) -> (1, cout): pool sub-pixel phases
        out = v[:, 0:cout]
        for p in range(1, phases):
            out = out + v[:, p * cout:(p + 1) * cout]
        return out

    av = acc if valid is None else acc * valid
    mean = _pool(jnp.sum(av, axis=0, keepdims=True)) / count            # (1,cout)
    mean_pc = (jnp.concatenate([mean] * phases, axis=1)
               if phases > 1 else mean)
    cen = acc - mean_pc
    if valid is not None:
        cen = cen * valid
    var = _pool(jnp.sum(cen * cen, axis=0, keepdims=True)) / count      # biased
    inv = jax.lax.rsqrt(var + _BN_EPS)
    scale = g_ref[...] * inv
    shift = be_ref[...] - mean * scale
    if phases > 1:
        scale = jnp.concatenate([scale] * phases, axis=1)
        shift = jnp.concatenate([shift] * phases, axis=1)
    o_ref[...] = jnp.maximum(acc * scale + shift, 0.0).astype(o_ref.dtype)


def _mm_partial_stats_kernel(a_ref, w_ref, b_ref, y_ref, st_ref, *,
                             m_true, tile_m):
    """Large-M pass 1: y = A @ W + b (bf16 out) + PER-TILE partial stats.

    Partial stats (not a cross-grid accumulator) keep the grid axis 'parallel'
    so it can shard across v7x's two TensorCores without a race."""
    acc = jnp.dot(a_ref[...], w_ref[...], preferred_element_type=jnp.float32)
    acc = acc + b_ref[...]
    y_ref[...] = acc.astype(y_ref.dtype)
    if m_true % tile_m != 0:
        row = (pl.program_id(0) * tile_m
               + jax.lax.broadcasted_iota(jnp.int32, (tile_m, 1), 0))
        acc = jnp.where(row < m_true, acc, 0.0)
    s = jnp.sum(acc, axis=0, keepdims=True)
    ss = jnp.sum(acc * acc, axis=0, keepdims=True)
    st_ref[...] = jnp.concatenate([s, ss], axis=0)[None]   # (1, 2, PC)


def _scale_shift_relu_kernel(y_ref, scale_ref, shift_ref, o_ref):
    """Large-M pass 2: o = relu(y * scale + shift)."""
    y = y_ref[...].astype(jnp.float32)
    o_ref[...] = jnp.maximum(y * scale_ref[...] + shift_ref[...],
                             0.0).astype(o_ref.dtype)


def _mm_act_kernel(a_ref, w_ref, b_ref, y_ref, *, activation):
    """Plain y = A @ W + b (+ optional activation)."""
    acc = jnp.dot(a_ref[...], w_ref[...], preferred_element_type=jnp.float32)
    acc = acc + b_ref[...]
    if activation == "relu":
        acc = jnp.maximum(acc, 0.0)
    elif activation == "sigmoid":
        acc = jax.nn.sigmoid(acc)
    y_ref[...] = acc.astype(y_ref.dtype)


def _latent_decin_kernel(a_ref, wml_ref, bml_ref, eps_ref, wdi_ref, bdi_ref,
                         ml_ref, d_ref, *, latent):
    """Fused mu / logvar / reparameterize / decoder_input.

    One matmul of `encoded` against the concatenated [mu_w | logvar_w] weight,
    ReLU only on the logvar half, z = mu + eps * exp(0.5*logvar), then the
    decoder-input projection d = z @ Wdi + bdi -- all in one pallas_call."""
    acc = jnp.dot(a_ref[...], wml_ref[...], preferred_element_type=jnp.float32)
    acc = acc + bml_ref[...]
    col = jax.lax.broadcasted_iota(jnp.int32, acc.shape, 1)
    acc = jnp.where(col >= latent, jnp.maximum(acc, 0.0), acc)   # ReLU on logvar
    ml_ref[...] = acc
    mu = acc[:, :latent]
    lv = acc[:, latent:]
    z = mu + eps_ref[...] * jnp.exp(0.5 * lv)
    d = jnp.dot(z.astype(jnp.bfloat16), wdi_ref[...],
                preferred_element_type=jnp.float32)
    d_ref[...] = (d + bdi_ref[...]).astype(d_ref.dtype)


# ----------------------------------------------------------------------------
# pallas_call wrappers
# ----------------------------------------------------------------------------
def conv_bn_relu_matmul(cols, wmat, bias, gamma, beta, *, phases, tile_m=1024):
    """patches @ W + bias -> BatchNorm (batch stats, pooled over `phases`
    sub-pixel column groups) -> ReLU, bf16 output.

    Fully fused in a single pallas_call when M fits one tile; otherwise a
    'parallel' partial-stats pass plus a tiled apply pass."""
    m, k = cols.shape
    pc = wmat.shape[1]
    cout = pc // phases
    cols = cols.astype(jnp.bfloat16)
    wmat = wmat.astype(jnp.bfloat16)
    bias2 = bias.reshape(1, pc).astype(jnp.float32)
    g2 = gamma.reshape(1, cout).astype(jnp.float32)
    b2 = beta.reshape(1, cout).astype(jnp.float32)

    m16 = _round_up(m, 16)                      # bf16 sublane packing
    if m16 <= _FUSE_MAX_M:
        m_pad = m16
        if m_pad != m:
            cols = jnp.pad(cols, ((0, m_pad - m), (0, 0)))
        out = pl.pallas_call(
            functools.partial(_fused_conv_bn_relu_kernel, m_true=m,
                              phases=phases, cout=cout),
            out_shape=jax.ShapeDtypeStruct((m_pad, pc), jnp.bfloat16),
            grid=(1,),
            in_specs=[pl.BlockSpec((m_pad, k), lambda i: (0, 0)),
                      pl.BlockSpec((k, pc), lambda i: (0, 0)),
                      pl.BlockSpec((1, pc), lambda i: (0, 0)),
                      pl.BlockSpec((1, cout), lambda i: (0, 0)),
                      pl.BlockSpec((1, cout), lambda i: (0, 0))],
            out_specs=pl.BlockSpec((m_pad, pc), lambda i: (0, 0)),
            compiler_params=pltpu.CompilerParams(
                dimension_semantics=("arbitrary",),
                vmem_limit_bytes=_VMEM_LIMIT),
        )(cols, wmat, bias2, g2, b2)
        return out[:m]

    # ---- large-M path: per-tile partial stats (parallel) + apply pass ----
    tm = min(tile_m, m16)
    m_pad = _round_up(m, tm)
    if m_pad != m:
        cols = jnp.pad(cols, ((0, m_pad - m), (0, 0)))
    n_m = m_pad // tm
    y, stats = pl.pallas_call(
        functools.partial(_mm_partial_stats_kernel, m_true=m, tile_m=tm),
        out_shape=(jax.ShapeDtypeStruct((m_pad, pc), jnp.bfloat16),
                   jax.ShapeDtypeStruct((n_m, 2, pc), jnp.float32)),
        grid=(n_m,),
        in_specs=[pl.BlockSpec((tm, k), lambda i: (i, 0),
                               pipeline_mode=pl.Buffered(3)),
                  pl.BlockSpec((k, pc), lambda i: (0, 0)),
                  pl.BlockSpec((1, pc), lambda i: (0, 0))],
        out_specs=(pl.BlockSpec((tm, pc), lambda i: (i, 0)),
                   pl.BlockSpec((1, 2, pc), lambda i: (i, 0, 0))),
        compiler_params=pltpu.CompilerParams(
            dimension_semantics=("parallel",), vmem_limit_bytes=_VMEM_LIMIT),
    )(cols, wmat, bias2)

    stats = stats.sum(axis=0)                                   # (2, pc)
    s = stats[0].reshape(phases, cout).sum(axis=0)
    ss = stats[1].reshape(phases, cout).sum(axis=0)
    count = float(m * phases)
    mean = s / count
    var = jnp.maximum(ss / count - mean * mean, 0.0)             # biased
    inv = jax.lax.rsqrt(var + _BN_EPS)
    scale = gamma * inv
    shift = beta - mean * scale
    scale_pc = jnp.tile(scale, phases).reshape(1, pc).astype(jnp.float32)
    shift_pc = jnp.tile(shift, phases).reshape(1, pc).astype(jnp.float32)

    out = pl.pallas_call(
        _scale_shift_relu_kernel,
        out_shape=jax.ShapeDtypeStruct((m_pad, pc), jnp.bfloat16),
        grid=(n_m,),
        in_specs=[pl.BlockSpec((tm, pc), lambda i: (i, 0)),
                  pl.BlockSpec((1, pc), lambda i: (0, 0)),
                  pl.BlockSpec((1, pc), lambda i: (0, 0))],
        out_specs=pl.BlockSpec((tm, pc), lambda i: (i, 0)),
        compiler_params=pltpu.CompilerParams(
            dimension_semantics=("parallel",), vmem_limit_bytes=_VMEM_LIMIT),
    )(y, scale_pc, shift_pc)
    return out[:m]


def matmul_bias_act(a, w, bias, *, activation="none", out_dtype=jnp.float32,
                    tile_m=1024):
    m, k = a.shape
    c = w.shape[1]
    a = a.astype(jnp.bfloat16)
    tm = min(tile_m, _round_up(m, 16))
    m_pad = _round_up(m, tm)
    if m_pad != m:
        a = jnp.pad(a, ((0, m_pad - m), (0, 0)))
    n_m = m_pad // tm
    if n_m > 1:
        a_spec = pl.BlockSpec((tm, k), lambda i: (i, 0),
                              pipeline_mode=pl.Buffered(3))
    else:
        a_spec = pl.BlockSpec((tm, k), lambda i: (i, 0))
    out = pl.pallas_call(
        functools.partial(_mm_act_kernel, activation=activation),
        out_shape=jax.ShapeDtypeStruct((m_pad, c), out_dtype),
        grid=(n_m,),
        in_specs=[a_spec,
                  pl.BlockSpec((k, c), lambda i: (0, 0)),
                  pl.BlockSpec((1, c), lambda i: (0, 0))],
        out_specs=pl.BlockSpec((tm, c), lambda i: (i, 0)),
        compiler_params=pltpu.CompilerParams(
            dimension_semantics=("parallel",), vmem_limit_bytes=_VMEM_LIMIT),
    )(a, w.astype(jnp.bfloat16), bias.reshape(1, c).astype(jnp.float32))
    return out[:m]


def latent_and_decoder_input(encoded, ml_w, ml_b, eps, di_w, di_b, latent):
    b, k = encoded.shape
    two_l = ml_w.shape[1]
    enc = di_w.shape[1]
    ml, d = pl.pallas_call(
        functools.partial(_latent_decin_kernel, latent=latent),
        out_shape=(jax.ShapeDtypeStruct((b, two_l), jnp.float32),
                   jax.ShapeDtypeStruct((b, enc), jnp.bfloat16)),
        grid=(1,),
        in_specs=[pl.BlockSpec((b, k), lambda i: (0, 0)),
                  pl.BlockSpec((k, two_l), lambda i: (0, 0)),
                  pl.BlockSpec((1, two_l), lambda i: (0, 0)),
                  pl.BlockSpec((b, latent), lambda i: (0, 0)),
                  pl.BlockSpec((latent, enc), lambda i: (0, 0)),
                  pl.BlockSpec((1, enc), lambda i: (0, 0))],
        out_specs=(pl.BlockSpec((b, two_l), lambda i: (0, 0)),
                   pl.BlockSpec((b, enc), lambda i: (0, 0))),
        compiler_params=pltpu.CompilerParams(
            dimension_semantics=("arbitrary",), vmem_limit_bytes=_VMEM_LIMIT),
    )(encoded.astype(jnp.bfloat16), ml_w.astype(jnp.bfloat16),
      ml_b.reshape(1, two_l).astype(jnp.float32), eps.astype(jnp.float32),
      di_w.astype(jnp.bfloat16), di_b.reshape(1, enc).astype(jnp.float32))
    return ml, d


# ----------------------------------------------------------------------------
# Glue: im2col, conv / sub-pixel deconv blocks
# ----------------------------------------------------------------------------
def im2col(x_nhwc, k, stride, pad):
    # TODO(synk): patches are still materialized by XLA between Pallas calls; a
    # fully fused variant would gather the k*k taps inside the matmul kernel.
    x = x_nhwc.astype(jnp.bfloat16)
    if pad:
        x = jnp.pad(x, ((0, 0), (pad, pad), (pad, pad), (0, 0)))
    n, h, w, c = x.shape
    oh = (h - k) // stride + 1
    ow = (w - k) // stride + 1
    patches = [x[:, i:i + stride * oh:stride, j:j + stride * ow:stride, :]
               for i in range(k) for j in range(k)]
    cols = jnp.stack(patches, axis=3)              # (N, oh, ow, k*k, C)
    return cols.reshape(n * oh * ow, k * k * c), oh, ow


def conv_block(x_nhwc, wmat, bias, gamma, beta):
    """Conv2d(k=4, s=2, p=1) + BatchNorm2d (batch stats) + ReLU, NHWC in/out."""
    n = x_nhwc.shape[0]
    cout = wmat.shape[1]
    cols, oh, ow = im2col(x_nhwc, 4, 2, 1)
    y = conv_bn_relu_matmul(cols, wmat, bias, gamma, beta, phases=1)
    return y.reshape(n, oh, ow, cout)


def _phase_interleave(out2d, n, h, w, cout):
    # columns ordered (phase r, phase s, cout) -> output pixel (2a+r, 2b+s)
    out = out2d.reshape(n, h, w, 2, 2, cout).transpose(0, 1, 3, 2, 4, 5)
    return out.reshape(n, 2 * h, 2 * w, cout)


def deconv_block_bn_relu(x_nhwc, wbig, bias4, gamma, beta):
    """ConvTranspose2d(k=4, s=2, p=1) via sub-pixel phases + BatchNorm + ReLU."""
    n, h, w, _ = x_nhwc.shape
    cout = wbig.shape[1] // 4
    cols, _, _ = im2col(x_nhwc, 3, 1, 1)                    # (N*h*w, 9*Cin)
    y = conv_bn_relu_matmul(cols, wbig, bias4, gamma, beta, phases=4)
    return _phase_interleave(y, n, h, w, cout)


def deconv_block_sigmoid(x_nhwc, wbig, bias4):
    # final layer: 4*Cout=12 output lanes -> tiny, accept masked stores here.
    n, h, w, _ = x_nhwc.shape
    cout = wbig.shape[1] // 4
    cols, _, _ = im2col(x_nhwc, 3, 1, 1)
    y = matmul_bias_act(cols, wbig, bias4, activation="sigmoid",
                        out_dtype=jnp.float32)
    return _phase_interleave(y, n, h, w, cout)


# ----------------------------------------------------------------------------
# Parameters (PyTorch layout) and one-time layout preparation
# ----------------------------------------------------------------------------
def init_params(key, input_size=(3, 16, 16), latent_size=16):
    c, h, w = input_size
    enc = 128 * (h // 8) * (w // 8)
    ks = jax.random.split(key, 9)
    f32 = jnp.float32

    def w_init(k, shape, scale=0.05):
        return (scale * jax.random.normal(k, shape)).astype(f32)

    return dict(
        conv1_w=w_init(ks[0], (32, c, 4, 4)), conv1_b=jnp.zeros((32,), f32),
        bn1_g=jnp.ones((32,), f32), bn1_b=jnp.zeros((32,), f32),
        conv2_w=w_init(ks[1], (64, 32, 4, 4)), conv2_b=jnp.zeros((64,), f32),
        bn2_g=jnp.ones((64,), f32), bn2_b=jnp.zeros((64,), f32),
        conv3_w=w_init(ks[2], (128, 64, 4, 4)), conv3_b=jnp.zeros((128,), f32),
        bn3_g=jnp.ones((128,), f32), bn3_b=jnp.zeros((128,), f32),
        mu_w=w_init(ks[3], (latent_size, enc)), mu_b=jnp.zeros((latent_size,), f32),
        lv_w=w_init(ks[4], (latent_size, enc)), lv_b=jnp.zeros((latent_size,), f32),
        dec_in_w=w_init(ks[5], (enc, latent_size)), dec_in_b=jnp.zeros((enc,), f32),
        deconv1_w=w_init(ks[6], (128, 64, 4, 4)), deconv1_b=jnp.zeros((64,), f32),
        dbn1_g=jnp.ones((64,), f32), dbn1_b=jnp.zeros((64,), f32),
        deconv2_w=w_init(ks[7], (64, 32, 4, 4)), deconv2_b=jnp.zeros((32,), f32),
        dbn2_g=jnp.ones((32,), f32), dbn2_b=jnp.zeros((32,), f32),
        deconv3_w=w_init(ks[8], (32, c, 4, 4)), deconv3_b=jnp.zeros((c,), f32),
    )


def _conv_wmat(w):
    # (Cout, Cin, k, k) -> (k*k*Cin, Cout), matches im2col (i, j, cin) ordering
    return jnp.transpose(w, (2, 3, 1, 0)).reshape(-1, w.shape[0]).astype(jnp.bfloat16)


def _subpixel_deconv_wmat(w):
    """ConvTranspose2d(k=4, s=2, p=1) weight (Cin, Cout, 4, 4) -> combined
    sub-pixel weight (9*Cin, 4*Cout): a stride-1 3x3 conv over the 1-padded
    input whose 4 output-column groups are the 4 sub-pixel phases (r, s)."""
    w = np.asarray(w, dtype=np.float32)
    cin, cout = w.shape[0], w.shape[1]
    big = np.zeros((3, 3, cin, 4, cout), np.float32)
    for r in (0, 1):
        for s in (0, 1):
            for di in (0, 1):
                for dj in (0, 1):
                    big[r + di, s + dj, :, r * 2 + s, :] = \
                        w[:, :, 3 - r - 2 * di, 3 - s - 2 * dj]
    return jnp.asarray(big.reshape(9 * cin, 4 * cout), dtype=jnp.bfloat16)


def _nchw_to_nhwc_perm(c, h, w):
    # perm[q_nhwc] = corresponding flat NCHW index
    idx = np.arange(c * h * w).reshape(c, h, w)
    return jnp.asarray(idx.transpose(1, 2, 0).reshape(-1))


def prepare_params(p, input_size=(3, 16, 16)):
    """One-time weight layout prep: conv matmul weights, sub-pixel deconv
    weights, and FC weights permuted to NHWC-flat ordering (so the Flatten /
    Unflatten transposes disappear)."""
    _, h, w = input_size
    h8, w8 = h // 8, w // 8
    perm = _nchw_to_nhwc_perm(128, h8, w8)
    return dict(
        c1_w=_conv_wmat(p["conv1_w"]), c1_b=p["conv1_b"],
        bn1_g=p["bn1_g"], bn1_b=p["bn1_b"],
        c2_w=_conv_wmat(p["conv2_w"]), c2_b=p["conv2_b"],
        bn2_g=p["bn2_g"], bn2_b=p["bn2_b"],
        c3_w=_conv_wmat(p["conv3_w"]), c3_b=p["conv3_b"],
        bn3_g=p["bn3_g"], bn3_b=p["bn3_b"],
        ml_w=jnp.concatenate([p["mu_w"].T[perm], p["lv_w"].T[perm]],
                             axis=1).astype(jnp.bfloat16),
        ml_b=jnp.concatenate([p["mu_b"], p["lv_b"]]).astype(jnp.float32),
        di_w=p["dec_in_w"][perm].T.astype(jnp.bfloat16),     # (latent, enc) NHWC cols
        di_b=p["dec_in_b"][perm].astype(jnp.float32),
        d1_w=_subpixel_deconv_wmat(p["deconv1_w"]), d1_b=jnp.tile(p["deconv1_b"], 4),
        dbn1_g=p["dbn1_g"], dbn1_b=p["dbn1_b"],
        d2_w=_subpixel_deconv_wmat(p["deconv2_w"]), d2_b=jnp.tile(p["deconv2_b"], 4),
        dbn2_g=p["dbn2_g"], dbn2_b=p["dbn2_b"],
        d3_w=_subpixel_deconv_wmat(p["deconv3_w"]), d3_b=jnp.tile(p["deconv3_b"], 4),
    )


# ----------------------------------------------------------------------------
# Forward pass
# ----------------------------------------------------------------------------
def vae_forward(prep, x_nchw, eps, input_size=(3, 16, 16), latent_size=16):
    c, h, w = input_size
    h8, w8 = h // 8, w // 8
    n = x_nchw.shape[0]

    x = jnp.transpose(x_nchw, (0, 2, 3, 1)).astype(jnp.float32)   # NCHW -> NHWC

    # ---------------- encoder ----------------
    x = conv_block(x, prep["c1_w"], prep["c1_b"], prep["bn1_g"], prep["bn1_b"])
    x = conv_block(x, prep["c2_w"], prep["c2_b"], prep["bn2_g"], prep["bn2_b"])
    x = conv_block(x, prep["c3_w"], prep["c3_b"], prep["bn3_g"], prep["bn3_b"])

    # FC weights are permuted to NHWC-flat ordering -> no transpose needed here.
    encoded = x.reshape(n, -1)

    # fused mu / logvar (ReLU on logvar half, per the reference) /
    # reparameterize / decoder_input -- one pallas_call
    ml, d = latent_and_decoder_input(encoded, prep["ml_w"], prep["ml_b"], eps,
                                     prep["di_w"], prep["di_b"], latent_size)
    mu, logvar = ml[:, :latent_size], ml[:, latent_size:]

    # ---------------- decoder ----------------
    d = d.reshape(n, h8, w8, 128)          # already NHWC-ordered (permuted weight)
    d = deconv_block_bn_relu(d, prep["d1_w"], prep["d1_b"],
                             prep["dbn1_g"], prep["dbn1_b"])
    d = deconv_block_bn_relu(d, prep["d2_w"], prep["d2_b"],
                             prep["dbn2_g"], prep["dbn2_b"])
    dec = deconv_block_sigmoid(d, prep["d3_w"], prep["d3_b"])

    decoded = jnp.transpose(dec, (0, 3, 1, 2))                     # NHWC -> NCHW
    return decoded, mu, logvar


if __name__ == "__main__":
    input_size = (3, 16, 16)   # small version of the (3, 64, 64) default
    latent_size = 16
    batch = 2

    key = jax.random.PRNGKey(0)
    kp, kx, ke = jax.random.split(key, 3)

    params = init_params(kp, input_size, latent_size)
    prep = prepare_params(params, input_size)
    x = jax.random.uniform(kx, (batch,) + input_size, dtype=jnp.float32)
    # TODO(synk): PyTorch uses torch.randn_like inside forward; here eps is drawn
    # from jax.random (different RNG stream, same N(0,1) semantics).
    eps = jax.random.normal(ke, (batch, latent_size), dtype=jnp.float32)

    fwd = jax.jit(functools.partial(vae_forward, input_size=input_size,
                                    latent_size=latent_size))
    decoded, mu, logvar = fwd(prep, x, eps)
    jax.block_until_ready((decoded, mu, logvar))

    assert decoded.shape == (batch,) + input_size
    assert mu.shape == (batch, latent_size)
    assert logvar.shape == (batch, latent_size)
    assert bool(jnp.all(jnp.isfinite(decoded)))
    assert bool(jnp.all((decoded >= 0.0) & (decoded <= 1.0)))
    assert bool(jnp.all(logvar >= 0.0))   # logvar head has a ReLU in the reference
    print("KERNEL_OK")
</pallas_src>

<mosaic_0001>
module attributes {stable_mosaic.version = 11 : i64} {
  func.func @_fused_conv_bn_relu_kernel(%arg0: i32, %arg1: memref<128x48xbf16, #tpu.memory_space<vmem>>, %arg2: memref<48x32xbf16, #tpu.memory_space<vmem>>, %arg3: memref<1x32xf32, #tpu.memory_space<vmem>>, %arg4: memref<1x32xf32, #tpu.memory_space<vmem>>, %arg5: memref<1x32xf32, #tpu.memory_space<vmem>>, %arg6: memref<128x32xbf16, #tpu.memory_space<vmem>>) attributes {dimension_semantics = [#tpu.dimension_semantics<arbitrary>], iteration_bounds = array<i64: 1>, scalar_prefetch = 0 : i64, scratch_operands = 0 : i64, tpu.core_type = #tpu.core_type<tc>, window_params = [{pipeline_mode = #tpu.pipeline_mode<synchronous>, transform_indices = @transform_0, window_bounds = array<i64: 128, 48>}, {pipeline_mode = #tpu.pipeline_mode<synchronous>, transform_indices = @transform_1, window_bounds = array<i64: 48, 32>}, {pipeline_mode = #tpu.pipeline_mode<synchronous>, transform_indices = @transform_2, window_bounds = array<i64: 1, 32>}, {pipeline_mode = #tpu.pipeline_mode<synchronous>, transform_indices = @transform_3, window_bounds = array<i64: 1, 32>}, {pipeline_mode = #tpu.pipeline_mode<synchronous>, transform_indices = @transform_4, window_bounds = array<i64: 1, 32>}, {pipeline_mode = #tpu.pipeline_mode<synchronous>, transform_indices = @transform_5, window_bounds = array<i64: 128, 32>}]} {
    %c0 = arith.constant 0 : index
    %c0_0 = arith.constant 0 : index
    %0 = vector.load %arg1[%c0, %c0_0] : memref<128x48xbf16, #tpu.memory_space<vmem>>, vector<128x48xbf16>
    %c0_1 = arith.constant 0 : index
    %c0_2 = arith.constant 0 : index
    %1 = vector.load %arg2[%c0_1, %c0_2] : memref<48x32xbf16, #tpu.memory_space<vmem>>, vector<48x32xbf16>
    %cst = arith.constant dense<0.000000e+00> : vector<128x32xf32>
    %2 = tpu.matmul %0, %1, %cst {dimension_numbers = #tpu.dot_dimension_numbers<[1], [0], [0], [1], [0, 0, 1, 1], [], []>} : vector<128x48xbf16>, vector<48x32xbf16>, vector<128x32xf32> -> vector<128x32xf32>
    %c0_3 = arith.constant 0 : index
    %c0_4 = arith.constant 0 : index
    %3 = vector.load %arg3[%c0_3, %c0_4] : memref<1x32xf32, #tpu.memory_space<vmem>>, vector<1x32xf32>
    %4 = vector.broadcast %3 : vector<1x32xf32> to vector<128x32xf32>
    %5 = arith.addf %2, %4 : vector<128x32xf32>
    %cst_5 = arith.constant dense<0.000000e+00> : vector<32xf32>
    %6 = vector.multi_reduction <add>, %5, %cst_5 [0] : vector<128x32xf32> to vector<32xf32>
    %7 = vector.shape_cast %6 : vector<32xf32> to vector<1x32xf32>
    %cst_6 = arith.constant 1.280000e+02 : f32
    %8 = vector.broadcast %cst_6 : f32 to vector<1x32xf32>
    %9 = arith.divf %7, %8 : vector<1x32xf32>
    %10 = vector.broadcast %9 : vector<1x32xf32> to vector<128x32xf32>
    %11 = arith.subf %5, %10 : vector<128x32xf32>
    %12 = arith.mulf %11, %11 : vector<128x32xf32>
    %cst_7 = arith.constant dense<0.000000e+00> : vector<32xf32>
    %13 = vector.multi_reduction <add>, %12, %cst_7 [0] : vector<128x32xf32> to vector<32xf32>
    %14 = vector.shape_cast %13 : vector<32xf32> to vector<1x32xf32>
    %cst_8 = arith.constant 1.280000e+02 : f32
    %15 = vector.broadcast %cst_8 : f32 to vector<1x32xf32>
    %16 = arith.divf %14, %15 : vector<1x32xf32>
    %cst_9 = arith.constant 9.99999974E-6 : f32
    %17 = vector.broadcast %cst_9 : f32 to vector<1x32xf32>
    %18 = arith.addf %16, %17 : vector<1x32xf32>
    %19 = math.rsqrt %18 : vector<1x32xf32>
    %c0_10 = arith.constant 0 : index
    %c0_11 = arith.constant 0 : index
    %20 = vector.load %arg4[%c0_10, %c0_11] : memref<1x32xf32, #tpu.memory_space<vmem>>, vector<1x32xf32>
    %21 = arith.mulf %20, %19 : vector<1x32xf32>
    %c0_12 = arith.constant 0 : index
    %c0_13 = arith.constant 0 : index
    %22 = vector.load %arg5[%c0_12, %c0_13] : memref<1x32xf32, #tpu.memory_space<vmem>>, vector<1x32xf32>
    %23 = arith.mulf %9, %21 : vector<1x32xf32>
    %24 = arith.subf %22, %23 : vector<1x32xf32>
    %25 = vector.broadcast %21 : vector<1x32xf32> to vector<128x32xf32>
    %26 = arith.mulf %5, %25 : vector<128x32xf32>
    %27 = vector.broadcast %24 : vector<1x32xf32> to vector<128x32xf32>
    %28 = arith.addf %26, %27 : vector<128x32xf32>
    %cst_14 = arith.constant 0.000000e+00 : f32
    %29 = vector.broadcast %cst_14 : f32 to vector<128x32xf32>
    %30 = arith.maximumf %28, %29 : vector<128x32xf32>
    %31 = arith.truncf %30 : vector<128x32xf32> to vector<128x32xbf16>
    %c0_15 = arith.constant 0 : index
    %c0_16 = arith.constant 0 : index
    %32 = vector.load %arg6[%c0_15, %c0_16] : memref<128x32xbf16, #tpu.memory_space<vmem>>, vector<128x32xbf16>
    tpu.vector_store %arg6[%c0_15, %c0_16], %31 {strides = array<i32>} : memref<128x32xbf16, #tpu.memory_space<vmem>>, vector<128x32xbf16>,
    return
  }
  func.func @transform_0(%arg0: i32) -> (i32, i32) {
    %c0_i32 = arith.constant 0 : i32
    %c0_i32_0 = arith.constant 0 : i32
    %c0_i32_1 = arith.constant 0 : i32
    return %c0_i32, %c0_i32_0 : i32, i32
  }
  func.func @transform_1(%arg0: i32) -> (i32, i32) {
    %c0_i32 = arith.constant 0 : i32
    %c0_i32_0 = arith.constant 0 : i32
    %c0_i32_1 = arith.constant 0 : i32
    return %c0_i32, %c0_i32_0 : i32, i32
  }
  func.func @transform_2(%arg0: i32) -> (i32, i32) {
    %c0_i32 = arith.constant 0 : i32
    %c0_i32_0 = arith.constant 0 : i32
    %c0_i32_1 = arith.constant 0 : i32
    return %c0_i32, %c0_i32_0 : i32, i32
  }
  func.func @transform_3(%arg0: i32) -> (i32, i32) {
    %c0_i32 = arith.constant 0 : i32
    %c0_i32_0 = arith.constant 0 : i32
    %c0_i32_1 = arith.constant 0 : i32
    return %c0_i32, %c0_i32_0 : i32, i32
  }
  func.func @transform_4(%arg0: i32) -> (i32, i32) {
    %c0_i32 = arith.constant 0 : i32
    %c0_i32_0 = arith.constant 0 : i32
    %c0_i32_1 = arith.constant 0 : i32
    return %c0_i32, %c0_i32_0 : i32, i32
  }
  func.func @transform_5(%arg0: i32) -> (i32, i32) {
    %c0_i32 = arith.constant 0 : i32
    %c0_i32_0 = arith.constant 0 : i32
    %c0_i32_1 = arith.constant 0 : i32
    return %c0_i32, %c0_i32_0 : i32, i32
  }
}

module attributes {stable_mosaic.version = 11 : i64} {
  func.func @_fused_conv_bn_relu_kernel(%arg0: i32, %arg1: memref<32x512xbf16, #tpu.memory_space<vmem>>, %arg2: memref<512x64xbf16, #tpu.memory_space<vmem>>, %arg3: memref<1x64xf32, #tpu.memory_space<vmem>>, %arg4: memref<1x64xf32, #tpu.memory_space<vmem>>, %arg5: memref<1x64xf32, #tpu.memory_space<vmem>>, %arg6: memref<32x64xbf16, #tpu.memory_space<vmem>>) attributes {dimension_semantics = [#tpu.dimension_semantics<arbitrary>], iteration_bounds = array<i64: 1>, scalar_prefetch = 0 : i64, scratch_operands = 0 : i64, tpu.core_type = #tpu.core_type<tc>, window_params = [{pipeline_mode = #tpu.pipeline_mode<synchronous>, transform_indices = @transform_0, window_bounds = array<i64: 32, 512>}, {pipeline_mode = #tpu.pipeline_mode<synchronous>, transform_indices = @transform_1, window_bounds = array<i64: 512, 64>}, {pipeline_mode = #tpu.pipeline_mode<synchronous>, transform_indices = @transform_2, window_bounds = array<i64: 1, 64>}, {pipeline_mode = #tpu.pipeline_mode<synchronous>, transform_indices = @transform_3, window_bounds = array<i64: 1, 64>}, {pipeline_mode = #tpu.pipeline_mode<synchronous>, transform_indices = @transform_4, window_bounds = array<i64: 1, 64>}, {pipeline_mode = #tpu.pipeline_mode<synchronous>, transform_indices = @transform_5, window_bounds = array<i64: 32, 64>}]} {
    %c0 = arith.constant 0 : index
    %c0_0 = arith.constant 0 : index
    %0 = vector.load %arg1[%c0, %c0_0] : memref<32x512xbf16, #tpu.memory_space<vmem>>, vector<32x512xbf16>
    %c0_1 = arith.constant 0 : index
    %c0_2 = arith.constant 0 : index
    %1 = vector.load %arg2[%c0_1, %c0_2] : memref<512x64xbf16, #tpu.memory_space<vmem>>, vector<512x64xbf16>
    %cst = arith.constant dense<0.000000e+00> : vector<32x64xf32>
    %2 = tpu.matmul %0, %1, %cst {dimension_numbers = #tpu.dot_dimension_numbers<[1], [0], [0], [1], [0, 0, 1, 1], [], []>} : vector<32x512xbf16>, vector<512x64xbf16>, vector<32x64xf32> -> vector<32x64xf32>
    %c0_3 = arith.constant 0 : index
    %c0_4 = arith.constant 0 : index
    %3 = vector.load %arg3[%c0_3, %c0_4] : memref<1x64xf32, #tpu.memory_space<vmem>>, vector<1x64xf32>
    %4 = vector.broadcast %3 : vector<1x64xf32> to vector<32x64xf32>
    %5 = arith.addf %2, %4 : vector<32x64xf32>
    %cst_5 = arith.constant dense<0.000000e+00> : vector<64xf32>
    %6 = vector.multi_reduction <add>, %5, %cst_5 [0] : vector<32x64xf32> to vector<64xf32>
    %7 = vector.shape_cast %6 : vector<64xf32> to vector<1x64xf32>
    %cst_6 = arith.constant 3.200000e+01 : f32
    %8 = vector.broadcast %cst_6 : f32 to vector<1x64xf32>
    %9 = arith.divf %7, %8 : vector<1x64xf32>
    %10 = vector.broadcast %9 : vector<1x64xf32> to vector<32x64xf32>
    %11 = arith.subf %5, %10 : vector<32x64xf32>
    %12 = arith.mulf %11, %11 : vector<32x64xf32>
    %cst_7 = arith.constant dense<0.000000e+00> : vector<64xf32>
    %13 = vector.multi_reduction <add>, %12, %cst_7 [0] : vector<32x64xf32> to vector<64xf32>
    %14 = vector.shape_cast %13 : vector<64xf32> to vector<1x64xf32>
    %cst_8 = arith.constant 3.200000e+01 : f32
    %15 = vector.broadcast %cst_8 : f32 to vector<1x64xf32>
    %16 = arith.divf %14, %15 : vector<1x64xf32>
    %cst_9 = arith.constant 9.99999974E-6 : f32
    %17 = vector.broadcast %cst_9 : f32 to vector<1x64xf32>
    %18 = arith.addf %16, %17 : vector<1x64xf32>
    %19 = math.rsqrt %18 : vector<1x64xf32>
    %c0_10 = arith.constant 0 : index
    %c0_11 = arith.constant 0 : index
    %20 = vector.load %arg4[%c0_10, %c0_11] : memref<1x64xf32, #tpu.memory_space<vmem>>, vector<1x64xf32>
    %21 = arith.mulf %20, %19 : vector<1x64xf32>
    %c0_12 = arith.constant 0 : index
    %c0_13 = arith.constant 0 : index
    %22 = vector.load %arg5[%c0_12, %c0_13] : memref<1x64xf32, #tpu.memory_space<vmem>>, vector<1x64xf32>
    %23 = arith.mulf %9, %21 : vector<1x64xf32>
    %24 = arith.subf %22, %23 : vector<1x64xf32>
    %25 = vector.broadcast %21 : vector<1x64xf32> to vector<32x64xf32>
    %26 = arith.mulf %5, %25 : vector<32x64xf32>
    %27 = vector.broadcast %24 : vector<1x64xf32> to vector<32x64xf32>
    %28 = arith.addf %26, %27 : vector<32x64xf32>
    %cst_14 = arith.constant 0.000000e+00 : f32
    %29 = vector.broadcast %cst_14 : f32 to vector<32x64xf32>
    %30 = arith.maximumf %28, %29 : vector<32x64xf32>
    %31 = arith.truncf %30 : vector<32x64xf32> to vector<32x64xbf16>
    %c0_15 = arith.constant 0 : index
    %c0_16 = arith.constant 0 : index
    %32 = vector.load %arg6[%c0_15, %c0_16] : memref<32x64xbf16, #tpu.memory_space<vmem>>, vector<32x64xbf16>
    tpu.vector_store %arg6[%c0_15, %c0_16], %31 {strides = array<i32>} : memref<32x64xbf16, #tpu.memory_space<vmem>>, vector<32x64xbf16>,
    return
  }
  func.func @transform_0(%arg0: i32) -> (i32, i32) {
    %c0_i32 = arith.constant 0 : i32
    %c0_i32_0 = arith.constant 0 : i32
    %c0_i32_1 = arith.constant 0 : i32
    return %c0_i32, %c0_i32_0 : i32, i32
  }
  func.func @transform_1(%arg0: i32) -> (i32, i32) {
    %c0_i32 = arith.constant 0 : i32
    %c0_i32_0 = arith.constant 0 : i32
    %c0_i32_1 = arith.constant 0 : i32
    return %c0_i32, %c0_i32_0 : i32, i32
  }
  func.func @transform_2(%arg0: i32) -> (i32, i32) {
    %c0_i32 = arith.constant 0 : i32
    %c0_i32_0 = arith.constant 0 : i32
    %c0_i32_1 = arith.constant 0 : i32
    return %c0_i32, %c0_i32_0 : i32, i32
  }
  func.func @transform_3(%arg0: i32) -> (i32, i32) {
    %c0_i32 = arith.constant 0 : i32
    %c0_i32_0 = arith.constant 0 : i32
    %c0_i32_1 = arith.constant 0 : i32
    return %c0_i32, %c0_i32_0 : i32, i32
  }
  func.func @transform_4(%arg0: i32) -> (i32, i32) {
    %c0_i32 = arith.constant 0 : i32
    %c0_i32_0 = arith.constant 0 : i32
    %c0_i32_1 = arith.constant 0 : i32
    return %c0_i32, %c0_i32_0 : i32, i32
  }
  func.func @transform_5(%arg0: i32) -> (i32, i32) {
    %c0_i32 = arith.constant 0 : i32
    %c0_i32_0 = arith.constant 0 : i32
    %c0_i32_1 = arith.constant 0 : i32
    return %c0_i32, %c0_i32_0 : i32, i32
  }
}

module attributes {stable_mosaic.version = 11 : i64} {
  func.func @_latent_decin_kernel(%arg0: i32, %arg1: memref<2x512xbf16, #tpu.memory_space<vmem>>, %arg2: memref<512x32xbf16, #tpu.memory_space<vmem>>, %arg3: memref<1x32xf32, #tpu.memory_space<vmem>>, %arg4: memref<2x16xf32, #tpu.memory_space<vmem>>, %arg5: memref<16x512xbf16, #tpu.memory_space<vmem>>, %arg6: memref<1x512xf32, #tpu.memory_space<vmem>>, %arg7: memref<2x32xf32, #tpu.memory_space<vmem>>, %arg8: memref<2x512xbf16, #tpu.memory_space<vmem>>) attributes {dimension_semantics = [#tpu.dimension_semantics<arbitrary>], iteration_bounds = array<i64: 1>, scalar_prefetch = 0 : i64, scratch_operands = 0 : i64, tpu.core_type = #tpu.core_type<tc>, window_params = [{pipeline_mode = #tpu.pipeline_mode<synchronous>, transform_indices = @transform_0, window_bounds = array<i64: 2, 512>}, {pipeline_mode = #tpu.pipeline_mode<synchronous>, transform_indices = @transform_1, window_bounds = array<i64: 512, 32>}, {pipeline_mode = #tpu.pipeline_mode<synchronous>, transform_indices = @transform_2, window_bounds = array<i64: 1, 32>}, {pipeline_mode = #tpu.pipeline_mode<synchronous>, transform_indices = @transform_3, window_bounds = array<i64: 2, 16>}, {pipeline_mode = #tpu.pipeline_mode<synchronous>, transform_indices = @transform_4, window_bounds = array<i64: 16, 512>}, {pipeline_mode = #tpu.pipeline_mode<synchronous>, transform_indices = @transform_5, window_bounds = array<i64: 1, 512>}, {pipeline_mode = #tpu.pipeline_mode<synchronous>, transform_indices = @transform_6, window_bounds = array<i64: 2, 32>}, {pipeline_mode = #tpu.pipeline_mode<synchronous>, transform_indices = @transform_7, window_bounds = array<i64: 2, 512>}]} {
    %c0 = arith.constant 0 : index
    %c0_0 = arith.constant 0 : index
    %0 = vector.load %arg1[%c0, %c0_0] : memref<2x512xbf16, #tpu.memory_space<vmem>>, vector<2x512xbf16>
    %c0_1 = arith.constant 0 : index
    %c0_2 = arith.constant 0 : index
    %1 = vector.load %arg2[%c0_1, %c0_2] : memref<512x32xbf16, #tpu.memory_space<vmem>>, vector<512x32xbf16>
    %cst = arith.constant dense<0.000000e+00> : vector<2x32xf32>
    %2 = tpu.matmul %0, %1, %cst {dimension_numbers = #tpu.dot_dimension_numbers<[1], [0], [0], [1], [0, 0, 1, 1], [], []>} : vector<2x512xbf16>, vector<512x32xbf16>, vector<2x32xf32> -> vector<2x32xf32>
    %c0_3 = arith.constant 0 : index
    %c0_4 = arith.constant 0 : index
    %3 = vector.load %arg3[%c0_3, %c0_4] : memref<1x32xf32, #tpu.memory_space<vmem>>, vector<1x32xf32>
    %4 = vector.broadcast %3 : vector<1x32xf32> to vector<2x32xf32>
    %5 = arith.addf %2, %4 : vector<2x32xf32>
    %6 = tpu.iota {dimensions = array<i32: 1>} : vector<2x32xi32>
    %c16_i32 = arith.constant 16 : i32
    %7 = vector.broadcast %c16_i32 : i32 to vector<2x32xi32>
    %8 = arith.cmpi sge, %6, %7 : vector<2x32xi32>
    %cst_5 = arith.constant 0.000000e+00 : f32
    %9 = vector.broadcast %cst_5 : f32 to vector<2x32xf32>
    %10 = arith.maximumf %5, %9 : vector<2x32xf32>
    %11 = arith.select %8, %10, %5 : vector<2x32xi1>, vector<2x32xf32>
    %c0_6 = arith.constant 0 : index
    %c0_7 = arith.constant 0 : index
    %12 = vector.load %arg7[%c0_6, %c0_7] : memref<2x32xf32, #tpu.memory_space<vmem>>, vector<2x32xf32>
    tpu.vector_store %arg7[%c0_6, %c0_7], %11 {strides = array<i32>} : memref<2x32xf32, #tpu.memory_space<vmem>>, vector<2x32xf32>,
    %13 = vector.extract_strided_slice %11 {offsets = [0, 0], sizes = [2, 16], strides = [1, 1]} : vector<2x32xf32> to vector<2x16xf32>
    %14 = vector.extract_strided_slice %11 {offsets = [0, 16], sizes = [2, 16], strides = [1, 1]} : vector<2x32xf32> to vector<2x16xf32>
    %c0_8 = arith.constant 0 : index
    %c0_9 = arith.constant 0 : index
    %15 = vector.load %arg4[%c0_8, %c0_9] : memref<2x16xf32, #tpu.memory_space<vmem>>, vector<2x16xf32>
    %cst_10 = arith.constant 5.000000e-01 : f32
    %16 = vector.broadcast %cst_10 : f32 to vector<2x16xf32>
    %17 = arith.mulf %16, %14 : vector<2x16xf32>
    %18 = math.exp %17 : vector<2x16xf32>
    %19 = arith.mulf %15, %18 : vector<2x16xf32>
    %20 = arith.addf %13, %19 : vector<2x16xf32>
    %21 = arith.truncf %20 : vector<2x16xf32> to vector<2x16xbf16>
    %c0_11 = arith.constant 0 : index
    %c0_12 = arith.constant 0 : index
    %22 = vector.load %arg5[%c0_11, %c0_12] : memref<16x512xbf16, #tpu.memory_space<vmem>>, vector<16x512xbf16>
    %cst_13 = arith.constant dense<0.000000e+00> : vector<2x512xf32>
    %23 = tpu.matmul %21, %22, %cst_13 {dimension_numbers = #tpu.dot_dimension_numbers<[1], [0], [0], [1], [0, 0, 1, 1], [], []>} : vector<2x16xbf16>, vector<16x512xbf16>, vector<2x512xf32> -> vector<2x512xf32>
    %c0_14 = arith.constant 0 : index
    %c0_15 = arith.constant 0 : index
    %24 = vector.load %arg6[%c0_14, %c0_15] : memref<1x512xf32, #tpu.memory_space<vmem>>, vector<1x512xf32>
    %25 = vector.broadcast %24 : vector<1x512xf32> to vector<2x512xf32>
    %26 = arith.addf %23, %25 : vector<2x512xf32>
    %27 = arith.truncf %26 : vector<2x512xf32> to vector<2x512xbf16>
    %c0_16 = arith.constant 0 : index
    %c0_17 = arith.constant 0 : index
    %28 = vector.load %arg8[%c0_16, %c0_17] : memref<2x512xbf16, #tpu.memory_space<vmem>>, vector<2x512xbf16>
    tpu.vector_store %arg8[%c0_16, %c0_17], %27 {strides = array<i32>} : memref<2x512xbf16, #tpu.memory_space<vmem>>, vector<2x512xbf16>,
    return
  }
  func.func @transform_0(%arg0: i32) -> (i32, i32) {
    %c0_i32 = arith.constant 0 : i32
    %c0_i32_0 = arith.constant 0 : i32
    %c0_i32_1 = arith.constant 0 : i32
    return %c0_i32, %c0_i32_0 : i32, i32
  }
  func.func @transform_1(%arg0: i32) -> (i32, i32) {
    %c0_i32 = arith.constant 0 : i32
    %c0_i32_0 = arith.constant 0 : i32
    %c0_i32_1 = arith.constant 0 : i32
    return %c0_i32, %c0_i32_0 : i32, i32
  }
  func.func @transform_2(%arg0: i32) -> (i32, i32) {
    %c0_i32 = arith.constant 0 : i32
    %c0_i32_0 = arith.constant 0 : i32
    %c0_i32_1 = arith.constant 0 : i32
    return %c0_i32, %c0_i32_0 : i32, i32
  }
  func.func @transform_3(%arg0: i32) -> (i32, i32) {
    %c0_i32 = arith.constant 0 : i32
    %c0_i32_0 = arith.constant 0 : i32
    %c0_i32_1 = arith.constant 0 : i32
    return %c0_i32, %c0_i32_0 : i32, i32
  }
  func.func @transform_4(%arg0: i32) -> (i32, i32) {
    %c0_i32 = arith.constant 0 : i32
    %c0_i32_0 = arith.constant 0 : i32
    %c0_i32_1 = arith.constant 0 : i32
    return %c0_i32, %c0_i32_0 : i32, i32
  }
  func.func @transform_5(%arg0: i32) -> (i32, i32) {
    %c0_i32 = arith.constant 0 : i32
    %c0_i32_0 = arith.constant 0 : i32
    %c0_i32_1 = arith.constant 0 : i32
    return %c0_i32, %c0_i32_0 : i32, i32
  }
  func.func @transform_6(%arg0: i32) -> (i32, i32) {
    %c0_i32 = arith.constant 0 : i32
    %c0_i32_0 = arith.constant 0 : i32
    %c0_i32_1 = arith.constant 0 : i32
    return %c0_i32, %c0_i32_0 : i32, i32
  }
  func.func @transform_7(%arg0: i32) -> (i32, i32) {
    %c0_i32 = arith.constant 0 : i32
    %c0_i32_0 = arith.constant 0 : i32
    %c0_i32_1 = arith.constant 0 : i32
    return %c0_i32, %c0_i32_0 : i32, i32
  }
}

module attributes {stable_mosaic.version = 11 : i64} {
  func.func @_fused_conv_bn_relu_kernel(%arg0: i32, %arg1: memref<16x1024xbf16, #tpu.memory_space<vmem>>, %arg2: memref<1024x128xbf16, #tpu.memory_space<vmem>>, %arg3: memref<1x128xf32, #tpu.memory_space<vmem>>, %arg4: memref<1x128xf32, #tpu.memory_space<vmem>>, %arg5: memref<1x128xf32, #tpu.memory_space<vmem>>, %arg6: memref<16x128xbf16, #tpu.memory_space<vmem>>) attributes {dimension_semantics = [#tpu.dimension_semantics<arbitrary>], iteration_bounds = array<i64: 1>, scalar_prefetch = 0 : i64, scratch_operands = 0 : i64, tpu.core_type = #tpu.core_type<tc>, window_params = [{pipeline_mode = #tpu.pipeline_mode<synchronous>, transform_indices = @transform_0, window_bounds = array<i64: 16, 1024>}, {pipeline_mode = #tpu.pipeline_mode<synchronous>, transform_indices = @transform_1, window_bounds = array<i64: 1024, 128>}, {pipeline_mode = #tpu.pipeline_mode<synchronous>, transform_indices = @transform_2, window_bounds = array<i64: 1, 128>}, {pipeline_mode = #tpu.pipeline_mode<synchronous>, transform_indices = @transform_3, window_bounds = array<i64: 1, 128>}, {pipeline_mode = #tpu.pipeline_mode<synchronous>, transform_indices = @transform_4, window_bounds = array<i64: 1, 128>}, {pipeline_mode = #tpu.pipeline_mode<synchronous>, transform_indices = @transform_5, window_bounds = array<i64: 16, 128>}]} {
    %c0 = arith.constant 0 : index
    %c0_0 = arith.constant 0 : index
    %0 = vector.load %arg1[%c0, %c0_0] : memref<16x1024xbf16, #tpu.memory_space<vmem>>, vector<16x1024xbf16>
    %c0_1 = arith.constant 0 : index
    %c0_2 = arith.constant 0 : index
    %1 = vector.load %arg2[%c0_1, %c0_2] : memref<1024x128xbf16, #tpu.memory_space<vmem>>, vector<1024x128xbf16>
    %cst = arith.constant dense<0.000000e+00> : vector<16x128xf32>
    %2 = tpu.matmul %0, %1, %cst {dimension_numbers = #tpu.dot_dimension_numbers<[1], [0], [0], [1], [0, 0, 1, 1], [], []>} : vector<16x1024xbf16>, vector<1024x128xbf16>, vector<16x128xf32> -> vector<16x128xf32>
    %c0_3 = arith.constant 0 : index
    %c0_4 = arith.constant 0 : index
    %3 = vector.load %arg3[%c0_3, %c0_4] : memref<1x128xf32, #tpu.memory_space<vmem>>, vector<1x128xf32>
    %4 = vector.broadcast %3 : vector<1x128xf32> to vector<16x128xf32>
    %5 = arith.addf %2, %4 : vector<16x128xf32>
    %6 = tpu.iota {dimensions = array<i32: 0>} : vector<16x1xi32>
    %c8_i32 = arith.constant 8 : i32
    %7 = vector.broadcast %c8_i32 : i32 to vector<16x1xi32>
    %8 = arith.cmpi slt, %6, %7 : vector<16x1xi32>
    %9 = arith.extui %8 : vector<16x1xi1> to vector<16x1xi32>
    %10 = arith.sitofp %9 : vector<16x1xi32> to vector<16x1xf32>
    %11 = vector.broadcast %10 : vector<16x1xf32> to vector<16x128xf32>
    %12 = arith.mulf %5, %11 : vector<16x128xf32>
    %cst_5 = arith.constant dense<0.000000e+00> : vector<128xf32>
    %13 = vector.multi_reduction <add>, %12, %cst_5 [0] : vector<16x128xf32> to vector<128xf32>
    %14 = vector.shape_cast %13 : vector<128xf32> to vector<1x128xf32>
    %cst_6 = arith.constant 8.000000e+00 : f32
    %15 = vector.broadcast %cst_6 : f32 to vector<1x128xf32>
    %16 = arith.divf %14, %15 : vector<1x128xf32>
    %17 = vector.broadcast %16 : vector<1x128xf32> to vector<16x128xf32>
    %18 = arith.subf %5, %17 : vector<16x128xf32>
    %19 = vector.broadcast %10 : vector<16x1xf32> to vector<16x128xf32>
    %20 = arith.mulf %18, %19 : vector<16x128xf32>
    %21 = arith.mulf %20, %20 : vector<16x128xf32>
    %cst_7 = arith.constant dense<0.000000e+00> : vector<128xf32>
    %22 = vector.multi_reduction <add>, %21, %cst_7 [0] : vector<16x128xf32> to vector<128xf32>
    %23 = vector.shape_cast %22 : vector<128xf32> to vector<1x128xf32>
    %cst_8 = arith.constant 8.000000e+00 : f32
    %24 = vector.broadcast %cst_8 : f32 to vector<1x128xf32>
    %25 = arith.divf %23, %24 : vector<1x128xf32>
    %cst_9 = arith.constant 9.99999974E-6 : f32
    %26 = vector.broadcast %cst_9 : f32 to vector<1x128xf32>
    %27 = arith.addf %25, %26 : vector<1x128xf32>
    %28 = math.rsqrt %27 : vector<1x128xf32>
    %c0_10 = arith.constant 0 : index
    %c0_11 = arith.constant 0 : index
    %29 = vector.load %arg4[%c0_10, %c0_11] : memref<1x128xf32, #tpu.memory_space<vmem>>, vector<1x128xf32>
    %30 = arith.mulf %29, %28 : vector<1x128xf32>
    %c0_12 = arith.constant 0 : index
    %c0_13 = arith.constant 0 : index
    %31 = vector.load %arg5[%c0_12, %c0_13] : memref<1x128xf32, #tpu.memory_space<vmem>>, vector<1x128xf32>
    %32 = arith.mulf %16, %30 : vector<1x128xf32>
    %33 = arith.subf %31, %32 : vector<1x128xf32>
    %34 = vector.broadcast %30 : vector<1x128xf32> to vector<16x128xf32>
    %35 = arith.mulf %5, %34 : vector<16x128xf32>
    %36 = vector.broadcast %33 : vector<1x128xf32> to vector<16x128xf32>
    %37 = arith.addf %35, %36 : vector<16x128xf32>
    %cst_14 = arith.constant 0.000000e+00 : f32
    %38 = vector.broadcast %cst_14 : f32 to vector<16x128xf32>
    %39 = arith.maximumf %37, %38 : vector<16x128xf32>
    %40 = arith.truncf %39 : vector<16x128xf32> to vector<16x128xbf16>
    %c0_15 = arith.constant 0 : index
    %c0_16 = arith.constant 0 : index
    %41 = vector.load %arg6[%c0_15, %c0_16] : memref<16x128xbf16, #tpu.memory_space<vmem>>, vector<16x128xbf16>
    tpu.vector_store %arg6[%c0_15, %c0_16], %40 {strides = array<i32>} : memref<16x128xbf16, #tpu.memory_space<vmem>>, vector<16x128xbf16>,
    return
  }
  func.func @transform_0(%arg0: i32) -> (i32, i32) {
    %c0_i32 = arith.constant 0 : i32
    %c0_i32_0 = arith.constant 0 : i32
    %c0_i32_1 = arith.constant 0 : i32
    return %c0_i32, %c0_i32_0 : i32, i32
  }
  func.func @transform_1(%arg0: i32) -> (i32, i32) {
    %c0_i32 = arith.constant 0 : i32
    %c0_i32_0 = arith.constant 0 : i32
    %c0_i32_1 = arith.constant 0 : i32
    return %c0_i32, %c0_i32_0 : i32, i32
  }
  func.func @transform_2(%arg0: i32) -> (i32, i32) {
    %c0_i32 = arith.constant 0 : i32
    %c0_i32_0 = arith.constant 0 : i32
    %c0_i32_1 = arith.constant 0 : i32
    return %c0_i32, %c0_i32_0 : i32, i32
  }
  func.func @transform_3(%arg0: i32) -> (i32, i32) {
    %c0_i32 = arith.constant 0 : i32
    %c0_i32_0 = arith.constant 0 : i32
    %c0_i32_1 = arith.constant 0 : i32
    return %c0_i32, %c0_i32_0 : i32, i32
  }
  func.func @transform_4(%arg0: i32) -> (i32, i32) {
    %c0_i32 = arith.constant 0 : i32
    %c0_i32_0 = arith.constant 0 : i32
    %c0_i32_1 = arith.constant 0 : i32
    return %c0_i32, %c0_i32_0 : i32, i32
  }
  func.func @transform_5(%arg0: i32) -> (i32, i32) {
    %c0_i32 = arith.constant 0 : i32
    %c0_i32_0 = arith.constant 0 : i32
    %c0_i32_1 = arith.constant 0 : i32
    return %c0_i32, %c0_i32_0 : i32, i32
  }
}

module attributes {stable_mosaic.version = 11 : i64} {
  func.func @_fused_conv_bn_relu_kernel(%arg0: i32, %arg1: memref<16x1152xbf16, #tpu.memory_space<vmem>>, %arg2: memref<1152x256xbf16, #tpu.memory_space<vmem>>, %arg3: memref<1x256xf32, #tpu.memory_space<vmem>>, %arg4: memref<1x64xf32, #tpu.memory_space<vmem>>, %arg5: memref<1x64xf32, #tpu.memory_space<vmem>>, %arg6: memref<16x256xbf16, #tpu.memory_space<vmem>>) attributes {dimension_semantics = [#tpu.dimension_semantics<arbitrary>], iteration_bounds = array<i64: 1>, scalar_prefetch = 0 : i64, scratch_operands = 0 : i64, tpu.core_type = #tpu.core_type<tc>, window_params = [{pipeline_mode = #tpu.pipeline_mode<synchronous>, transform_indices = @transform_0, window_bounds = array<i64: 16, 1152>}, {pipeline_mode = #tpu.pipeline_mode<synchronous>, transform_indices = @transform_1, window_bounds = array<i64: 1152, 256>}, {pipeline_mode = #tpu.pipeline_mode<synchronous>, transform_indices = @transform_2, window_bounds = array<i64: 1, 256>}, {pipeline_mode = #tpu.pipeline_mode<synchronous>, transform_indices = @transform_3, window_bounds = array<i64: 1, 64>}, {pipeline_mode = #tpu.pipeline_mode<synchronous>, transform_indices = @transform_4, window_bounds = array<i64: 1, 64>}, {pipeline_mode = #tpu.pipeline_mode<synchronous>, transform_indices = @transform_5, window_bounds = array<i64: 16, 256>}]} {
    %c0 = arith.constant 0 : index
    %c0_0 = arith.constant 0 : index
    %0 = vector.load %arg1[%c0, %c0_0] : memref<16x1152xbf16, #tpu.memory_space<vmem>>, vector<16x1152xbf16>
    %c0_1 = arith.constant 0 : index
    %c0_2 = arith.constant 0 : index
    %1 = vector.load %arg2[%c0_1, %c0_2] : memref<1152x256xbf16, #tpu.memory_space<vmem>>, vector<1152x256xbf16>
    %cst = arith.constant dense<0.000000e+00> : vector<16x256xf32>
    %2 = tpu.matmul %0, %1, %cst {dimension_numbers = #tpu.dot_dimension_numbers<[1], [0], [0], [1], [0, 0, 1, 1], [], []>} : vector<16x1152xbf16>, vector<1152x256xbf16>, vector<16x256xf32> -> vector<16x256xf32>
    %c0_3 = arith.constant 0 : index
    %c0_4 = arith.constant 0 : index
    %3 = vector.load %arg3[%c0_3, %c0_4] : memref<1x256xf32, #tpu.memory_space<vmem>>, vector<1x256xf32>
    %4 = vector.broadcast %3 : vector<1x256xf32> to vector<16x256xf32>
    %5 = arith.addf %2, %4 : vector<16x256xf32>
    %6 = tpu.iota {dimensions = array<i32: 0>} : vector<16x1xi32>
    %c8_i32 = arith.constant 8 : i32
    %7 = vector.broadcast %c8_i32 : i32 to vector<16x1xi32>
    %8 = arith.cmpi slt, %6, %7 : vector<16x1xi32>
    %9 = arith.extui %8 : vector<16x1xi1> to vector<16x1xi32>
    %10 = arith.sitofp %9 : vector<16x1xi32> to vector<16x1xf32>
    %11 = vector.broadcast %10 : vector<16x1xf32> to vector<16x256xf32>
    %12 = arith.mulf %5, %11 : vector<16x256xf32>
    %cst_5 = arith.constant dense<0.000000e+00> : vector<256xf32>
    %13 = vector.multi_reduction <add>, %12, %cst_5 [0] : vector<16x256xf32> to vector<256xf32>
    %14 = vector.shape_cast %13 : vector<256xf32> to vector<1x256xf32>
    %15 = vector.extract_strided_slice %14 {offsets = [0, 0], sizes = [1, 64], strides = [1, 1]} : vector<1x256xf32> to vector<1x64xf32>
    %16 = vector.extract_strided_slice %14 {offsets = [0, 64], sizes = [1, 64], strides = [1, 1]} : vector<1x256xf32> to vector<1x64xf32>
    %17 = arith.addf %15, %16 : vector<1x64xf32>
    %18 = vector.extract_strided_slice %14 {offsets = [0, 128], sizes = [1, 64], strides = [1, 1]} : vector<1x256xf32> to vector<1x64xf32>
    %19 = arith.addf %17, %18 : vector<1x64xf32>
    %20 = vector.extract_strided_slice %14 {offsets = [0, 192], sizes = [1, 64], strides = [1, 1]} : vector<1x256xf32> to vector<1x64xf32>
    %21 = arith.addf %19, %20 : vector<1x64xf32>
    %cst_6 = arith.constant 3.200000e+01 : f32
    %22 = vector.broadcast %cst_6 : f32 to vector<1x64xf32>
    %23 = arith.divf %21, %22 : vector<1x64xf32>
    %24 = tpu.concatenate %23, %23, %23, %23 in 1 : vector<1x64xf32>, vector<1x64xf32>, vector<1x64xf32>, vector<1x64xf32> -> vector<1x256xf32>
    %25 = vector.broadcast %24 : vector<1x256xf32> to vector<16x256xf32>
    %26 = arith.subf %5, %25 : vector<16x256xf32>
    %27 = vector.broadcast %10 : vector<16x1xf32> to vector<16x256xf32>
    %28 = arith.mulf %26, %27 : vector<16x256xf32>
    %29 = arith.mulf %28, %28 : vector<16x256xf32>
    %cst_7 = arith.constant dense<0.000000e+00> : vector<256xf32>
    %30 = vector.multi_reduction <add>, %29, %cst_7 [0] : vector<16x256xf32> to vector<256xf32>
    %31 = vector.shape_cast %30 : vector<256xf32> to vector<1x256xf32>
    %32 = vector.extract_strided_slice %31 {offsets = [0, 0], sizes = [1, 64], strides = [1, 1]} : vector<1x256xf32> to vector<1x64xf32>
    %33 = vector.extract_strided_slice %31 {offsets = [0, 64], sizes = [1, 64], strides = [1, 1]} : vector<1x256xf32> to vector<1x64xf32>
    %34 = arith.addf %32, %33 : vector<1x64xf32>
    %35 = vector.extract_strided_slice %31 {offsets = [0, 128], sizes = [1, 64], strides = [1, 1]} : vector<1x256xf32> to vector<1x64xf32>
    %36 = arith.addf %34, %35 : vector<1x64xf32>
    %37 = vector.extract_strided_slice %31 {offsets = [0, 192], sizes = [1, 64], strides = [1, 1]} : vector<1x256xf32> to vector<1x64xf32>
    %38 = arith.addf %36, %37 : vector<1x64xf32>
    %cst_8 = arith.constant 3.200000e+01 : f32
    %39 = vector.broadcast %cst_8 : f32 to vector<1x64xf32>
    %40 = arith.divf %38, %39 : vector<1x64xf32>
    %cst_9 = arith.constant 9.99999974E-6 : f32
    %41 = vector.broadcast %cst_9 : f32 to vector<1x64xf32>
    %42 = arith.addf %40, %41 : vector<1x64xf32>
    %43 = math.rsqrt %42 : vector<1x64xf32>
    %c0_10 = arith.constant 0 : index
    %c0_11 = arith.constant 0 : index
    %44 = vector.load %arg4[%c0_10, %c0_11] : memref<1x64xf32, #tpu.memory_space<vmem>>, vector<1x64xf32>
    %45 = arith.mulf %44, %43 : vector<1x64xf32>
    %c0_12 = arith.constant 0 : index
    %c0_13 = arith.constant 0 : index
    %46 = vector.load %arg5[%c0_12, %c0_13] : memref<1x64xf32, #tpu.memory_space<vmem>>, vector<1x64xf32>
    %47 = arith.mulf %23, %45 : vector<1x64xf32>
    %48 = arith.subf %46, %47 : vector<1x64xf32>
    %49 = tpu.concatenate %45, %45, %45, %45 in 1 : vector<1x64xf32>, vector<1x64xf32>, vector<1x64xf32>, vector<1x64xf32> -> vector<1x256xf32>
    %50 = tpu.concatenate %48, %48, %48, %48 in 1 : vector<1x64xf32>, vector<1x64xf32>, vector<1x64xf32>, vector<1x64xf32> -> vector<1x256xf32>
    %51 = vector.broadcast %49 : vector<1x256xf32> to vector<16x256xf32>
    %52 = arith.mulf %5, %51 : vector<16x256xf32>
    %53 = vector.broadcast %50 : vector<1x256xf32> to vector<16x256xf32>
    %54 = arith.addf %52, %53 : vector<16x256xf32>
    %cst_14 = arith.constant 0.000000e+00 : f32
    %55 = vector.broadcast %cst_14 : f32 to vector<16x256xf32>
    %56 = arith.maximumf %54, %55 : vector<16x256xf32>
    %57 = arith.truncf %56 : vector<16x256xf32> to vector<16x256xbf16>
    %c0_15 = arith.constant 0 : index
    %c0_16 = arith.constant 0 : index
    %58 = vector.load %arg6[%c0_15, %c0_16] : memref<16x256xbf16, #tpu.memory_space<vmem>>, vector<16x256xbf16>
    tpu.vector_store %arg6[%c0_15, %c0_16], %57 {strides = array<i32>} : memref<16x256xbf16, #tpu.memory_space<vmem>>, vector<16x256xbf16>,
    return
  }
  func.func @transform_0(%arg0: i32) -> (i32, i32) {
    %c0_i32 = arith.constant 0 : i32
    %c0_i32_0 = arith.constant 0 : i32
    %c0_i32_1 = arith.constant 0 : i32
    return %c0_i32, %c0_i32_0 : i32, i32
  }
  func.func @transform_1(%arg0: i32) -> (i32, i32) {
    %c0_i32 = arith.constant 0 : i32
    %c0_i32_0 = arith.constant 0 : i32
    %c0_i32_1 = arith.constant 0 : i32
    return %c0_i32, %c0_i32_0 : i32, i32
  }
  func.func @transform_2(%arg0: i32) -> (i32, i32) {
    %c0_i32 = arith.constant 0 : i32
    %c0_i32_0 = arith.constant 0 : i32
    %c0_i32_1 = arith.constant 0 : i32
    return %c0_i32, %c0_i32_0 : i32, i32
  }
  func.func @transform_3(%arg0: i32) -> (i32, i32) {
    %c0_i32 = arith.constant 0 : i32
    %c0_i32_0 = arith.constant 0 : i32
    %c0_i32_1 = arith.constant 0 : i32
    return %c0_i32, %c0_i32_0 : i32, i32
  }
  func.func @transform_4(%arg0: i32) -> (i32, i32) {
    %c0_i32 = arith.constant 0 : i32
    %c0_i32_0 = arith.constant 0 : i32
    %c0_i32_1 = arith.constant 0 : i32
    return %c0_i32, %c0_i32_0 : i32, i32
  }
  func.func @transform_5(%arg0: i32) -> (i32, i32) {
    %c0_i32 = arith.constant 0 : i32
    %c0_i32_0 = arith.constant 0 : i32
    %c0_i32_1 = arith.constant 0 : i32
    return %c0_i32, %c0_i32_0 : i32, i32
  }
}

module attributes {stable_mosaic.version = 11 : i64} {
  func.func @_fused_conv_bn_relu_kernel(%arg0: i32, %arg1: memref<32x576xbf16, #tpu.memory_space<vmem>>, %arg2: memref<576x128xbf16, #tpu.memory_space<vmem>>, %arg3: memref<1x128xf32, #tpu.memory_space<vmem>>, %arg4: memref<1x32xf32, #tpu.memory_space<vmem>>, %arg5: memref<1x32xf32, #tpu.memory_space<vmem>>, %arg6: memref<32x128xbf16, #tpu.memory_space<vmem>>) attributes {dimension_semantics = [#tpu.dimension_semantics<arbitrary>], iteration_bounds = array<i64: 1>, scalar_prefetch = 0 : i64, scratch_operands = 0 : i64, tpu.core_type = #tpu.core_type<tc>, window_params = [{pipeline_mode = #tpu.pipeline_mode<synchronous>, transform_indices = @transform_0, window_bounds = array<i64: 32, 576>}, {pipeline_mode = #tpu.pipeline_mode<synchronous>, transform_indices = @transform_1, window_bounds = array<i64: 576, 128>}, {pipeline_mode = #tpu.pipeline_mode<synchronous>, transform_indices = @transform_2, window_bounds = array<i64: 1, 128>}, {pipeline_mode = #tpu.pipeline_mode<synchronous>, transform_indices = @transform_3, window_bounds = array<i64: 1, 32>}, {pipeline_mode = #tpu.pipeline_mode<synchronous>, transform_indices = @transform_4, window_bounds = array<i64: 1, 32>}, {pipeline_mode = #tpu.pipeline_mode<synchronous>, transform_indices = @transform_5, window_bounds = array<i64: 32, 128>}]} {
    %c0 = arith.constant 0 : index
    %c0_0 = arith.constant 0 : index
    %0 = vector.load %arg1[%c0, %c0_0] : memref<32x576xbf16, #tpu.memory_space<vmem>>, vector<32x576xbf16>
    %c0_1 = arith.constant 0 : index
    %c0_2 = arith.constant 0 : index
    %1 = vector.load %arg2[%c0_1, %c0_2] : memref<576x128xbf16, #tpu.memory_space<vmem>>, vector<576x128xbf16>
    %cst = arith.constant dense<0.000000e+00> : vector<32x128xf32>
    %2 = tpu.matmul %0, %1, %cst {dimension_numbers = #tpu.dot_dimension_numbers<[1], [0], [0], [1], [0, 0, 1, 1], [], []>} : vector<32x576xbf16>, vector<576x128xbf16>, vector<32x128xf32> -> vector<32x128xf32>
    %c0_3 = arith.constant 0 : index
    %c0_4 = arith.constant 0 : index
    %3 = vector.load %arg3[%c0_3, %c0_4] : memref<1x128xf32, #tpu.memory_space<vmem>>, vector<1x128xf32>
    %4 = vector.broadcast %3 : vector<1x128xf32> to vector<32x128xf32>
    %5 = arith.addf %2, %4 : vector<32x128xf32>
    %cst_5 = arith.constant dense<0.000000e+00> : vector<128xf32>
    %6 = vector.multi_reduction <add>, %5, %cst_5 [0] : vector<32x128xf32> to vector<128xf32>
    %7 = vector.shape_cast %6 : vector<128xf32> to vector<1x128xf32>
    %8 = vector.extract_strided_slice %7 {offsets = [0, 0], sizes = [1, 32], strides = [1, 1]} : vector<1x128xf32> to vector<1x32xf32>
    %9 = vector.extract_strided_slice %7 {offsets = [0, 32], sizes = [1, 32], strides = [1, 1]} : vector<1x128xf32> to vector<1x32xf32>
    %10 = arith.addf %8, %9 : vector<1x32xf32>
    %11 = vector.extract_strided_slice %7 {offsets = [0, 64], sizes = [1, 32], strides = [1, 1]} : vector<1x128xf32> to vector<1x32xf32>
    %12 = arith.addf %10, %11 : vector<1x32xf32>
    %13 = vector.extract_strided_slice %7 {offsets = [0, 96], sizes = [1, 32], strides = [1, 1]} : vector<1x128xf32> to vector<1x32xf32>
    %14 = arith.addf %12, %13 : vector<1x32xf32>
    %cst_6 = arith.constant 1.280000e+02 : f32
    %15 = vector.broadcast %cst_6 : f32 to vector<1x32xf32>
    %16 = arith.divf %14, %15 : vector<1x32xf32>
    %17 = tpu.concatenate %16, %16, %16, %16 in 1 : vector<1x32xf32>, vector<1x32xf32>, vector<1x32xf32>, vector<1x32xf32> -> vector<1x128xf32>
    %18 = vector.broadcast %17 : vector<1x128xf32> to vector<32x128xf32>
    %19 = arith.subf %5, %18 : vector<32x128xf32>
    %20 = arith.mulf %19, %19 : vector<32x128xf32>
    %cst_7 = arith.constant dense<0.000000e+00> : vector<128xf32>
    %21 = vector.multi_reduction <add>, %20, %cst_7 [0] : vector<32x128xf32> to vector<128xf32>
    %22 = vector.shape_cast %21 : vector<128xf32> to vector<1x128xf32>
    %23 = vector.extract_strided_slice %22 {offsets = [0, 0], sizes = [1, 32], strides = [1, 1]} : vector<1x128xf32> to vector<1x32xf32>
    %24 = vector.extract_strided_slice %22 {offsets = [0, 32], sizes = [1, 32], strides = [1, 1]} : vector<1x128xf32> to vector<1x32xf32>
    %25 = arith.addf %23, %24 : vector<1x32xf32>
    %26 = vector.extract_strided_slice %22 {offsets = [0, 64], sizes = [1, 32], strides = [1, 1]} : vector<1x128xf32> to vector<1x32xf32>
    %27 = arith.addf %25, %26 : vector<1x32xf32>
    %28 = vector.extract_strided_slice %22 {offsets = [0, 96], sizes = [1, 32], strides = [1, 1]} : vector<1x128xf32> to vector<1x32xf32>
    %29 = arith.addf %27, %28 : vector<1x32xf32>
    %cst_8 = arith.constant 1.280000e+02 : f32
    %30 = vector.broadcast %cst_8 : f32 to vector<1x32xf32>
    %31 = arith.divf %29, %30 : vector<1x32xf32>
    %cst_9 = arith.constant 9.99999974E-6 : f32
    %32 = vector.broadcast %cst_9 : f32 to vector<1x32xf32>
    %33 = arith.addf %31, %32 : vector<1x32xf32>
    %34 = math.rsqrt %33 : vector<1x32xf32>
    %c0_10 = arith.constant 0 : index
    %c0_11 = arith.constant 0 : index
    %35 = vector.load %arg4[%c0_10, %c0_11] : memref<1x32xf32, #tpu.memory_space<vmem>>, vector<1x32xf32>
    %36 = arith.mulf %35, %34 : vector<1x32xf32>
    %c0_12 = arith.constant 0 : index
    %c0_13 = arith.constant 0 : index
    %37 = vector.load %arg5[%c0_12, %c0_13] : memref<1x32xf32, #tpu.memory_space<vmem>>, vector<1x32xf32>
    %38 = arith.mulf %16, %36 : vector<1x32xf32>
    %39 = arith.subf %37, %38 : vector<1x32xf32>
    %40 = tpu.concatenate %36, %36, %36, %36 in 1 : vector<1x32xf32>, vector<1x32xf32>, vector<1x32xf32>, vector<1x32xf32> -> vector<1x128xf32>
    %41 = tpu.concatenate %39, %39, %39, %39 in 1 : vector<1x32xf32>, vector<1x32xf32>, vector<1x32xf32>, vector<1x32xf32> -> vector<1x128xf32>
    %42 = vector.broadcast %40 : vector<1x128xf32> to vector<32x128xf32>
    %43 = arith.mulf %5, %42 : vector<32x128xf32>
    %44 = vector.broadcast %41 : vector<1x128xf32> to vector<32x128xf32>
    %45 = arith.addf %43, %44 : vector<32x128xf32>
    %cst_14 = arith.constant 0.000000e+00 : f32
    %46 = vector.broadcast %cst_14 : f32 to vector<32x128xf32>
    %47 = arith.maximumf %45, %46 : vector<32x128xf32>
    %48 = arith.truncf %47 : vector<32x128xf32> to vector<32x128xbf16>
    %c0_15 = arith.constant 0 : index
    %c0_16 = arith.constant 0 : index
    %49 = vector.load %arg6[%c0_15, %c0_16] : memref<32x128xbf16, #tpu.memory_space<vmem>>, vector<32x128xbf16>
    tpu.vector_store %arg6[%c0_15, %c0_16], %48 {strides = array<i32>} : memref<32x128xbf16, #tpu.memory_space<vmem>>, vector<32x128xbf16>,
    return
  }
  func.func @transform_0(%arg0: i32) -> (i32, i32) {
    %c0_i32 = arith.constant 0 : i32
    %c0_i32_0 = arith.constant 0 : i32
    %c0_i32_1 = arith.constant 0 : i32
    return %c0_i32, %c0_i32_0 : i32, i32
  }
  func.func @transform_1(%arg0: i32) -> (i32, i32) {
    %c0_i32 = arith.constant 0 : i32
    %c0_i32_0 = arith.constant 0 : i32
    %c0_i32_1 = arith.constant 0 : i32
    return %c0_i32, %c0_i32_0 : i32, i32
  }
  func.func @transform_2(%arg0: i32) -> (i32, i32) {
    %c0_i32 = arith.constant 0 : i32
    %c0_i32_0 = arith.constant 0 : i32
    %c0_i32_1 = arith.constant 0 : i32
    return %c0_i32, %c0_i32_0 : i32, i32
  }
  func.func @transform_3(%arg0: i32) -> (i32, i32) {
    %c0_i32 = arith.constant 0 : i32
    %c0_i32_0 = arith.constant 0 : i32
    %c0_i32_1 = arith.constant 0 : i32
    return %c0_i32, %c0_i32_0 : i32, i32
  }
  func.func @transform_4(%arg0: i32) -> (i32, i32) {
    %c0_i32 = arith.constant 0 : i32
    %c0_i32_0 = arith.constant 0 : i32
    %c0_i32_1 = arith.constant 0 : i32
    return %c0_i32, %c0_i32_0 : i32, i32
  }
  func.func @transform_5(%arg0: i32) -> (i32, i32) {
    %c0_i32 = arith.constant 0 : i32
    %c0_i32_0 = arith.constant 0 : i32
    %c0_i32_1 = arith.constant 0 : i32
    return %c0_i32, %c0_i32_0 : i32, i32
  }
}

module attributes {stable_mosaic.version = 11 : i64} {
  func.func @_mm_act_kernel(%arg0: i32, %arg1: memref<128x288xbf16, #tpu.memory_space<vmem>>, %arg2: memref<288x12xbf16, #tpu.memory_space<vmem>>, %arg3: memref<1x12xf32, #tpu.memory_space<vmem>>, %arg4: memref<128x12xf32, #tpu.memory_space<vmem>>) attributes {dimension_semantics = [#tpu.dimension_semantics<parallel>], iteration_bounds = array<i64: 1>, scalar_prefetch = 0 : i64, scratch_operands = 0 : i64, tpu.core_type = #tpu.core_type<tc>, window_params = [{transform_indices = @transform_0, window_bounds = array<i64: 128, 288>}, {pipeline_mode = #tpu.pipeline_mode<synchronous>, transform_indices = @transform_1, window_bounds = array<i64: 288, 12>}, {pipeline_mode = #tpu.pipeline_mode<synchronous>, transform_indices = @transform_2, window_bounds = array<i64: 1, 12>}, {transform_indices = @transform_3, window_bounds = array<i64: 128, 12>}]} {
    %c0 = arith.constant 0 : index
    %c0_0 = arith.constant 0 : index
    %0 = vector.load %arg1[%c0, %c0_0] : memref<128x288xbf16, #tpu.memory_space<vmem>>, vector<128x288xbf16>
    %c0_1 = arith.constant 0 : index
    %c0_2 = arith.constant 0 : index
    %1 = vector.load %arg2[%c0_1, %c0_2] : memref<288x12xbf16, #tpu.memory_space<vmem>>, vector<288x12xbf16>
    %cst = arith.constant dense<0.000000e+00> : vector<128x12xf32>
    %2 = tpu.matmul %0, %1, %cst {dimension_numbers = #tpu.dot_dimension_numbers<[1], [0], [0], [1], [0, 0, 1, 1], [], []>} : vector<128x288xbf16>, vector<288x12xbf16>, vector<128x12xf32> -> vector<128x12xf32>
    %c0_3 = arith.constant 0 : index
    %c0_4 = arith.constant 0 : index
    %3 = vector.load %arg3[%c0_3, %c0_4] : memref<1x12xf32, #tpu.memory_space<vmem>>, vector<1x12xf32>
    %4 = vector.broadcast %3 : vector<1x12xf32> to vector<128x12xf32>
    %5 = arith.addf %2, %4 : vector<128x12xf32>
    %6 = arith.negf %5 : vector<128x12xf32>
    %7 = math.exp %6 : vector<128x12xf32>
    %cst_5 = arith.constant 1.000000e+00 : f32
    %8 = vector.broadcast %cst_5 : f32 to vector<128x12xf32>
    %9 = arith.addf %8, %7 : vector<128x12xf32>
    %10 = arith.divf %8, %9 : vector<128x12xf32>
    %c0_6 = arith.constant 0 : index
    %c0_7 = arith.constant 0 : index
    %11 = vector.load %arg4[%c0_6, %c0_7] : memref<128x12xf32, #tpu.memory_space<vmem>>, vector<128x12xf32>
    tpu.vector_store %arg4[%c0_6, %c0_7], %10 {strides = array<i32>} : memref<128x12xf32, #tpu.memory_space<vmem>>, vector<128x12xf32>,
    return
  }
  func.func @transform_0(%arg0: i32) -> (i32, i32) {
    %c0_i32 = arith.constant 0 : i32
    %c0_i32_0 = arith.constant 0 : i32
    return %arg0, %c0_i32 : i32, i32
  }
  func.func @transform_1(%arg0: i32) -> (i32, i32) {
    %c0_i32 = arith.constant 0 : i32
    %c0_i32_0 = arith.constant 0 : i32
    %c0_i32_1 = arith.constant 0 : i32
    return %c0_i32, %c0_i32_0 : i32, i32
  }
  func.func @transform_2(%arg0: i32) -> (i32, i32) {
    %c0_i32 = arith.constant 0 : i32
    %c0_i32_0 = arith.constant 0 : i32
    %c0_i32_1 = arith.constant 0 : i32
    return %c0_i32, %c0_i32_0 : i32, i32
  }
  func.func @transform_3(%arg0: i32) -> (i32, i32) {
    %c0_i32 = arith.constant 0 : i32
    %c0_i32_0 = arith.constant 0 : i32
    return %arg0, %c0_i32 : i32, i32
  }
}

</mosaic_0001>

<bundles_post_ra>
// kernel: vae_forward.7
= control target key start
LH: loop header
LB: loop body
LE: loop exit
PB: predicated region body
PF: predicated region fallthrough
CT: control target
= control target key end

     0   :  { %vm108_vm0 = vcmask 392192   ;;  %vm230_vm1 = vcmask 261120   ;;  %vm471_vm2 = vcmask 257024   ;;  %s871_s1 = inlined_call_operand.vmem [shape: bf16[48,32], index: 1, kind: input, shape index: {}]   ;;  %s872_s0 = inlined_call_operand.vmem [shape: bf16[128,48], index: 0, kind: input, shape index: {}]   ;;  %s873_s2 = inlined_call_operand.vmem [shape: f32[1,32], index: 2, kind: input, shape index: {}]   ;;  %s874_s3 = inlined_call_operand.vmem [shape: f32[1,32], index: 3, kind: input, shape index: {}]   ;;  %s875_s4 = inlined_call_operand.vmem [shape: f32[1,32], index: 4, kind: input, shape index: {}]   ;;  %s876_s5 = inlined_call_operand.vmem [shape: bf16[128,32], index: 5, kind: output, shape index: {}]  }
   0x1   :  { %v583_v0 = vld [vmem:[%s871_s1 + $0x10] sm:$0xff]   ;;  %v584_v1 = vld [vmem:[%s871_s1 + $0x8] sm:$0xff]   ;;  %v586_v2 = vld [vmem:[%s872_s0] sm:$0xff]  }
   0x2   :  { %555 = vmatprep.subr.bf16.mxu0 %v583_v0  ;;  %577 = vmatprep.subr.bf16.mxu1 %v583_v0  ;;  %v585_v3 = vld [vmem:[%s871_s1] sm:$0xff]   ;;  %v587_v5 = vld [vmem:[%s872_s0 + $0x8] sm:$0xff]   ;;  %v588_v7 = vld [vmem:[%s872_s0 + $0x10] sm:$0xff]  }
   0x3   :  { %556 = vmatpush3.bf16.msra.mxu0 %v583_v0  ;;  %580 = vmatpush3.bf16.msra.mxu1 %v583_v0  ;;  %v590_v4 = vld [vmem:[%s872_s0 + $0x20] sm:$0xff]   ;;  %v591_v6 = vld [vmem:[%s872_s0 + $0x28] sm:$0xff]   ;;  %v592_v8 = vld [vmem:[%s872_s0 + $0x30] sm:$0xff]  }
   0x4   :  { %557 = vmatprep.subr.bf16.mxu0 %v584_v1  ;;  %578 = vmatprep.subr.bf16.mxu1 %v584_v1  ;;  %v589_v9 = vld [vmem:[%s872_s0 + $0x18] sm:$0xff]   ;;  %v492_v15 = vld [vmem:[%s873_s2] ss:$0 sm:$0xff] }
   0x5   :  { %561 = vmatprep.mubr.msk.bf16.mxu0 %vm108_vm0, %v586_v2  ;;  %569 = vmatprep.mubr.msk.bf16.mxu1 %vm108_vm0, %v590_v4  ;;  %v593_v10 = vld [vmem:[%s872_s0 + $0x38] sm:$0xff]  }
   0x7   :  { %558 = vmatpush3.bf16.msra.mxu0 %v584_v1  ;;  %581 = vmatpush3.bf16.msra.mxu1 %v584_v1 }
   0x8   :  { %559 = vmatprep.subr.bf16.mxu0 %v585_v3  ;;  %579 = vmatprep.subr.bf16.mxu1 %v585_v3 }
   0xb   :  { %560 = vmatpush3.bf16.msra.mxu0 %v585_v3  ;;  %582 = vmatpush3.bf16.msra.mxu1 %v585_v3 }
   0xe   :  { %562 = vmatmul.mubr.msk.bf16.vlgmr.msra.gmra.mxu0 %vm108_vm0, %v587_v5  ;;  %570 = vmatmul.mubr.msk.bf16.vlgmr.msra.gmra.mxu1 %vm108_vm0, %v591_v6 }
   0xf   :  { %565 = vmatprep.mubr.msk.bf16.mxu0 %vm108_vm0, %v588_v7  ;;  %573 = vmatprep.mubr.msk.bf16.mxu1 %vm108_vm0, %v592_v8 }
  0x16   :  { %566 = vmatmul.mubr.msk.bf16.gmra.mxu0 %vm108_vm0, %v589_v9  ;;  %574 = vmatmul.mubr.msk.bf16.gmra.mxu1 %vm108_vm0, %v593_v10 }
  0xce   :  { %v563_v11 = vpop.f32.mrf.mxu0  ;;  %v571_v12 = vpop.f32.mrf.mxu1 }
  0xcf   :  { %v672_v20 = vadd.f32 %v563_v11, %v492_v15  ;;  %v706_v52 = vadd.f32 %v571_v12, %v492_v15 }
  0xd0   :  { %v167_v13 = vpop.f32.mrf.mxu0  ;;  %v199_v14 = vpop.f32.mrf.mxu1 }
  0xd1   :  { %v670_v17 = vadd.f32 %v492_v15, %v167_v13  ;;  %v234_v29 = vsel %vm230_vm1, %v672_v20, 0.0  ;;  %v700_v46 = vadd.f32 %v492_v15, %v199_v14  ;;  %v250_v59 = vsel %vm230_vm1, %v706_v52, 0.0 }
  0xd2   :  { %v564_v16 = vpop.f32.mrf.mxu0  ;;  %v572_v19 = vpop.f32.mrf.mxu1 }
  0xd3   :  { %v231_v23 = vsel %vm230_vm1, %v670_v17, 0.0  ;;  %v678_v24 = vadd.f32 %v564_v16, %v492_v15  ;;  %v246_v53 = vsel %vm230_vm1, %v700_v46, 0.0  ;;  %v710_v55 = vadd.f32 %v572_v19, %v492_v15 }
  0xd4   :  { %v170_v18 = vpop.f32.mrf.mxu0  ;;  %v202_v28 = vpop.f32.mrf.mxu1 }
  0xd5   :  { %v674_v21 = vadd.f32 %v492_v15, %v170_v18  ;;  %v236_v33 = vsel %vm230_vm1, %v678_v24, 0.0  ;;  %v704_v49 = vadd.f32 %v492_v15, %v202_v28  ;;  %v252_v62 = vsel %vm230_vm1, %v710_v55, 0.0 }
  0xd6   :  { %v567_v22 = vpop.f32.mrf.mxu0  ;;  %v575_v36 = vpop.f32.mrf.mxu1 }
  0xd7   :  { %v232_v25 = vsel %vm230_vm1, %v674_v21, 0.0  ;;  %v688_v37 = vadd.f32 %v567_v22, %v492_v15  ;;  %v248_v56 = vsel %vm230_vm1, %v704_v49, 0.0  ;;  %v722_v1 = vadd.f32 %v575_v36, %v492_v15 }
  0xd8   :  { %v233_v26 = vadd.f32 %v232_v25, %v231_v23  ;;  %v183_v27 = vpop.f32.mrf.mxu0  ;;  %v215_v44 = vpop.f32.mrf.mxu1 }
  0xd9   :  { %v684_v30 = vadd.f32 %v492_v15, %v183_v27  ;;  %v242_v45 = vsel %vm230_vm1, %v688_v37, 0.0  ;;  %v716_v60 = vadd.f32 %v492_v15, %v215_v44  ;;  %v258_v7 = vsel %vm230_vm1, %v722_v1, 0.0 }
  0xda   :  { %v235_v31 = vadd.f32 %v234_v29, %v233_v26  ;;  %v568_v32 = vpop.f32.mrf.mxu0  ;;  %v576_v51 = vpop.f32.mrf.mxu1 }
  0xdb   :  { %v238_v38 = vsel %vm230_vm1, %v684_v30, 0.0  ;;  %v694_v41 = vadd.f32 %v568_v32, %v492_v15  ;;  %v254_v2 = vsel %vm230_vm1, %v716_v60, 0.0  ;;  %v726_v4 = vadd.f32 %v576_v51, %v492_v15 }
  0xdc   :  { %v237_v34 = vadd.f32 %v236_v33, %v235_v31  ;;  %v186_v35 = vpop.f32.mrf.mxu0  ;;  %v218_v58 = vpop.f32.mrf.mxu1 }
  0xdd   :  { %v692_v39 = vadd.f32 %v492_v15, %v186_v35  ;;  %v244_v48 = vsel %vm230_vm1, %v694_v41, 0.0  ;;  %v720_v63 = vadd.f32 %v492_v15, %v218_v58  ;;  %v260_v9 = vsel %vm230_vm1, %v726_v4, 0.0 }
  0xde   :  { %v239_v40 = vadd.f32 %v238_v38, %v237_v34 }
  0xdf   :  { %v240_v42 = vsel %vm230_vm1, %v692_v39, 0.0  ;;  %v256_v5 = vsel %vm230_vm1, %v720_v63, 0.0 }
  0xe0   :  { %v241_v43 = vadd.f32 %v240_v42, %v239_v40 }
  0xe2   :  { %v243_v47 = vadd.f32 %v242_v45, %v241_v43 }
  0xe4   :  { %v245_v50 = vadd.f32 %v244_v48, %v243_v47 }
  0xe6   :  { %v247_v54 = vadd.f32 %v246_v53, %v245_v50 }
  0xe8   :  { %v249_v57 = vadd.f32 %v248_v56, %v247_v54 }
  0xea   :  { %v251_v61 = vadd.f32 %v250_v59, %v249_v57 }
  0xec   :  { %v253_v0 = vadd.f32 %v252_v62, %v251_v61 }
  0xee   :  { %v255_v3 = vadd.f32 %v254_v2, %v253_v0 }
  0xf0   :  { %v257_v6 = vadd.f32 %v256_v5, %v255_v3 }
  0xf2   :  { %v259_v8 = vadd.f32 %v258_v7, %v257_v6 }
  0xf4   :  { %v261_v10 = vadd.f32 %v260_v9, %v259_v8 }
  0xf6   :  { %v262_v11 = vrot.slane %v261_v10, 4 }
  0xf8   :  { %v263_v12 = vadd.f32 %v262_v11, %v261_v10 }
  0xfa   :  { %v264_v13 = vrot.slane %v263_v12, 2 }
  0xfc   :  { %v265_v14 = vadd.f32 %v264_v13, %v263_v12 }
  0xfe   :  { %v266_v16 = vrot.slane %v265_v14, 1 }
 0x100   :  { %v267_v18 = vadd.f32 %v266_v16, %v265_v14 }
 0x102   :  { %v734_v15 = vmul.f32 0.0078125, %v267_v18 }
 0x104   :  { %v270_v19 = vsub.f32 %v670_v17, %v734_v15  ;;  %v271_v22 = vsub.f32 %v674_v21, %v734_v15  ;;  %v272_v23 = vsub.f32 %v672_v20, %v734_v15  ;;  %v273_v25 = vsub.f32 %v678_v24, %v734_v15 }
 0x105   :  { %v274_v28 = vsub.f32 %v684_v30, %v734_v15  ;;  %v275_v31 = vsub.f32 %v692_v39, %v734_v15  ;;  %v276_v36 = vsub.f32 %v688_v37, %v734_v15  ;;  %v277_v43 = vsub.f32 %v694_v41, %v734_v15 }
 0x106   :  { %v286_v26 = vmul.f32 %v270_v19, %v270_v19  ;;  %v287_v27 = vmul.f32 %v271_v22, %v271_v22  ;;  %v288_v29 = vmul.f32 %v272_v23, %v272_v23  ;;  %v289_v32 = vmul.f32 %v273_v25, %v273_v25 }
 0x107   :  { %v290_v38 = vmul.f32 %v274_v28, %v274_v28  ;;  %v291_v44 = vmul.f32 %v275_v31, %v275_v31  ;;  %v278_v48 = vsub.f32 %v700_v46, %v734_v15  ;;  %v292_v50 = vmul.f32 %v276_v36, %v276_v36 }
 0x108   :  { %v302_v33 = vsel %vm230_vm1, %v286_v26, 0.0  ;;  %v303_v34 = vsel %vm230_vm1, %v287_v27, 0.0  ;;  %v305_v40 = vsel %vm230_vm1, %v288_v29, 0.0  ;;  %v307_v45 = vsel %vm230_vm1, %v289_v32, 0.0 }
 0x109   :  { %v304_v35 = vadd.f32 %v303_v34, %v302_v33  ;;  %v309_v51 = vsel %vm230_vm1, %v290_v38, 0.0  ;;  %v279_v54 = vsub.f32 %v704_v49, %v734_v15  ;;  %v293_v56 = vmul.f32 %v277_v43, %v277_v43 }
 0x10a   :  { %v311_v57 = vsel %vm230_vm1, %v291_v44, 0.0  ;;  %v280_v59 = vsub.f32 %v706_v52, %v734_v15  ;;  %v294_v61 = vmul.f32 %v278_v48, %v278_v48  ;;  %v313_v62 = vsel %vm230_vm1, %v292_v50, 0.0 }
 0x10b   :  { %v306_v42 = vadd.f32 %v305_v40, %v304_v35  ;;  %v281_v2 = vsub.f32 %v710_v55, %v734_v15  ;;  %v295_v3 = vmul.f32 %v279_v54, %v279_v54  ;;  %v315_v5 = vsel %vm230_vm1, %v293_v56, 0.0  ;;  %v342_v56 = vld [vmem:[%s874_s3] sm:$0x1] }
 0x10c   :  { %v282_v7 = vsub.f32 %v716_v60, %v734_v15  ;;  %v296_v8 = vmul.f32 %v280_v59, %v280_v59  ;;  %v317_v9 = vsel %vm230_vm1, %v294_v61, 0.0  ;;  %v283_v11 = vsub.f32 %v720_v63, %v734_v15  ;;  %v344_v61 = vld [vmem:[%s875_s4] sm:$0x1] }
 0x10d   :  { %v308_v47 = vadd.f32 %v307_v45, %v306_v42  ;;  %v297_v12 = vmul.f32 %v281_v2, %v281_v2  ;;  %v319_v13 = vsel %vm230_vm1, %v295_v3, 0.0  ;;  %v284_v16 = vsub.f32 %v722_v1, %v734_v15 }
 0x10e   :  { %v298_v18 = vmul.f32 %v282_v7, %v282_v7  ;;  %v321_v19 = vsel %vm230_vm1, %v296_v8, 0.0  ;;  %v285_v23 = vsub.f32 %v726_v4, %v734_v15  ;;  %v299_v25 = vmul.f32 %v283_v11, %v283_v11 }
 0x10f   :  { %v310_v53 = vadd.f32 %v309_v51, %v308_v47  ;;  %v323_v26 = vsel %vm230_vm1, %v297_v12, 0.0  ;;  %v300_v28 = vmul.f32 %v284_v16, %v284_v16 }
 0x110   :  { %v325_v29 = vsel %vm230_vm1, %v298_v18, 0.0  ;;  %v301_v32 = vmul.f32 %v285_v23, %v285_v23  ;;  %v327_v33 = vsel %vm230_vm1, %v299_v25, 0.0 }
 0x111   :  { %v312_v58 = vadd.f32 %v311_v57, %v310_v53  ;;  %v329_v35 = vsel %vm230_vm1, %v300_v28, 0.0  ;;  %v348_v53 = vlaneseq }
 0x112   :  { %v331_v38 = vsel %vm230_vm1, %v301_v32, 0.0 }
 0x113   :  { %v314_v0 = vadd.f32 %v313_v62, %v312_v58  ;;  %v349_v54 = vshrl.u32 %v348_v53, 7 }
 0x115   :  { %v316_v6 = vadd.f32 %v315_v5, %v314_v0  ;;  %v350_v57 = vsub.s32 0, %v349_v54 }
 0x117   :  { %v318_v10 = vadd.f32 %v317_v9, %v316_v6 }
 0x119   :  { %v320_v14 = vadd.f32 %v319_v13, %v318_v10 }
 0x11b   :  { %v322_v22 = vadd.f32 %v321_v19, %v320_v14 }
 0x11d   :  { %v324_v27 = vadd.f32 %v323_v26, %v322_v22 }
 0x11f   :  { %v326_v31 = vadd.f32 %v325_v29, %v324_v27 }
 0x121   :  { %v328_v34 = vadd.f32 %v327_v33, %v326_v31 }
 0x123   :  { %v330_v36 = vadd.f32 %v329_v35, %v328_v34 }
 0x125   :  { %v332_v40 = vadd.f32 %v331_v38, %v330_v36 }
 0x127   :  { %v333_v42 = vrot.slane %v332_v40, 4 }
 0x129   :  { %v334_v43 = vadd.f32 %v333_v42, %v332_v40 }
 0x12b   :  { %v335_v44 = vrot.slane %v334_v43, 2 }
 0x12d   :  { %v336_v45 = vadd.f32 %v335_v44, %v334_v43 }
 0x12f   :  { %v337_v47 = vrot.slane %v336_v45, 1 }
 0x131   :  { %v338_v48 = vadd.f32 %v337_v47, %v336_v45 }
 0x133   :  { %v339_v50 = vmul.f32 0.0078125, %v338_v48 }
 0x135   :  { %v340_v51 = vadd.f32 1e-05, %v339_v50 }
 0x137   :  { %594 = vrsqrt.f32 %v340_v51 }
 0x144   :  { %v595_v58 = vpop.eup %594 }
 0x145   :  { %v343_v59 = vmul.f32 %v595_v58, %v342_v56 }
 0x147   :  { %v345_v62 = vmul.f32 %v343_v59, %v734_v15  ;;  %v351_v0 = vrot.slane %v343_v59, %v350_v57 }
 0x149   :  { %v346_v2 = vsub.f32 %v344_v61, %v345_v62  ;;  %v353_v3 = vmul.f32 %v351_v0, %v670_v17  ;;  %v354_v5 = vmul.f32 %v351_v0, %v674_v21  ;;  %v355_v6 = vmul.f32 %v351_v0, %v672_v20 }
 0x14a   :  { %v356_v7 = vmul.f32 %v351_v0, %v678_v24  ;;  %v357_v8 = vmul.f32 %v351_v0, %v684_v30  ;;  %v358_v9 = vmul.f32 %v351_v0, %v692_v39  ;;  %v359_v10 = vmul.f32 %v351_v0, %v688_v37 }
 0x14b   :  { %v360_v11 = vmul.f32 %v351_v0, %v694_v41  ;;  %v361_v15 = vmul.f32 %v351_v0, %v700_v46  ;;  %v362_v12 = vmul.f32 %v351_v0, %v704_v49  ;;  %v363_v17 = vmul.f32 %v351_v0, %v706_v52 }
 0x14c   :  { %v364_v21 = vmul.f32 %v351_v0, %v710_v55  ;;  %v373_v13 = vrot.slane %v346_v2, %v350_v57  ;;  %v365_v20 = vmul.f32 %v351_v0, %v716_v60  ;;  %v366_v24 = vmul.f32 %v351_v0, %v720_v63 }
 0x14d   :  { %v367_v30 = vmul.f32 %v351_v0, %v722_v1  ;;  %v368_v39 = vmul.f32 %v351_v0, %v726_v4 }
 0x14e   :  { %v375_v37 = vadd.f32 %v373_v13, %v353_v3  ;;  %v376_v41 = vadd.f32 %v373_v13, %v354_v5  ;;  %v377_v14 = vadd.f32 %v373_v13, %v355_v6  ;;  %v378_v46 = vadd.f32 %v373_v13, %v356_v7 }
 0x14f   :  { %v379_v16 = vadd.f32 %v373_v13, %v357_v8  ;;  %v380_v49 = vadd.f32 %v373_v13, %v358_v9  ;;  %v381_v18 = vadd.f32 %v373_v13, %v359_v10  ;;  %v382_v52 = vadd.f32 %v373_v13, %v360_v11 }
 0x150   :  { %v383_v19 = vadd.f32 %v373_v13, %v361_v15  ;;  %v384_v55 = vadd.f32 %v373_v13, %v362_v12  ;;  %v385_v22 = vadd.f32 %v373_v13, %v363_v17  ;;  %v386_v23 = vadd.f32 %v373_v13, %v364_v21 }
 0x151   :  { %v387_v60 = vadd.f32 %v373_v13, %v365_v20  ;;  %v388_v25 = vadd.f32 %v373_v13, %v366_v24  ;;  %v389_v63 = vadd.f32 %v373_v13, %v367_v30  ;;  %v390_v26 = vadd.f32 %v373_v13, %v368_v39 }
 0x152   :  { %v391_v1 = vmax.f32 %v375_v37, 0.0  ;;  %v392_v27 = vmax.f32 %v376_v41, 0.0  ;;  %v393_v4 = vmax.f32 %v377_v14, 0.0  ;;  %v394_v28 = vmax.f32 %v378_v46, 0.0 }
 0x153   :  { %v395_v29 = vmax.f32 %v379_v16, 0.0  ;;  %v396_v31 = vmax.f32 %v380_v49, 0.0  ;;  %v397_v32 = vmax.f32 %v381_v18, 0.0  ;;  %v398_v33 = vmax.f32 %v382_v52, 0.0 }
 0x154   :  { %v399_v34 = vmax.f32 %v383_v19, 0.0  ;;  %v400_v35 = vmax.f32 %v384_v55, 0.0  ;;  %v401_v36 = vmax.f32 %v385_v22, 0.0  ;;  %v402_v38 = vmax.f32 %v386_v23, 0.0 }
 0x155   :  { %v403_v40 = vmax.f32 %v387_v60, 0.0  ;;  %v404_v42 = vmax.f32 %v388_v25, 0.0  ;;  %v405_v43 = vmax.f32 %v389_v63, 0.0  ;;  %v406_v44 = vmax.f32 %v390_v26, 0.0 }
 0x156   :  { %v528_v45 = vpack.c.bf16 %v391_v1, %v391_v1  ;;  %v529_v47 = vpack.c.bf16 %v392_v27, %v392_v27  ;;  %v530_v48 = vpack.c.bf16 %v393_v4, %v393_v4  ;;  %v531_v50 = vpack.c.bf16 %v394_v28, %v394_v28 }
 0x157   :  { %v532_v51 = vpack.c.bf16 %v395_v29, %v395_v29  ;;  %v533_v53 = vpack.c.bf16 %v396_v31, %v396_v31  ;;  %v534_v54 = vpack.c.bf16 %v397_v32, %v397_v32  ;;  %v535_v56 = vpack.c.bf16 %v398_v33, %v398_v33 }
 0x158   :  { %v536_v57 = vpack.c.bf16 %v399_v34, %v399_v34  ;;  %v537_v58 = vpack.c.bf16 %v400_v35, %v400_v35  ;;  %v538_v59 = vpack.c.bf16 %v401_v36, %v401_v36  ;;  %v539_v61 = vpack.c.bf16 %v402_v38, %v402_v38  ;;  %472 = vst.msk [vmem:[%s876_s5] sm:$0xf] %vm471_vm2, %v528_v45 }
 0x159   :  { %473 = vst.msk [vmem:[%s876_s5 + $0x4] sm:$0xf] %vm471_vm2, %v529_v47  ;;  %474 = vst.msk [vmem:[%s876_s5 + $0x8] sm:$0xf] %vm471_vm2, %v530_v48  ;;  %v540_v62 = vpack.c.bf16 %v403_v40, %v403_v40  ;;  %v541_v0 = vpack.c.bf16 %v404_v42, %v404_v42  ;;  %v542_v2 = vpack.c.bf16 %v405_v43, %v405_v43 }
 0x15a   :  { %475 = vst.msk [vmem:[%s876_s5 + $0xc] sm:$0xf] %vm471_vm2, %v531_v50  ;;  %v543_v3 = vpack.c.bf16 %v406_v44, %v406_v44  ;;  %476 = vst.msk [vmem:[%s876_s5 + $0x10] sm:$0xf] %vm471_vm2, %v532_v51 }
 0x15b   :  { %477 = vst.msk [vmem:[%s876_s5 + $0x14] sm:$0xf] %vm471_vm2, %v533_v53  ;;  %478 = vst.msk [vmem:[%s876_s5 + $0x18] sm:$0xf] %vm471_vm2, %v534_v54 }
 0x15c   :  { %479 = vst.msk [vmem:[%s876_s5 + $0x1c] sm:$0xf] %vm471_vm2, %v535_v56  ;;  %480 = vst.msk [vmem:[%s876_s5 + $0x20] sm:$0xf] %vm471_vm2, %v536_v57 }
 0x15d   :  { %481 = vst.msk [vmem:[%s876_s5 + $0x24] sm:$0xf] %vm471_vm2, %v537_v58  ;;  %482 = vst.msk [vmem:[%s876_s5 + $0x28] sm:$0xf] %vm471_vm2, %v538_v59 }
 0x15e   :  { %483 = vst.msk [vmem:[%s876_s5 + $0x2c] sm:$0xf] %vm471_vm2, %v539_v61  ;;  %484 = vst.msk [vmem:[%s876_s5 + $0x30] sm:$0xf] %vm471_vm2, %v540_v62 }
 0x15f   :  { %485 = vst.msk [vmem:[%s876_s5 + $0x34] sm:$0xf] %vm471_vm2, %v541_v0  ;;  %486 = vst.msk [vmem:[%s876_s5 + $0x38] sm:$0xf] %vm471_vm2, %v542_v2 }
 0x160   :  { %487 = vst.msk [vmem:[%s876_s5 + $0x3c] sm:$0xf] %vm471_vm2, %v543_v3 }

// kernel: vae_forward.8
= control target key start
LH: loop header
LB: loop body
LE: loop exit
PB: predicated region body
PF: predicated region fallthrough
CT: control target
= control target key end

     0   :  { %vm430_vm0 = vcmask 523264   ;;  %vm515_vm1 = vcmask 519168   ;;  %s859_s1 = inlined_call_operand.vmem [shape: bf16[512,64], index: 1, kind: input, shape index: {}]   ;;  %s860_s0 = inlined_call_operand.vmem [shape: bf16[32,512], index: 0, kind: input, shape index: {}]   ;;  %s861_s2 = inlined_call_operand.vmem [shape: f32[1,64], index: 2, kind: input, shape index: {}]   ;;  %s862_s3 = inlined_call_operand.vmem [shape: f32[1,64], index: 3, kind: input, shape index: {}]   ;;  %s863_s4 = inlined_call_operand.vmem [shape: f32[1,64], index: 4, kind: input, shape index: {}]   ;;  %s864_s5 = inlined_call_operand.vmem [shape: bf16[32,64], index: 5, kind: output, shape index: {}]  }
   0x1   :  { %v629_v0 = vld [vmem:[%s859_s1 + $0x78] sm:$0xff]   ;;  %v633_v4 = vld [vmem:[%s859_s1 + $0x70] sm:$0xff]   ;;  %v637_v8 = vld [vmem:[%s859_s1 + $0x68] sm:$0xff]  }
   0x2   :  { %v630_v1 = vld [vmem:[%s859_s1 + $0xf8] sm:$0xff]   ;;  %573 = vmatprep.subr.bf16.mxu0 %v629_v0  ;;  %v634_v5 = vld [vmem:[%s859_s1 + $0xf0] sm:$0xff]   ;;  %v638_v9 = vld [vmem:[%s859_s1 + $0xe8] sm:$0xff]  }
   0x3   :  { %v631_v2 = vld [vmem:[%s859_s1 + $0x38] sm:$0xff]   ;;  %601 = vmatprep.subr.bf16.mxu1 %v630_v1  ;;  %v635_v6 = vld [vmem:[%s859_s1 + $0x30] sm:$0xff]   ;;  %v639_v10 = vld [vmem:[%s859_s1 + $0x28] sm:$0xff]  }
   0x4   :  { %v632_v3 = vld [vmem:[%s859_s1 + $0xb8] sm:$0xff]   ;;  %574 = vmatpush3.bf16.msra.mxu0 %v631_v2  ;;  %v636_v7 = vld [vmem:[%s859_s1 + $0xb0] sm:$0xff]   ;;  %v640_v11 = vld [vmem:[%s859_s1 + $0xa8] sm:$0xff]  }
   0x5   :  { %602 = vmatpush3.bf16.msra.mxu1 %v632_v3  ;;  %575 = vmatprep.subr.bf16.mxu0 %v633_v4  ;;  %v641_v12 = vld [vmem:[%s859_s1 + $0x60] sm:$0xff]   ;;  %v645_v16 = vld [vmem:[%s859_s1 + $0x58] sm:$0xff]   ;;  %v649_v20 = vld [vmem:[%s859_s1 + $0x50] sm:$0xff]  }
   0x6   :  { %603 = vmatprep.subr.bf16.mxu1 %v634_v5  ;;  %v642_v13 = vld [vmem:[%s859_s1 + $0xe0] sm:$0xff]   ;;  %v646_v17 = vld [vmem:[%s859_s1 + $0xd8] sm:$0xff]   ;;  %v650_v21 = vld [vmem:[%s859_s1 + $0xd0] sm:$0xff]  }
   0x7   :  { %v643_v14 = vld [vmem:[%s859_s1 + $0x20] sm:$0xff]   ;;  %v647_v18 = vld [vmem:[%s859_s1 + $0x18] sm:$0xff]   ;;  %v651_v22 = vld [vmem:[%s859_s1 + $0x10] sm:$0xff]  }
   0x8   :  { %576 = vmatpush3.bf16.msra.mxu0 %v635_v6  ;;  %v644_v15 = vld [vmem:[%s859_s1 + $0xa0] sm:$0xff]   ;;  %v648_v19 = vld [vmem:[%s859_s1 + $0x98] sm:$0xff]   ;;  %v652_v23 = vld [vmem:[%s859_s1 + $0x90] sm:$0xff]  }
   0x9   :  { %604 = vmatpush3.bf16.msra.mxu1 %v636_v7  ;;  %577 = vmatprep.subr.bf16.mxu0 %v637_v8  ;;  %v653_v24 = vld [vmem:[%s859_s1 + $0x48] sm:$0xff]   ;;  %v657_v28 = vld [vmem:[%s859_s1 + $0x40] sm:$0xff]  }
   0xa   :  { %605 = vmatprep.subr.bf16.mxu1 %v638_v9  ;;  %v654_v25 = vld [vmem:[%s859_s1 + $0xc8] sm:$0xff]   ;;  %v658_v29 = vld [vmem:[%s859_s1 + $0xc0] sm:$0xff]  }
   0xb   :  { %v655_v26 = vld [vmem:[%s859_s1 + $0x8] sm:$0xff]   ;;  %v659_v30 = vld [vmem:[%s859_s1] sm:$0xff]  }
   0xc   :  { %578 = vmatpush3.bf16.msra.mxu0 %v639_v10  ;;  %v656_v27 = vld [vmem:[%s859_s1 + $0x88] sm:$0xff]   ;;  %v660_v31 = vld [vmem:[%s859_s1 + $0x80] sm:$0xff]  }
   0xd   :  { %606 = vmatpush3.bf16.msra.mxu1 %v640_v11  ;;  %579 = vmatprep.subr.bf16.mxu0 %v641_v12  ;;  %v661_v32 = vld [vmem:[%s860_s0] ss:$16 sps:$4 sm:$0xff]   ;;  %v663_v33 = vld [vmem:[%s860_s0 + $0x4] ss:$16 sps:$4 sm:$0xff]   ;;  %v664_v34 = vld [vmem:[%s860_s0 + $0x8] ss:$16 sps:$4 sm:$0xff]  }
   0xe   :  { %607 = vmatprep.subr.bf16.mxu1 %v642_v13  ;;  %v666_v35 = vld [vmem:[%s860_s0 + $0xc] ss:$16 sps:$4 sm:$0xff]   ;;  %364 = vmatprep.mubr.bf16.mxu0 %v663_v33  ;;  %v667_v36 = vld [vmem:[%s860_s0 + $0x24] ss:$16 sps:$4 sm:$0xff]   ;;  %v671_v38 = vld [vmem:[%s860_s0 + $0x20] ss:$16 sps:$4 sm:$0xff]  }
   0xf   :  { %413 = vmatprep.mubr.bf16.mxu1 %v666_v35  ;;  %v669_v37 = vld [vmem:[%s860_s0 + $0x2c] ss:$16 sps:$4 sm:$0xff]   ;;  %v672_v39 = vld [vmem:[%s860_s0 + $0x28] ss:$16 sps:$4 sm:$0xff]   ;;  %v524_v47 = vld [vmem:[%s861_s2] ss:$0 sm:$0xff] }
  0x10   :  { %580 = vmatpush3.bf16.msra.mxu0 %v643_v14 }
  0x11   :  { %608 = vmatpush3.bf16.msra.mxu1 %v644_v15  ;;  %581 = vmatprep.subr.bf16.mxu0 %v645_v16 }
  0x12   :  { %609 = vmatprep.subr.bf16.mxu1 %v646_v17 }
  0x14   :  { %582 = vmatpush3.bf16.msra.mxu0 %v647_v18 }
  0x15   :  { %610 = vmatpush3.bf16.msra.mxu1 %v648_v19  ;;  %583 = vmatprep.subr.bf16.mxu0 %v649_v20 }
  0x16   :  { %611 = vmatprep.subr.bf16.mxu1 %v650_v21 }
  0x18   :  { %584 = vmatpush3.bf16.msra.mxu0 %v651_v22 }
  0x19   :  { %612 = vmatpush3.bf16.msra.mxu1 %v652_v23  ;;  %585 = vmatprep.subr.bf16.mxu0 %v653_v24 }
  0x1a   :  { %613 = vmatprep.subr.bf16.mxu1 %v654_v25 }
  0x1c   :  { %586 = vmatpush3.bf16.msra.mxu0 %v655_v26 }
  0x1d   :  { %614 = vmatpush3.bf16.msra.mxu1 %v656_v27  ;;  %587 = vmatprep.subr.bf16.mxu0 %v657_v28 }
  0x1e   :  { %615 = vmatprep.subr.bf16.mxu1 %v658_v29 }
  0x20   :  { %588 = vmatpush3.bf16.msra.mxu0 %v659_v30 }
  0x21   :  { %616 = vmatpush3.bf16.msra.mxu1 %v660_v31 }
  0x23   :  { %365 = vmatmul.mubr.bf16.vlgmr.msra.gmra.mxu0 %v661_v32 }
  0x24   :  { %414 = vmatmul.mubr.bf16.vlgmr.msra.gmra.mxu1 %v664_v34  ;;  %372 = vmatprep.mubr.bf16.mxu0 %v667_v36 }
  0x25   :  { %421 = vmatprep.mubr.bf16.mxu1 %v669_v37 }
  0x2b   :  { %373 = vmatmul.mubr.bf16.gmra.mxu0 %v671_v38 }
  0x2c   :  { %422 = vmatmul.mubr.bf16.gmra.mxu1 %v672_v39 }
  0xe3   :  { %v589_v40 = vpop.f32.mrf.mxu0 }
  0xe4   :  { %v617_v41 = vpop.f32.mrf.mxu1 }
  0xe5   :  { %v590_v42 = vpop.f32.mrf.mxu0 }
  0xe6   :  { %v618_v43 = vpop.f32.mrf.mxu1  ;;  %v591_v45 = vadd.f32 %v590_v42, %v589_v40 }
  0xe7   :  { %v592_v44 = vpop.f32.mrf.mxu0  ;;  %v619_v57 = vadd.f32 %v618_v43, %v617_v41 }
  0xe8   :  { %v620_v46 = vpop.f32.mrf.mxu1  ;;  %v367_v52 = vadd.f32 %v591_v45, %v524_v47 }
  0xe9   :  { %v593_v48 = vpop.f32.mrf.mxu0 }
  0xea   :  { %v594_v49 = vadd.f32 %v593_v48, %v592_v44  ;;  %v621_v50 = vpop.f32.mrf.mxu1  ;;  %v416_v62 = vadd.f32 %v619_v57, %v367_v52  ;;  %v470_v48 = vld [vmem:[%s862_s3] sm:$0x1] }
  0xeb   :  { %v595_v51 = vpop.f32.mrf.mxu0  ;;  %v622_v54 = vadd.f32 %v621_v50, %v620_v46  ;;  %v476_v46 = vlaneseq  ;;  %v472_v52 = vld [vmem:[%s863_s4] sm:$0x1] }
  0xec   :  { %v370_v53 = vadd.f32 %v594_v49, %v524_v47  ;;  %v623_v55 = vpop.f32.mrf.mxu1  ;;  %v431_v7 = vsel %vm430_vm0, %v416_v62, 0.0 }
  0xed   :  { %v596_v56 = vpop.f32.mrf.mxu0 }
  0xee   :  { %v828_v58 = vadd.f32 %v622_v54, %v370_v53  ;;  %v597_v59 = vadd.f32 %v596_v56, %v595_v51  ;;  %v624_v60 = vpop.f32.mrf.mxu1 }
  0xef   :  { %v598_v61 = vpop.f32.mrf.mxu0  ;;  %v625_v0 = vadd.f32 %v624_v60, %v623_v55 }
  0xf0   :  { %v375_v63 = vadd.f32 %v597_v59, %v524_v47  ;;  %v626_v1 = vpop.f32.mrf.mxu1  ;;  %v432_v3 = vsel %vm430_vm0, %v828_v58, 0.0 }
  0xf1   :  { %v599_v2 = vpop.f32.mrf.mxu0  ;;  %v433_v11 = vadd.f32 %v432_v3, %v431_v7 }
  0xf2   :  { %v424_v4 = vadd.f32 %v625_v0, %v375_v63  ;;  %v600_v5 = vadd.f32 %v599_v2, %v598_v61  ;;  %v627_v6 = vpop.f32.mrf.mxu1 }
  0xf3   :  { %v628_v10 = vadd.f32 %v627_v6, %v626_v1 }
  0xf4   :  { %v434_v8 = vsel %vm430_vm0, %v424_v4, 0.0  ;;  %v378_v9 = vadd.f32 %v600_v5, %v524_v47  ;;  %v477_v47 = vshrl.u32 %v476_v46, 7 }
  0xf5   :  { %v435_v13 = vadd.f32 %v434_v8, %v433_v11 }
  0xf6   :  { %v427_v12 = vadd.f32 %v628_v10, %v378_v9  ;;  %v478_v49 = vsub.s32 0, %v477_v47 }
  0xf8   :  { %v436_v14 = vsel %vm430_vm0, %v427_v12, 0.0 }
  0xf9   :  { %v437_v15 = vadd.f32 %v436_v14, %v435_v13 }
  0xfb   :  { %v438_v16 = vrot.slane %v437_v15, 4 }
  0xfd   :  { %v439_v17 = vadd.f32 %v438_v16, %v437_v15 }
  0xff   :  { %v440_v18 = vrot.slane %v439_v17, 2 }
 0x101   :  { %v441_v19 = vadd.f32 %v440_v18, %v439_v17 }
 0x103   :  { %v442_v20 = vrot.slane %v441_v19, 1 }
 0x105   :  { %v443_v21 = vadd.f32 %v442_v20, %v441_v19 }
 0x107   :  { %v445_v22 = vmul.f32 0.03125, %v443_v21 }
 0x109   :  { %v446_v23 = vsub.f32 %v416_v62, %v445_v22  ;;  %v447_v24 = vsub.f32 %v828_v58, %v445_v22  ;;  %v448_v25 = vsub.f32 %v424_v4, %v445_v22  ;;  %v449_v26 = vsub.f32 %v427_v12, %v445_v22 }
 0x10b   :  { %v450_v27 = vmul.f32 %v446_v23, %v446_v23  ;;  %v451_v28 = vmul.f32 %v447_v24, %v447_v24  ;;  %v452_v29 = vmul.f32 %v448_v25, %v448_v25  ;;  %v453_v30 = vmul.f32 %v449_v26, %v449_v26 }
 0x10d   :  { %v454_v31 = vsel %vm430_vm0, %v450_v27, 0.0  ;;  %v455_v32 = vsel %vm430_vm0, %v451_v28, 0.0  ;;  %v457_v34 = vsel %vm430_vm0, %v452_v29, 0.0  ;;  %v459_v36 = vsel %vm430_vm0, %v453_v30, 0.0 }
 0x10e   :  { %v456_v33 = vadd.f32 %v455_v32, %v454_v31 }
 0x110   :  { %v458_v35 = vadd.f32 %v457_v34, %v456_v33 }
 0x112   :  { %v460_v37 = vadd.f32 %v459_v36, %v458_v35 }
 0x114   :  { %v461_v38 = vrot.slane %v460_v37, 4 }
 0x116   :  { %v462_v39 = vadd.f32 %v461_v38, %v460_v37 }
 0x118   :  { %v463_v40 = vrot.slane %v462_v39, 2 }
 0x11a   :  { %v464_v41 = vadd.f32 %v463_v40, %v462_v39 }
 0x11c   :  { %v465_v42 = vrot.slane %v464_v41, 1 }
 0x11e   :  { %v466_v43 = vadd.f32 %v465_v42, %v464_v41 }
 0x120   :  { %v467_v44 = vmul.f32 0.03125, %v466_v43 }
 0x122   :  { %v468_v45 = vadd.f32 1e-05, %v467_v44 }
 0x124   :  { %673 = vrsqrt.f32 %v468_v45 }
 0x131   :  { %v674_v50 = vpop.eup %673 }
 0x132   :  { %v471_v51 = vmul.f32 %v674_v50, %v470_v48 }
 0x134   :  { %v473_v53 = vmul.f32 %v471_v51, %v445_v22  ;;  %v479_v54 = vrot.slane %v471_v51, %v478_v49 }
 0x136   :  { %v474_v55 = vsub.f32 %v472_v52, %v473_v53  ;;  %v481_v56 = vmul.f32 %v479_v54, %v416_v62  ;;  %v482_v57 = vmul.f32 %v479_v54, %v828_v58  ;;  %v483_v59 = vmul.f32 %v479_v54, %v424_v4 }
 0x137   :  { %v484_v60 = vmul.f32 %v479_v54, %v427_v12 }
 0x138   :  { %v489_v61 = vrot.slane %v474_v55, %v478_v49 }
 0x13a   :  { %v491_v63 = vadd.f32 %v489_v61, %v481_v56  ;;  %v492_v0 = vadd.f32 %v489_v61, %v482_v57  ;;  %v493_v1 = vadd.f32 %v489_v61, %v483_v59  ;;  %v494_v2 = vadd.f32 %v489_v61, %v484_v60 }
 0x13c   :  { %v495_v3 = vmax.f32 %v491_v63, 0.0  ;;  %v496_v5 = vmax.f32 %v492_v0, 0.0  ;;  %v497_v6 = vmax.f32 %v493_v1, 0.0  ;;  %v498_v7 = vmax.f32 %v494_v2, 0.0 }
 0x13e   :  { %v569_v8 = vpack.c.bf16 %v495_v3, %v495_v3  ;;  %v570_v9 = vpack.c.bf16 %v496_v5, %v496_v5  ;;  %v571_v10 = vpack.c.bf16 %v497_v6, %v497_v6  ;;  %v572_v11 = vpack.c.bf16 %v498_v7, %v498_v7 }
 0x140   :  { %516 = vst.msk [vmem:[%s864_s5] sm:$0xf] %vm515_vm1, %v569_v8  ;;  %517 = vst.msk [vmem:[%s864_s5 + $0x4] sm:$0xf] %vm515_vm1, %v570_v9 }
 0x141   :  { %518 = vst.msk [vmem:[%s864_s5 + $0x8] sm:$0xf] %vm515_vm1, %v571_v10  ;;  %519 = vst.msk [vmem:[%s864_s5 + $0xc] sm:$0xf] %vm515_vm1, %v572_v11 }

// kernel: vae_forward.10
= control target key start
LH: loop header
LB: loop body
LE: loop exit
PB: predicated region body
PF: predicated region fallthrough
CT: control target
= control target key end

     0   :  { %v721_v22 = vmov 1966171168   ;;  %v110_v24 = vlaneseq  ;;  %vm404_vm1 = vcmask 254976   ;;  %vm463_vm2 = vcmask 130048   ;;  %s903_s1 = inlined_call_operand.vmem [shape: bf16[512,32], index: 1, kind: input, shape index: {}]   ;;  %s904_s0 = inlined_call_operand.vmem [shape: bf16[2,512], index: 0, kind: input, shape index: {}]   ;;  %s905_s4 = inlined_call_operand.vmem [shape: bf16[16,512], index: 4, kind: input, shape index: {}]   ;;  %s906_s2 = inlined_call_operand.vmem [shape: f32[1,32], index: 2, kind: input, shape index: {}]   ;;  %s907_s6 = inlined_call_operand.vmem [shape: f32[2,32], index: 6, kind: output, shape index: {0}]   ;;  %s908_s3 = inlined_call_operand.vmem [shape: f32[2,16], index: 3, kind: input, shape index: {}]   ;;  %s909_s5 = inlined_call_operand.vmem [shape: f32[1,512], index: 5, kind: input, shape index: {}]   ;;  %s910_s7 = inlined_call_operand.vmem [shape: bf16[2,512], index: 7, kind: output, shape index: {1}]  }
   0x1   :  { %v681_v0 = vld [vmem:[%s903_s1 + $0x78] sm:$0xff]   ;;  %v685_v4 = vld [vmem:[%s903_s1 + $0x70] sm:$0xff]   ;;  %v689_v8 = vld [vmem:[%s903_s1 + $0x68] sm:$0xff]   ;;  %v108_v23 = vunpack.c.l.s4 %v721_v22 }
   0x2   :  { %v682_v1 = vld [vmem:[%s903_s1 + $0xf8] sm:$0xff]   ;;  %634 = vmatprep.subr.bf16.mxu0 %v681_v0  ;;  %v686_v5 = vld [vmem:[%s903_s1 + $0xf0] sm:$0xff]   ;;  %v690_v9 = vld [vmem:[%s903_s1 + $0xe8] sm:$0xff]   ;;  %v842_v30 = vshrl.u32 %v110_v24, 7  ;;  %v400_v54 = vand.u32 127, %v110_v24 }
   0x3   :  { %v683_v2 = vld [vmem:[%s903_s1 + $0x38] sm:$0xff]   ;;  %656 = vmatprep.subr.bf16.mxu1 %v682_v1  ;;  %v687_v6 = vld [vmem:[%s903_s1 + $0x30] sm:$0xff]   ;;  %v691_v10 = vld [vmem:[%s903_s1 + $0x28] sm:$0xff]   ;;  %v109_v29 = vunpack.c.0.s8 %v108_v23 }
   0x4   :  { %v684_v3 = vld [vmem:[%s903_s1 + $0xb8] sm:$0xff]   ;;  %635 = vmatpush3.bf16.msra.mxu0 %v683_v2  ;;  %v688_v7 = vld [vmem:[%s903_s1 + $0xb0] sm:$0xff]   ;;  %v692_v11 = vld [vmem:[%s903_s1 + $0xa8] sm:$0xff]   ;;  %vm401_vm0 = vcmp.ge.s32.totalorder %v400_v54, 16  ;;  %v722_v2 = vmov 0  }
   0x5   :  { %657 = vmatpush3.bf16.msra.mxu1 %v684_v3  ;;  %636 = vmatprep.subr.bf16.mxu0 %v685_v4  ;;  %v693_v12 = vld [vmem:[%s903_s1 + $0x60] sm:$0xff]   ;;  %v697_v16 = vld [vmem:[%s903_s1 + $0x58] sm:$0xff]   ;;  %v701_v20 = vld [vmem:[%s903_s1 + $0x50] sm:$0xff]   ;;  %v857_v35 = vsub.s32 %v109_v29, %v842_v30 }
   0x6   :  { %658 = vmatprep.subr.bf16.mxu1 %v686_v5  ;;  %v694_v13 = vld [vmem:[%s903_s1 + $0xe0] sm:$0xff]   ;;  %v698_v17 = vld [vmem:[%s903_s1 + $0xd8] sm:$0xff]   ;;  %v702_v21 = vld [vmem:[%s903_s1 + $0xd0] sm:$0xff]  }
   0x7   :  { %v695_v14 = vld [vmem:[%s903_s1 + $0x20] sm:$0xff]   ;;  %v699_v18 = vld [vmem:[%s903_s1 + $0x18] sm:$0xff]   ;;  %v703_v25 = vld [vmem:[%s903_s1 + $0x10] sm:$0xff]  }
   0x8   :  { %637 = vmatpush3.bf16.msra.mxu0 %v687_v6  ;;  %v696_v15 = vld [vmem:[%s903_s1 + $0xa0] sm:$0xff]   ;;  %v700_v19 = vld [vmem:[%s903_s1 + $0x98] sm:$0xff]   ;;  %v704_v26 = vld [vmem:[%s903_s1 + $0x90] sm:$0xff]  }
   0x9   :  { %659 = vmatpush3.bf16.msra.mxu1 %v688_v7  ;;  %638 = vmatprep.subr.bf16.mxu0 %v689_v8  ;;  %v705_v27 = vld [vmem:[%s903_s1 + $0x48] sm:$0xff]   ;;  %v709_v33 = vld [vmem:[%s903_s1 + $0x40] sm:$0xff]  }
   0xa   :  { %660 = vmatprep.subr.bf16.mxu1 %v690_v9  ;;  %v706_v28 = vld [vmem:[%s903_s1 + $0xc8] sm:$0xff]   ;;  %v710_v34 = vld [vmem:[%s903_s1 + $0xc0] sm:$0xff]   ;;  %v425_v9 = vsub.s32 0, %v842_v30 }
   0xb   :  { %v707_v31 = vld [vmem:[%s903_s1 + $0x8] sm:$0xff]   ;;  %v711_v36 = vld [vmem:[%s903_s1] sm:$0xff]  }
   0xc   :  { %639 = vmatpush3.bf16.msra.mxu0 %v691_v10  ;;  %v708_v32 = vld [vmem:[%s903_s1 + $0x88] sm:$0xff]   ;;  %v712_v37 = vld [vmem:[%s903_s1 + $0x80] sm:$0xff]   ;;  %v433_v10 = vsub.s32 2, %v842_v30 }
   0xd   :  { %661 = vmatpush3.bf16.msra.mxu1 %v692_v11  ;;  %640 = vmatprep.subr.bf16.mxu0 %v693_v12  ;;  %v592_v38 = vld.sshfl [vmem:[%s904_s0] sm:$0x33 pattern:$0x75316420]  ;;  %v715_v45 = vld [vmem:[%s905_s4 + $0x4] ss:$16 sps:$4 sm:$0xff]  }
   0xe   :  { %662 = vmatprep.subr.bf16.mxu1 %v694_v13  ;;  %v106_v39 = vcombine.high %v592_v38, %v592_v38  ;;  %v113_v40 = vrot.slane %v592_v38, %v857_v35  ;;  %v713_v44 = vld [vmem:[%s905_s4] ss:$16 sps:$4 sm:$0xff]   ;;  %v716_v46 = vld [vmem:[%s905_s4 + $0x8] ss:$16 sps:$4 sm:$0xff]   ;;  %v718_v47 = vld [vmem:[%s905_s4 + $0xc] ss:$16 sps:$4 sm:$0xff]  }
   0xf   :  { %v591_v50 = vld [vmem:[%s906_s2] ss:$0 sm:$0xff]  ;;  %s723_s2 = smov 112   ;;  %v429_v11 = vsub.s32 1, %v842_v30  ;;  %v437_v12 = vsub.s32 3, %v842_v30 }
  0x10   :  { %641 = vmatpush3.bf16.msra.mxu0 %v695_v14  ;;  %v120_v41 = vrot.slane %v106_v39, %v857_v35  ;;  %v121_v42 = vcombine.high %v113_v40, %v113_v40  ;;  %v406_v4 = vld [vmem:[%s908_s3] sm:$0x3] }
  0x11   :  { %663 = vmatpush3.bf16.msra.mxu1 %v696_v15  ;;  %642 = vmatprep.subr.bf16.mxu0 %v697_v16  ;;  %v421_v13 = vld [vmem:[%s909_s5] sm:$0xf] }
  0x12   :  { %664 = vmatprep.subr.bf16.mxu1 %v698_v17  ;;  %351 = vmatprep.mubr.bf16.mxu0 %v120_v41  ;;  %v122_v43 = vcombine.high %v120_v41, %v120_v41  ;;  %v426_v14 = vrot.slane %v421_v13, %v425_v9  ;;  %v434_v15 = vrot.slane %v421_v13, %v433_v10 }
  0x13   :  { %v430_v16 = vrot.slane %v421_v13, %v429_v11  ;;  %v438_v17 = vrot.slane %v421_v13, %v437_v12 }
  0x14   :  { %643 = vmatpush3.bf16.msra.mxu0 %v699_v18  ;;  %391 = vmatprep.mubr.bf16.mxu1 %v122_v43 }
  0x15   :  { %665 = vmatpush3.bf16.msra.mxu1 %v700_v19  ;;  %644 = vmatprep.subr.bf16.mxu0 %v701_v20 }
  0x16   :  { %666 = vmatprep.subr.bf16.mxu1 %v702_v21 }
  0x18   :  { %645 = vmatpush3.bf16.msra.mxu0 %v703_v25 }
  0x19   :  { %667 = vmatpush3.bf16.msra.mxu1 %v704_v26  ;;  %646 = vmatprep.subr.bf16.mxu0 %v705_v27 }
  0x1a   :  { %668 = vmatprep.subr.bf16.mxu1 %v706_v28 }
  0x1c   :  { %647 = vmatpush3.bf16.msra.mxu0 %v707_v31 }
  0x1d   :  { %669 = vmatpush3.bf16.msra.mxu1 %v708_v32  ;;  %648 = vmatprep.subr.bf16.mxu0 %v709_v33 }
  0x1e   :  { %670 = vmatprep.subr.bf16.mxu1 %v710_v34 }
  0x20   :  { %649 = vmatpush3.bf16.msra.mxu0 %v711_v36 }
  0x21   :  { %671 = vmatpush3.bf16.msra.mxu1 %v712_v37  ;;  %481 = vmatprep.subr.bf16.mxu0 %v715_v45 }
  0x22   :  { %522 = vmatprep.subr.bf16.mxu1 %v718_v47 }
  0x23   :  { %352 = vmatmul.mubr.bf16.vlgmr.msra.gmra.mxu0 %v113_v40 }
  0x24   :  { %392 = vmatmul.mubr.bf16.vlgmr.msra.gmra.mxu1 %v121_v42  ;;  %482 = vmatpush1.bf16.msra.mxu0 %v713_v44 }
  0x25   :  { %523 = vmatpush1.bf16.msra.mxu1 %v716_v46  ;;  %499 = vmatprep.mubr.bf16.mxu0 %v722_v2 }
  0x26   :  { %540 = vmatprep.mubr.bf16.mxu1 %v722_v2 }
  0xe3   :  { %v650_v48 = vpop.f32.mrf.mxu0 }
  0xe4   :  { %v672_v49 = vpop.f32.mrf.mxu1 }
  0xe5   :  { %v651_v51 = vpop.f32.mrf.mxu0 }
  0xe6   :  { %v652_v52 = vadd.f32 %v651_v51, %v650_v48  ;;  %v673_v53 = vpop.f32.mrf.mxu1 }
  0xe7   :  { %v653_v55 = vpop.f32.mrf.mxu0  ;;  %v674_v57 = vadd.f32 %v673_v53, %v672_v49 }
  0xe8   :  { %v354_v56 = vadd.f32 %v652_v52, %v591_v50  ;;  %v675_v58 = vpop.f32.mrf.mxu1 }
  0xe9   :  { %v654_v59 = vpop.f32.mrf.mxu0 }
  0xea   :  { %v394_v60 = vadd.f32 %v674_v57, %v354_v56  ;;  %v676_v61 = vpop.f32.mrf.mxu1 }
  0xec   :  { %v402_v62 = vmax.f32 %v394_v60, 0.0 }
  0xee   :  { %v403_v63 = vsel %vm401_vm0, %v402_v62, %v394_v60 }
  0xef   :  { %405 = vst.msk [vmem:[%s907_s6] sm:$0x3] %vm404_vm1, %v403_v63  ;;  %v407_v0 = vmul.f32 0.5, %v403_v63 }
  0xf1   :  { %v408_v1 = vmul.f32 1.442695, %v407_v0 }
  0xf3   :  { %719 = vpow2.f32 %v408_v1 }
 0x100   :  { %v720_v3 = vpop.eup %719 }
 0x101   :  { %411 = vrot.lane.b32.xlu0 %v720_v3, %s723_s2 }
 0x173   :  { %v412_v5 = vpop.permute.xlu0 %411 }
 0x174   :  { %v414_v6 = vmul.f32 %v412_v5, %v406_v4 }
 0x176   :  { %v415_v7 = vadd.f32 %v414_v6, %v403_v63 }
 0x178   :  { %v416_v8 = vpack.c.bf16 %v415_v7, %v415_v7 }
 0x17a   :  { %629 = vmatmul.mubr.msk.bf16.vlgmr.msra.gmra.mxu0 %vm463_vm2, %v416_v8  ;;  %630 = vmatmul.mubr.msk.bf16.vlgmr.msra.gmra.mxu1 %vm463_vm2, %v416_v8 }
 0x23a   :  { %v501_v18 = vpop.f32.mrf.mxu0  ;;  %v542_v19 = vpop.f32.mrf.mxu1 }
 0x23b   :  { %v502_v22 = vadd.f32 %v501_v18, %v426_v14  ;;  %v543_v23 = vadd.f32 %v542_v19, %v434_v15 }
 0x23c   :  { %v503_v20 = vpop.f32.mrf.mxu0  ;;  %v544_v21 = vpop.f32.mrf.mxu1 }
 0x23d   :  { %v504_v24 = vadd.f32 %v503_v20, %v430_v16  ;;  %v545_v25 = vadd.f32 %v544_v21, %v438_v17 }
 0x23e   :  { %v505_v26 = vpop.f32.mrf.mxu0  ;;  %v546_v27 = vpop.f32.mrf.mxu1 }
 0x23f   :  { %v631_v28 = vpack.c.bf16 %v504_v24, %v502_v22  ;;  %v632_v29 = vpack.c.bf16 %v545_v25, %v543_v23 }
 0x240   :  { %v506_v30 = vpop.f32.mrf.mxu0  ;;  %v547_v31 = vpop.f32.mrf.mxu1 }
 0x241   :  { %v565_v32 = vrot.slane %v631_v28, %v857_v35  ;;  %v572_v33 = vrot.slane %v632_v29, %v857_v35 }
 0x243   :  { %v573_v34 = vcombine.low %v565_v32, %v572_v33 }
 0x245   :  { %633 = vst.sshfl [vmem:[%s910_s7] sm:$0x55 pattern:$0x73625140] %v573_v34 }

// kernel: vae_forward.9
= control target key start
LH: loop header
LB: loop body
LE: loop exit
PB: predicated region body
PF: predicated region fallthrough
CT: control target
= control target key end

     0   :  { %s1319_s1 = inlined_call_operand.vmem [shape: bf16[1024,128], index: 1, kind: input, shape index: {}]   ;;  %s1320_s0 = inlined_call_operand.vmem [shape: bf16[16,1024], index: 0, kind: input, shape index: {}]   ;;  %s1321_s2 = inlined_call_operand.vmem [shape: f32[1,128], index: 2, kind: input, shape index: {}]   ;;  %s1322_s3 = inlined_call_operand.vmem [shape: f32[1,128], index: 3, kind: input, shape index: {}]   ;;  %s1323_s4 = inlined_call_operand.vmem [shape: f32[1,128], index: 4, kind: input, shape index: {}]   ;;  %s1324_s5 = inlined_call_operand.vmem [shape: bf16[16,128], index: 5, kind: output, shape index: {}]  }
   0x1   :  { %v995_v0 = vld [vmem:[%s1319_s1 + $0x78] sm:$0xff]   ;;  %v999_v4 = vld [vmem:[%s1319_s1 + $0x70] sm:$0xff]   ;;  %v1003_v8 = vld [vmem:[%s1319_s1 + $0x68] sm:$0xff]  }
   0x2   :  { %v996_v1 = vld [vmem:[%s1319_s1 + $0xf8] sm:$0xff]   ;;  %907 = vmatprep.subr.bf16.mxu0 %v995_v0  ;;  %v1000_v5 = vld [vmem:[%s1319_s1 + $0xf0] sm:$0xff]   ;;  %v1004_v9 = vld [vmem:[%s1319_s1 + $0xe8] sm:$0xff]  }
   0x3   :  { %v997_v2 = vld [vmem:[%s1319_s1 + $0x38] sm:$0xff]   ;;  %929 = vmatprep.subr.bf16.mxu1 %v996_v1  ;;  %v1001_v6 = vld [vmem:[%s1319_s1 + $0x30] sm:$0xff]   ;;  %v1005_v10 = vld [vmem:[%s1319_s1 + $0x28] sm:$0xff]  }
   0x4   :  { %v998_v3 = vld [vmem:[%s1319_s1 + $0xb8] sm:$0xff]   ;;  %908 = vmatpush3.bf16.msra.mxu0 %v997_v2  ;;  %v1002_v7 = vld [vmem:[%s1319_s1 + $0xb0] sm:$0xff]   ;;  %v1006_v11 = vld [vmem:[%s1319_s1 + $0xa8] sm:$0xff]  }
   0x5   :  { %930 = vmatpush3.bf16.msra.mxu1 %v998_v3  ;;  %909 = vmatprep.subr.bf16.mxu0 %v999_v4  ;;  %v1007_v12 = vld [vmem:[%s1319_s1 + $0x60] sm:$0xff]   ;;  %v1011_v16 = vld [vmem:[%s1319_s1 + $0x58] sm:$0xff]   ;;  %v1015_v20 = vld [vmem:[%s1319_s1 + $0x50] sm:$0xff]  }
   0x6   :  { %931 = vmatprep.subr.bf16.mxu1 %v1000_v5  ;;  %v1008_v13 = vld [vmem:[%s1319_s1 + $0xe0] sm:$0xff]   ;;  %v1012_v17 = vld [vmem:[%s1319_s1 + $0xd8] sm:$0xff]   ;;  %v1016_v21 = vld [vmem:[%s1319_s1 + $0xd0] sm:$0xff]  }
   0x7   :  { %v1009_v14 = vld [vmem:[%s1319_s1 + $0x20] sm:$0xff]   ;;  %v1013_v18 = vld [vmem:[%s1319_s1 + $0x18] sm:$0xff]   ;;  %v1017_v22 = vld [vmem:[%s1319_s1 + $0x10] sm:$0xff]  }
   0x8   :  { %910 = vmatpush3.bf16.msra.mxu0 %v1001_v6  ;;  %v1010_v15 = vld [vmem:[%s1319_s1 + $0xa0] sm:$0xff]   ;;  %v1014_v19 = vld [vmem:[%s1319_s1 + $0x98] sm:$0xff]   ;;  %v1018_v23 = vld [vmem:[%s1319_s1 + $0x90] sm:$0xff]  }
   0x9   :  { %932 = vmatpush3.bf16.msra.mxu1 %v1002_v7  ;;  %911 = vmatprep.subr.bf16.mxu0 %v1003_v8  ;;  %v1019_v24 = vld [vmem:[%s1319_s1 + $0x48] sm:$0xff]   ;;  %v1023_v28 = vld [vmem:[%s1319_s1 + $0x40] sm:$0xff]   ;;  %v1027_v40 = vld [vmem:[%s1319_s1 + $0x178] sm:$0xff]  }
   0xa   :  { %933 = vmatprep.subr.bf16.mxu1 %v1004_v9  ;;  %v1020_v25 = vld [vmem:[%s1319_s1 + $0xc8] sm:$0xff]   ;;  %v1024_v29 = vld [vmem:[%s1319_s1 + $0xc0] sm:$0xff]   ;;  %v1028_v41 = vld [vmem:[%s1319_s1 + $0x1f8] sm:$0xff]  }
   0xb   :  { %v1021_v26 = vld [vmem:[%s1319_s1 + $0x8] sm:$0xff]   ;;  %v1025_v30 = vld [vmem:[%s1319_s1] sm:$0xff]   ;;  %v1029_v42 = vld [vmem:[%s1319_s1 + $0x138] sm:$0xff]  }
   0xc   :  { %912 = vmatpush3.bf16.msra.mxu0 %v1005_v10  ;;  %v1022_v27 = vld [vmem:[%s1319_s1 + $0x88] sm:$0xff]   ;;  %v1026_v31 = vld [vmem:[%s1319_s1 + $0x80] sm:$0xff]   ;;  %v1030_v43 = vld [vmem:[%s1319_s1 + $0x1b8] sm:$0xff]  }
   0xd   :  { %934 = vmatpush3.bf16.msra.mxu1 %v1006_v11  ;;  %913 = vmatprep.subr.bf16.mxu0 %v1007_v12  ;;  %v21_v32 = vld [vmem:[%s1320_s0] sm:$0xff]  ;;  %v22_v34 = vld [vmem:[%s1320_s0 + $0x8] sm:$0xff]  ;;  %v1031_v44 = vld [vmem:[%s1319_s1 + $0x170] sm:$0xff]  }
   0xe   :  { %935 = vmatprep.subr.bf16.mxu1 %v1008_v13  ;;  %v25_v33 = vld [vmem:[%s1320_s0 + $0x20] sm:$0xff]  ;;  %v26_v37 = vld [vmem:[%s1320_s0 + $0x28] sm:$0xff]  ;;  %v1032_v45 = vld [vmem:[%s1319_s1 + $0x1f0] sm:$0xff]  }
   0xf   :  { %v826_v35 = vcombine.low %v21_v32, %v25_v33  ;;  %v827_v36 = vcombine.high %v21_v32, %v25_v33  ;;  %v828_v38 = vcombine.low %v22_v34, %v26_v37  ;;  %v829_v39 = vcombine.high %v22_v34, %v26_v37  ;;  %v1033_v46 = vld [vmem:[%s1319_s1 + $0x130] sm:$0xff]   ;;  %v1035_v48 = vld [vmem:[%s1319_s1 + $0x168] sm:$0xff]   ;;  %v1039_v52 = vld [vmem:[%s1319_s1 + $0x160] sm:$0xff]  }
  0x10   :  { %914 = vmatpush3.bf16.msra.mxu0 %v1009_v14  ;;  %v1034_v47 = vld [vmem:[%s1319_s1 + $0x1b0] sm:$0xff]   ;;  %v1036_v49 = vld [vmem:[%s1319_s1 + $0x1e8] sm:$0xff]   ;;  %v1040_v53 = vld [vmem:[%s1319_s1 + $0x1e0] sm:$0xff]  }
  0x11   :  { %936 = vmatpush3.bf16.msra.mxu1 %v1010_v15  ;;  %915 = vmatprep.subr.bf16.mxu0 %v1011_v16  ;;  %v1037_v50 = vld [vmem:[%s1319_s1 + $0x128] sm:$0xff]   ;;  %v1041_v54 = vld [vmem:[%s1319_s1 + $0x120] sm:$0xff]   ;;  %v1043_v56 = vld [vmem:[%s1319_s1 + $0x158] sm:$0xff]  }
  0x12   :  { %937 = vmatprep.subr.bf16.mxu1 %v1012_v17  ;;  %620 = vmatprep.mubr.bf16.mxu0 %v827_v36  ;;  %v1038_v51 = vld [vmem:[%s1319_s1 + $0x1a8] sm:$0xff]   ;;  %v1042_v55 = vld [vmem:[%s1319_s1 + $0x1a0] sm:$0xff]   ;;  %v1044_v57 = vld [vmem:[%s1319_s1 + $0x1d8] sm:$0xff]  }
  0x13   :  { %661 = vmatprep.mubr.bf16.mxu1 %v829_v39  ;;  %v1045_v58 = vld [vmem:[%s1319_s1 + $0x118] sm:$0xff]   ;;  %v1047_v60 = vld [vmem:[%s1319_s1 + $0x150] sm:$0xff]   ;;  %v1051_v0 = vld [vmem:[%s1319_s1 + $0x148] sm:$0xff]  }
  0x14   :  { %916 = vmatpush3.bf16.msra.mxu0 %v1013_v18  ;;  %v1046_v59 = vld [vmem:[%s1319_s1 + $0x198] sm:$0xff]   ;;  %v1048_v61 = vld [vmem:[%s1319_s1 + $0x1d0] sm:$0xff]   ;;  %v1052_v1 = vld [vmem:[%s1319_s1 + $0x1c8] sm:$0xff]  }
  0x15   :  { %938 = vmatpush3.bf16.msra.mxu1 %v1014_v19  ;;  %917 = vmatprep.subr.bf16.mxu0 %v1015_v20  ;;  %v1049_v62 = vld [vmem:[%s1319_s1 + $0x110] sm:$0xff]   ;;  %v1053_v2 = vld [vmem:[%s1319_s1 + $0x108] sm:$0xff]   ;;  %v1055_v4 = vld [vmem:[%s1319_s1 + $0x140] sm:$0xff]  }
  0x16   :  { %939 = vmatprep.subr.bf16.mxu1 %v1016_v21  ;;  %v1050_v63 = vld [vmem:[%s1319_s1 + $0x190] sm:$0xff]   ;;  %v1054_v3 = vld [vmem:[%s1319_s1 + $0x188] sm:$0xff]   ;;  %v1056_v5 = vld [vmem:[%s1319_s1 + $0x1c0] sm:$0xff]  }
  0x17   :  { %v1057_v6 = vld [vmem:[%s1319_s1 + $0x100] sm:$0xff]   ;;  %v23_v8 = vld [vmem:[%s1320_s0 + $0x10] sm:$0xff]  ;;  %v24_v12 = vld [vmem:[%s1320_s0 + $0x18] sm:$0xff] }
  0x18   :  { %918 = vmatpush3.bf16.msra.mxu0 %v1017_v22  ;;  %v1058_v7 = vld [vmem:[%s1319_s1 + $0x180] sm:$0xff]   ;;  %v27_v9 = vld [vmem:[%s1320_s0 + $0x30] sm:$0xff]  ;;  %v28_v13 = vld [vmem:[%s1320_s0 + $0x38] sm:$0xff] }
  0x19   :  { %940 = vmatpush3.bf16.msra.mxu1 %v1018_v23  ;;  %919 = vmatprep.subr.bf16.mxu0 %v1019_v24  ;;  %v830_v10 = vcombine.low %v23_v8, %v27_v9  ;;  %v831_v11 = vcombine.high %v23_v8, %v27_v9  ;;  %v832_v14 = vcombine.low %v24_v12, %v28_v13  ;;  %v794_v8 = vlaneseq }
  0x1a   :  { %941 = vmatprep.subr.bf16.mxu1 %v1020_v25  ;;  %v833_v15 = vcombine.high %v24_v12, %v28_v13 }
  0x1b   :  { %v795_v9 = vshrl.u32 %v794_v8, 7 }
  0x1c   :  { %920 = vmatpush3.bf16.msra.mxu0 %v1021_v26  ;;  %v825_v26 = vld [vmem:[%s1321_s2] ss:$0 sm:$0xff] }
  0x1d   :  { %942 = vmatpush3.bf16.msra.mxu1 %v1022_v27  ;;  %921 = vmatprep.subr.bf16.mxu0 %v1023_v28 }
  0x1e   :  { %943 = vmatprep.subr.bf16.mxu1 %v1024_v29 }
  0x20   :  { %922 = vmatpush3.bf16.msra.mxu0 %v1025_v30 }
  0x21   :  { %944 = vmatpush3.bf16.msra.mxu1 %v1026_v31  ;;  %951 = vmatprep.subr.bf16.mxu0 %v1027_v40 }
  0x22   :  { %973 = vmatprep.subr.bf16.mxu1 %v1028_v41 }
  0x23   :  { %621 = vmatmul.mubr.bf16.vlgmr.msra.gmra.mxu0 %v826_v35 }
  0x24   :  { %662 = vmatmul.mubr.bf16.vlgmr.msra.gmra.mxu1 %v828_v38  ;;  %952 = vmatpush3.bf16.msra.mxu0 %v1029_v42 }
  0x25   :  { %974 = vmatpush3.bf16.msra.mxu1 %v1030_v43  ;;  %953 = vmatprep.subr.bf16.mxu0 %v1031_v44 }
  0x26   :  { %975 = vmatprep.subr.bf16.mxu1 %v1032_v45  ;;  %702 = vmatprep.mubr.bf16.mxu0 %v831_v11  ;;  %v796_v11 = vsub.s32 0, %v795_v9 }
  0x27   :  { %743 = vmatprep.mubr.bf16.mxu1 %v833_v15 }
  0x28   :  { %954 = vmatpush3.bf16.msra.mxu0 %v1033_v46 }
  0x29   :  { %976 = vmatpush3.bf16.msra.mxu1 %v1034_v47  ;;  %955 = vmatprep.subr.bf16.mxu0 %v1035_v48 }
  0x2a   :  { %977 = vmatprep.subr.bf16.mxu1 %v1036_v49 }
  0x2c   :  { %956 = vmatpush3.bf16.msra.mxu0 %v1037_v50 }
  0x2d   :  { %978 = vmatpush3.bf16.msra.mxu1 %v1038_v51  ;;  %957 = vmatprep.subr.bf16.mxu0 %v1039_v52 }
  0x2e   :  { %979 = vmatprep.subr.bf16.mxu1 %v1040_v53 }
  0x30   :  { %958 = vmatpush3.bf16.msra.mxu0 %v1041_v54 }
  0x31   :  { %980 = vmatpush3.bf16.msra.mxu1 %v1042_v55  ;;  %959 = vmatprep.subr.bf16.mxu0 %v1043_v56 }
  0x32   :  { %981 = vmatprep.subr.bf16.mxu1 %v1044_v57 }
  0x34   :  { %960 = vmatpush3.bf16.msra.mxu0 %v1045_v58 }
  0x35   :  { %982 = vmatpush3.bf16.msra.mxu1 %v1046_v59  ;;  %961 = vmatprep.subr.bf16.mxu0 %v1047_v60 }
  0x36   :  { %983 = vmatprep.subr.bf16.mxu1 %v1048_v61 }
  0x38   :  { %962 = vmatpush3.bf16.msra.mxu0 %v1049_v62 }
  0x39   :  { %984 = vmatpush3.bf16.msra.mxu1 %v1050_v63  ;;  %963 = vmatprep.subr.bf16.mxu0 %v1051_v0 }
  0x3a   :  { %985 = vmatprep.subr.bf16.mxu1 %v1052_v1 }
  0x3c   :  { %964 = vmatpush3.bf16.msra.mxu0 %v1053_v2 }
  0x3d   :  { %986 = vmatpush3.bf16.msra.mxu1 %v1054_v3  ;;  %965 = vmatprep.subr.bf16.mxu0 %v1055_v4 }
  0x3e   :  { %987 = vmatprep.subr.bf16.mxu1 %v1056_v5 }
  0x40   :  { %966 = vmatpush3.bf16.msra.mxu0 %v1057_v6 }
  0x41   :  { %988 = vmatpush3.bf16.msra.mxu1 %v1058_v7 }
  0x43   :  { %703 = vmatmul.mubr.bf16.vlgmr.msra.gmra.mxu0 %v830_v10  ;;  %v788_v10 = vld [vmem:[%s1322_s3] sm:$0x1] }
  0x44   :  { %744 = vmatmul.mubr.bf16.vlgmr.msra.gmra.mxu1 %v832_v14  ;;  %v790_v14 = vld [vmem:[%s1323_s4] sm:$0x1] }
  0xe3   :  { %v923_v16 = vpop.f32.mrf.mxu0 }
  0xe4   :  { %v945_v17 = vpop.f32.mrf.mxu1 }
  0xe5   :  { %v924_v18 = vpop.f32.mrf.mxu0 }
  0xe6   :  { %v946_v19 = vpop.f32.mrf.mxu1  ;;  %v925_v23 = vadd.f32 %v924_v18, %v923_v16 }
  0xe7   :  { %v926_v20 = vpop.f32.mrf.mxu0  ;;  %v947_v31 = vadd.f32 %v946_v19, %v945_v17 }
  0xe8   :  { %v948_v21 = vpop.f32.mrf.mxu1  ;;  %v623_v30 = vadd.f32 %v925_v23, %v825_v26 }
  0xe9   :  { %v927_v22 = vpop.f32.mrf.mxu0 }
  0xea   :  { %v928_v24 = vadd.f32 %v927_v22, %v926_v20  ;;  %v949_v25 = vpop.f32.mrf.mxu1  ;;  %v664_v39 = vadd.f32 %v947_v31, %v623_v30 }
  0xeb   :  { %v950_v35 = vadd.f32 %v949_v25, %v948_v21 }
  0xec   :  { %v626_v32 = vadd.f32 %v928_v24, %v825_v26 }
  0xee   :  { %v667_v40 = vadd.f32 %v950_v35, %v626_v32 }
 0x103   :  { %v967_v27 = vpop.f32.mrf.mxu0 }
 0x104   :  { %v989_v28 = vpop.f32.mrf.mxu1 }
 0x105   :  { %v968_v29 = vpop.f32.mrf.mxu0 }
 0x106   :  { %v990_v33 = vpop.f32.mrf.mxu1  ;;  %v969_v36 = vadd.f32 %v968_v29, %v967_v27 }
 0x107   :  { %v970_v34 = vpop.f32.mrf.mxu0  ;;  %v991_v46 = vadd.f32 %v990_v33, %v989_v28 }
 0x108   :  { %v992_v37 = vpop.f32.mrf.mxu1  ;;  %v705_v43 = vadd.f32 %v969_v36, %v664_v39 }
 0x109   :  { %v971_v38 = vpop.f32.mrf.mxu0 }
 0x10a   :  { %v972_v41 = vadd.f32 %v971_v38, %v970_v34  ;;  %v993_v42 = vpop.f32.mrf.mxu1  ;;  %v746_v48 = vadd.f32 %v991_v46, %v705_v43 }
 0x10b   :  { %v994_v45 = vadd.f32 %v993_v42, %v992_v37 }
 0x10c   :  { %v708_v44 = vadd.f32 %v972_v41, %v667_v40 }
 0x10e   :  { %v749_v47 = vadd.f32 %v994_v45, %v708_v44 }
 0x110   :  { %v762_v49 = vmul.f32 0.0, %v749_v47 }
 0x112   :  { %v763_v50 = vadd.f32 %v762_v49, %v746_v48 }
 0x114   :  { %v764_v51 = vrot.slane %v763_v50, 4 }
 0x116   :  { %v765_v52 = vadd.f32 %v764_v51, %v763_v50 }
 0x118   :  { %v766_v53 = vrot.slane %v765_v52, 2 }
 0x11a   :  { %v767_v54 = vadd.f32 %v766_v53, %v765_v52 }
 0x11c   :  { %v768_v55 = vrot.slane %v767_v54, 1 }
 0x11e   :  { %v769_v56 = vadd.f32 %v768_v55, %v767_v54 }
 0x120   :  { %v771_v57 = vmul.f32 0.125, %v769_v56 }
 0x122   :  { %v772_v58 = vsub.f32 %v746_v48, %v771_v57  ;;  %v773_v59 = vsub.f32 %v749_v47, %v771_v57 }
 0x124   :  { %v775_v60 = vmul.f32 0.0, %v773_v59  ;;  %v776_v61 = vmul.f32 %v772_v58, %v772_v58 }
 0x126   :  { %v777_v62 = vmul.f32 %v775_v60, %v775_v60 }
 0x128   :  { %v778_v63 = vadd.f32 %v777_v62, %v776_v61 }
 0x12a   :  { %v779_v0 = vrot.slane %v778_v63, 4 }
 0x12c   :  { %v780_v1 = vadd.f32 %v779_v0, %v778_v63 }
 0x12e   :  { %v781_v2 = vrot.slane %v780_v1, 2 }
 0x130   :  { %v782_v3 = vadd.f32 %v781_v2, %v780_v1 }
 0x132   :  { %v783_v4 = vrot.slane %v782_v3, 1 }
 0x134   :  { %v784_v5 = vadd.f32 %v783_v4, %v782_v3 }
 0x136   :  { %v785_v6 = vmul.f32 0.125, %v784_v5 }
 0x138   :  { %v786_v7 = vadd.f32 1e-05, %v785_v6 }
 0x13a   :  { %1059 = vrsqrt.f32 %v786_v7 }
 0x147   :  { %v1060_v12 = vpop.eup %1059 }
 0x148   :  { %v789_v13 = vmul.f32 %v1060_v12, %v788_v10 }
 0x14a   :  { %v791_v15 = vmul.f32 %v789_v13, %v771_v57  ;;  %v797_v16 = vrot.slane %v789_v13, %v796_v11 }
 0x14c   :  { %v792_v17 = vsub.f32 %v790_v14, %v791_v15  ;;  %v799_v18 = vmul.f32 %v797_v16, %v746_v48  ;;  %v800_v19 = vmul.f32 %v797_v16, %v749_v47 }
 0x14e   :  { %v805_v20 = vrot.slane %v792_v17, %v796_v11 }
 0x150   :  { %v807_v21 = vadd.f32 %v805_v20, %v799_v18  ;;  %v808_v22 = vadd.f32 %v805_v20, %v800_v19 }
 0x152   :  { %v809_v23 = vmax.f32 %v807_v21, 0.0  ;;  %v810_v24 = vmax.f32 %v808_v22, 0.0 }
 0x154   :  { %v905_v25 = vpack.c.bf16 %v810_v24, %v809_v23 }
 0x156   :  { %906 = vst [vmem:[%s1324_s5] sm:$0xff] %v905_v25  }

// kernel: vae_forward.11
= control target key start
LH: loop header
LB: loop body
LE: loop exit
PB: predicated region body
PF: predicated region fallthrough
CT: control target
= control target key end

     0   :  { %vm1212_vm0 = vcmask 523264   ;;  %s2253_s1 = inlined_call_operand.vmem [shape: bf16[1152,256], index: 1, kind: input, shape index: {}]   ;;  %s2254_s0 = inlined_call_operand.vmem [shape: bf16[16,1152], index: 0, kind: input, shape index: {}]   ;;  %s2255_s2 = inlined_call_operand.vmem [shape: f32[1,256], index: 2, kind: input, shape index: {}]   ;;  %s2256_s3 = inlined_call_operand.vmem [shape: f32[1,64], index: 3, kind: input, shape index: {}]   ;;  %s2257_s4 = inlined_call_operand.vmem [shape: f32[1,64], index: 4, kind: input, shape index: {}]   ;;  %s2258_s5 = inlined_call_operand.vmem [shape: bf16[16,256], index: 5, kind: output, shape index: {}]  }
   0x1   :  { %v1478_v0 = vld [vmem:[%s2253_s1 + $0x74] ss:$8 sps:$4 sm:$0xff]   ;;  %v1480_v1 = vld [vmem:[%s2253_s1 + $0x70] ss:$8 sps:$4 sm:$0xff]   ;;  %v1484_v4 = vld [vmem:[%s2253_s1 + $0x64] ss:$8 sps:$4 sm:$0xff]  }
   0x2   :  { %953 = vmatprep.subr.bf16.mxu0 %v1478_v0  ;;  %v1481_v2 = vld [vmem:[%s2253_s1 + $0x174] ss:$8 sps:$4 sm:$0xff]   ;;  %v1483_v3 = vld [vmem:[%s2253_s1 + $0x170] ss:$8 sps:$4 sm:$0xff]   ;;  %v1486_v5 = vld [vmem:[%s2253_s1 + $0x60] ss:$8 sps:$4 sm:$0xff]  }
   0x3   :  { %954 = vmatpush1.bf16.msra.mxu0 %v1480_v1  ;;  %996 = vmatprep.subr.bf16.mxu1 %v1481_v2  ;;  %v1487_v6 = vld [vmem:[%s2253_s1 + $0x164] ss:$8 sps:$4 sm:$0xff]   ;;  %v1489_v7 = vld [vmem:[%s2253_s1 + $0x160] ss:$8 sps:$4 sm:$0xff]   ;;  %v1490_v8 = vld [vmem:[%s2253_s1 + $0x54] ss:$8 sps:$4 sm:$0xff]  }
   0x4   :  { %997 = vmatpush1.bf16.msra.mxu1 %v1483_v3  ;;  %955 = vmatprep.subr.bf16.mxu0 %v1484_v4  ;;  %v1492_v9 = vld [vmem:[%s2253_s1 + $0x50] ss:$8 sps:$4 sm:$0xff]   ;;  %v1493_v10 = vld [vmem:[%s2253_s1 + $0x154] ss:$8 sps:$4 sm:$0xff]   ;;  %v1496_v11 = vld [vmem:[%s2253_s1 + $0x44] ss:$8 sps:$4 sm:$0xff]  }
   0x5   :  { %998 = vmatprep.subr.bf16.mxu1 %v1487_v6  ;;  %v1495_v12 = vld [vmem:[%s2253_s1 + $0x150] ss:$8 sps:$4 sm:$0xff]   ;;  %v1499_v13 = vld [vmem:[%s2253_s1 + $0x144] ss:$8 sps:$4 sm:$0xff]   ;;  %v1498_v14 = vld [vmem:[%s2253_s1 + $0x40] ss:$8 sps:$4 sm:$0xff]  }
   0x6   :  { %v1502_v15 = vld [vmem:[%s2253_s1 + $0x34] ss:$8 sps:$4 sm:$0xff]   ;;  %v1501_v16 = vld [vmem:[%s2253_s1 + $0x140] ss:$8 sps:$4 sm:$0xff]   ;;  %v1504_v18 = vld [vmem:[%s2253_s1 + $0x30] ss:$8 sps:$4 sm:$0xff]  }
   0x7   :  { %956 = vmatpush1.bf16.msra.mxu0 %v1486_v5  ;;  %v1505_v17 = vld [vmem:[%s2253_s1 + $0x134] ss:$8 sps:$4 sm:$0xff]   ;;  %v1508_v19 = vld [vmem:[%s2253_s1 + $0x24] ss:$8 sps:$4 sm:$0xff]   ;;  %v1507_v20 = vld [vmem:[%s2253_s1 + $0x130] ss:$8 sps:$4 sm:$0xff]  }
   0x8   :  { %957 = vmatprep.subr.bf16.mxu0 %v1490_v8  ;;  %999 = vmatpush1.bf16.msra.mxu1 %v1489_v7  ;;  %v1511_v21 = vld [vmem:[%s2253_s1 + $0x124] ss:$8 sps:$4 sm:$0xff]   ;;  %v1510_v22 = vld [vmem:[%s2253_s1 + $0x20] ss:$8 sps:$4 sm:$0xff]   ;;  %v1514_v23 = vld [vmem:[%s2253_s1 + $0x14] ss:$8 sps:$4 sm:$0xff]  }
   0x9   :  { %1000 = vmatprep.subr.bf16.mxu1 %v1493_v10  ;;  %v1513_v24 = vld [vmem:[%s2253_s1 + $0x120] ss:$8 sps:$4 sm:$0xff]   ;;  %v1517_v25 = vld [vmem:[%s2253_s1 + $0x114] ss:$8 sps:$4 sm:$0xff]   ;;  %v1516_v26 = vld [vmem:[%s2253_s1 + $0x10] ss:$8 sps:$4 sm:$0xff]  }
   0xa   :  { %v1520_v27 = vld [vmem:[%s2253_s1 + $0x4] ss:$8 sps:$4 sm:$0xff]   ;;  %v1519_v28 = vld [vmem:[%s2253_s1 + $0x110] ss:$8 sps:$4 sm:$0xff]   ;;  %v1522_v30 = vld [vmem:[%s2253_s1] ss:$8 sps:$4 sm:$0xff]  }
   0xb   :  { %958 = vmatpush1.bf16.msra.mxu0 %v1492_v9  ;;  %v1523_v29 = vld [vmem:[%s2253_s1 + $0x104] ss:$8 sps:$4 sm:$0xff]   ;;  %v1526_v31 = vld [vmem:[%s2253_s1 + $0xf4] ss:$8 sps:$4 sm:$0xff]   ;;  %v1525_v32 = vld [vmem:[%s2253_s1 + $0x100] ss:$8 sps:$4 sm:$0xff]  }
   0xc   :  { %959 = vmatprep.subr.bf16.mxu0 %v1496_v11  ;;  %1001 = vmatpush1.bf16.msra.mxu1 %v1495_v12  ;;  %v1529_v33 = vld [vmem:[%s2253_s1 + $0x1f4] ss:$8 sps:$4 sm:$0xff]   ;;  %v1528_v34 = vld [vmem:[%s2253_s1 + $0xf0] ss:$8 sps:$4 sm:$0xff]   ;;  %v1532_v35 = vld [vmem:[%s2253_s1 + $0xe4] ss:$8 sps:$4 sm:$0xff]  }
   0xd   :  { %1002 = vmatprep.subr.bf16.mxu1 %v1499_v13  ;;  %v1531_v36 = vld [vmem:[%s2253_s1 + $0x1f0] ss:$8 sps:$4 sm:$0xff]   ;;  %v1535_v37 = vld [vmem:[%s2253_s1 + $0x1e4] ss:$8 sps:$4 sm:$0xff]   ;;  %v1534_v38 = vld [vmem:[%s2253_s1 + $0xe0] ss:$8 sps:$4 sm:$0xff]  }
   0xe   :  { %v1538_v39 = vld [vmem:[%s2253_s1 + $0xd4] ss:$8 sps:$4 sm:$0xff]   ;;  %v1537_v40 = vld [vmem:[%s2253_s1 + $0x1e0] ss:$8 sps:$4 sm:$0xff]   ;;  %v1540_v42 = vld [vmem:[%s2253_s1 + $0xd0] ss:$8 sps:$4 sm:$0xff]  }
   0xf   :  { %960 = vmatpush1.bf16.msra.mxu0 %v1498_v14  ;;  %v1541_v41 = vld [vmem:[%s2253_s1 + $0x1d4] ss:$8 sps:$4 sm:$0xff]   ;;  %v1544_v43 = vld [vmem:[%s2253_s1 + $0xc4] ss:$8 sps:$4 sm:$0xff]   ;;  %v1543_v44 = vld [vmem:[%s2253_s1 + $0x1d0] ss:$8 sps:$4 sm:$0xff]  }
  0x10   :  { %961 = vmatprep.subr.bf16.mxu0 %v1502_v15  ;;  %1003 = vmatpush1.bf16.msra.mxu1 %v1501_v16  ;;  %v1547_v45 = vld [vmem:[%s2253_s1 + $0x1c4] ss:$8 sps:$4 sm:$0xff]   ;;  %v1546_v46 = vld [vmem:[%s2253_s1 + $0xc0] ss:$8 sps:$4 sm:$0xff]   ;;  %v1550_v48 = vld [vmem:[%s2253_s1 + $0xb4] ss:$8 sps:$4 sm:$0xff]  }
  0x11   :  { %1004 = vmatprep.subr.bf16.mxu1 %v1505_v17  ;;  %v1575_v47 = vld [vmem:[%s2254_s0 + $0x4] ss:$36 sps:$4 sm:$0xff]   ;;  %v1553_v50 = vld [vmem:[%s2253_s1 + $0x1b4] ss:$8 sps:$4 sm:$0xff]   ;;  %v1582_v51 = vld [vmem:[%s2254_s0 + $0xc] ss:$36 sps:$4 sm:$0xff]  }
  0x12   :  { %v1549_v49 = vld [vmem:[%s2253_s1 + $0x1c0] ss:$8 sps:$4 sm:$0xff]   ;;  %985 = vmatprep.mubr.bf16.mxu0 %v1575_v47  ;;  %v1552_v52 = vld [vmem:[%s2253_s1 + $0xb0] ss:$8 sps:$4 sm:$0xff]   ;;  %v1556_v53 = vld [vmem:[%s2253_s1 + $0xa4] ss:$8 sps:$4 sm:$0xff]   ;;  %1028 = vmatprep.mubr.bf16.mxu1 %v1582_v51 }
  0x13   :  { %962 = vmatpush1.bf16.msra.mxu0 %v1504_v18  ;;  %v1555_v54 = vld [vmem:[%s2253_s1 + $0x1b0] ss:$8 sps:$4 sm:$0xff]   ;;  %v1559_v55 = vld [vmem:[%s2253_s1 + $0x1a4] ss:$8 sps:$4 sm:$0xff]   ;;  %v1558_v56 = vld [vmem:[%s2253_s1 + $0xa0] ss:$8 sps:$4 sm:$0xff]  }
  0x14   :  { %963 = vmatprep.subr.bf16.mxu0 %v1508_v19  ;;  %1005 = vmatpush1.bf16.msra.mxu1 %v1507_v20  ;;  %v1562_v57 = vld [vmem:[%s2253_s1 + $0x94] ss:$8 sps:$4 sm:$0xff]   ;;  %v1561_v58 = vld [vmem:[%s2253_s1 + $0x1a0] ss:$8 sps:$4 sm:$0xff]   ;;  %v1564_v60 = vld [vmem:[%s2253_s1 + $0x90] ss:$8 sps:$4 sm:$0xff]  }
  0x15   :  { %1006 = vmatprep.subr.bf16.mxu1 %v1511_v21  ;;  %v1565_v59 = vld [vmem:[%s2253_s1 + $0x194] ss:$8 sps:$4 sm:$0xff]   ;;  %v1568_v61 = vld [vmem:[%s2253_s1 + $0x84] ss:$8 sps:$4 sm:$0xff]   ;;  %v1567_v62 = vld [vmem:[%s2253_s1 + $0x190] ss:$8 sps:$4 sm:$0xff]  }
  0x16   :  { %v1571_v63 = vld [vmem:[%s2253_s1 + $0x184] ss:$8 sps:$4 sm:$0xff]   ;;  %v1570_v0 = vld [vmem:[%s2253_s1 + $0x80] ss:$8 sps:$4 sm:$0xff]   ;;  %v1579_v1 = vld [vmem:[%s2253_s1 + $0x274] ss:$8 sps:$4 sm:$0xff]  }
  0x17   :  { %964 = vmatpush1.bf16.msra.mxu0 %v1510_v22  ;;  %v1576_v2 = vld [vmem:[%s2253_s1 + $0x180] ss:$8 sps:$4 sm:$0xff]   ;;  %v1585_v4 = vld [vmem:[%s2253_s1 + $0x374] ss:$8 sps:$4 sm:$0xff]   ;;  %v1577_v5 = vld [vmem:[%s2253_s1 + $0x270] ss:$8 sps:$4 sm:$0xff]  }
  0x18   :  { %965 = vmatprep.subr.bf16.mxu0 %v1514_v23  ;;  %1007 = vmatpush1.bf16.msra.mxu1 %v1513_v24  ;;  %v1573_v3 = vld [vmem:[%s2254_s0] ss:$36 sps:$4 sm:$0xff]   ;;  %v1580_v6 = vld [vmem:[%s2254_s0 + $0x8] ss:$36 sps:$4 sm:$0xff]   ;;  %v1583_v8 = vld [vmem:[%s2253_s1 + $0x370] ss:$8 sps:$4 sm:$0xff]  }
  0x19   :  { %1008 = vmatprep.subr.bf16.mxu1 %v1517_v25  ;;  %v1588_v7 = vld [vmem:[%s2253_s1 + $0x264] ss:$8 sps:$4 sm:$0xff]   ;;  %v1586_v10 = vld [vmem:[%s2253_s1 + $0x260] ss:$8 sps:$4 sm:$0xff]   ;;  %v1594_v11 = vld [vmem:[%s2253_s1 + $0x254] ss:$8 sps:$4 sm:$0xff]  }
  0x1a   :  { %v1591_v9 = vld [vmem:[%s2253_s1 + $0x364] ss:$8 sps:$4 sm:$0xff]   ;;  %v1589_v12 = vld [vmem:[%s2253_s1 + $0x360] ss:$8 sps:$4 sm:$0xff]   ;;  %v1597_v13 = vld [vmem:[%s2253_s1 + $0x354] ss:$8 sps:$4 sm:$0xff]  }
  0x1b   :  { %966 = vmatpush1.bf16.msra.mxu0 %v1516_v26  ;;  %v1592_v14 = vld [vmem:[%s2253_s1 + $0x250] ss:$8 sps:$4 sm:$0xff]   ;;  %v1600_v15 = vld [vmem:[%s2253_s1 + $0x244] ss:$8 sps:$4 sm:$0xff]   ;;  %v1598_v18 = vld [vmem:[%s2253_s1 + $0x240] ss:$8 sps:$4 sm:$0xff]  }
  0x1c   :  { %967 = vmatprep.subr.bf16.mxu0 %v1520_v27  ;;  %1009 = vmatpush1.bf16.msra.mxu1 %v1519_v28  ;;  %v1595_v16 = vld [vmem:[%s2253_s1 + $0x350] ss:$8 sps:$4 sm:$0xff]   ;;  %v1603_v17 = vld [vmem:[%s2253_s1 + $0x344] ss:$8 sps:$4 sm:$0xff]   ;;  %v1606_v19 = vld [vmem:[%s2253_s1 + $0x234] ss:$8 sps:$4 sm:$0xff]  }
  0x1d   :  { %1010 = vmatprep.subr.bf16.mxu1 %v1523_v29  ;;  %v1601_v20 = vld [vmem:[%s2253_s1 + $0x340] ss:$8 sps:$4 sm:$0xff]   ;;  %v1609_v21 = vld [vmem:[%s2253_s1 + $0x334] ss:$8 sps:$4 sm:$0xff]   ;;  %v1604_v22 = vld [vmem:[%s2253_s1 + $0x230] ss:$8 sps:$4 sm:$0xff]  }
  0x1e   :  { %v1612_v23 = vld [vmem:[%s2253_s1 + $0x224] ss:$8 sps:$4 sm:$0xff]   ;;  %v1607_v24 = vld [vmem:[%s2253_s1 + $0x330] ss:$8 sps:$4 sm:$0xff]   ;;  %v1610_v26 = vld [vmem:[%s2253_s1 + $0x220] ss:$8 sps:$4 sm:$0xff]  }
  0x1f   :  { %968 = vmatpush1.bf16.msra.mxu0 %v1522_v30  ;;  %v1615_v25 = vld [vmem:[%s2253_s1 + $0x324] ss:$8 sps:$4 sm:$0xff]   ;;  %v1618_v27 = vld [vmem:[%s2253_s1 + $0x214] ss:$8 sps:$4 sm:$0xff]   ;;  %v1613_v28 = vld [vmem:[%s2253_s1 + $0x320] ss:$8 sps:$4 sm:$0xff]  }
  0x20   :  { %969 = vmatprep.subr.bf16.mxu0 %v1526_v31  ;;  %1011 = vmatpush1.bf16.msra.mxu1 %v1525_v32  ;;  %v1621_v29 = vld [vmem:[%s2253_s1 + $0x314] ss:$8 sps:$4 sm:$0xff]   ;;  %v1616_v30 = vld [vmem:[%s2253_s1 + $0x210] ss:$8 sps:$4 sm:$0xff]   ;;  %v1624_v32 = vld [vmem:[%s2253_s1 + $0x204] ss:$8 sps:$4 sm:$0xff]  }
  0x21   :  { %1012 = vmatprep.subr.bf16.mxu1 %v1529_v33  ;;  %v1619_v31 = vld [vmem:[%s2253_s1 + $0x310] ss:$8 sps:$4 sm:$0xff]   ;;  %v1645_v47 = vld [vmem:[%s2253_s1 + $0x3d4] ss:$8 sps:$4 sm:$0xff]   ;;  %v1651_v51 = vld [vmem:[%s2253_s1 + $0x3c4] ss:$8 sps:$4 sm:$0xff]  }
  0x22   :  { %v1678_v33 = vld [vmem:[%s2254_s0 + $0x14] ss:$36 sps:$4 sm:$0xff]  }
  0x23   :  { %970 = vmatpush2.bf16.msra.mxu0 %v1528_v34  ;;  %v1627_v34 = vld [vmem:[%s2253_s1 + $0x304] ss:$8 sps:$4 sm:$0xff]  }
  0x24   :  { %971 = vmatprep.subr.bf16.mxu0 %v1532_v35  ;;  %1013 = vmatpush2.bf16.msra.mxu1 %v1531_v36  ;;  %v1622_v35 = vld [vmem:[%s2253_s1 + $0x200] ss:$8 sps:$4 sm:$0xff]  }
  0x25   :  { %1014 = vmatprep.subr.bf16.mxu1 %v1535_v37  ;;  %v1684_v36 = vld [vmem:[%s2254_s0 + $0x1c] ss:$36 sps:$4 sm:$0xff]  }
  0x26   :  { %v1630_v37 = vld [vmem:[%s2253_s1 + $0x2f4] ss:$8 sps:$4 sm:$0xff]  }
  0x27   :  { %972 = vmatpush2.bf16.msra.mxu0 %v1534_v38  ;;  %v1625_v38 = vld [vmem:[%s2253_s1 + $0x300] ss:$8 sps:$4 sm:$0xff]  }
  0x28   :  { %973 = vmatprep.subr.bf16.mxu0 %v1538_v39  ;;  %1015 = vmatpush2.bf16.msra.mxu1 %v1537_v40  ;;  %v1633_v39 = vld [vmem:[%s2253_s1 + $0x3f4] ss:$8 sps:$4 sm:$0xff]   ;;  %v1628_v40 = vld [vmem:[%s2253_s1 + $0x2f0] ss:$8 sps:$4 sm:$0xff]  }
  0x29   :  { %1016 = vmatprep.subr.bf16.mxu1 %v1541_v41  ;;  %v1636_v41 = vld [vmem:[%s2253_s1 + $0x2e4] ss:$8 sps:$4 sm:$0xff]  }
  0x2b   :  { %974 = vmatpush2.bf16.msra.mxu0 %v1540_v42  ;;  %v1631_v42 = vld [vmem:[%s2253_s1 + $0x3f0] ss:$8 sps:$4 sm:$0xff]  }
  0x2c   :  { %975 = vmatprep.subr.bf16.mxu0 %v1544_v43  ;;  %1017 = vmatpush2.bf16.msra.mxu1 %v1543_v44  ;;  %v1639_v43 = vld [vmem:[%s2253_s1 + $0x3e4] ss:$8 sps:$4 sm:$0xff]   ;;  %v1634_v44 = vld [vmem:[%s2253_s1 + $0x2e0] ss:$8 sps:$4 sm:$0xff]  }
  0x2d   :  { %1018 = vmatprep.subr.bf16.mxu1 %v1547_v45  ;;  %v1642_v45 = vld [vmem:[%s2253_s1 + $0x2d4] ss:$8 sps:$4 sm:$0xff]  }
  0x2f   :  { %976 = vmatpush2.bf16.msra.mxu0 %v1546_v46  ;;  %v1637_v46 = vld [vmem:[%s2253_s1 + $0x3e0] ss:$8 sps:$4 sm:$0xff]  }
  0x30   :  { %977 = vmatprep.subr.bf16.mxu0 %v1550_v48  ;;  %1019 = vmatpush2.bf16.msra.mxu1 %v1549_v49  ;;  %v1640_v48 = vld [vmem:[%s2253_s1 + $0x2d0] ss:$8 sps:$4 sm:$0xff]   ;;  %v1648_v49 = vld [vmem:[%s2253_s1 + $0x2c4] ss:$8 sps:$4 sm:$0xff]  }
  0x31   :  { %1020 = vmatprep.subr.bf16.mxu1 %v1553_v50  ;;  %v1643_v50 = vld [vmem:[%s2253_s1 + $0x3d0] ss:$8 sps:$4 sm:$0xff]  }
  0x33   :  { %978 = vmatpush2.bf16.msra.mxu0 %v1552_v52  ;;  %v1646_v52 = vld [vmem:[%s2253_s1 + $0x2c0] ss:$8 sps:$4 sm:$0xff]  }
  0x34   :  { %979 = vmatprep.subr.bf16.mxu0 %v1556_v53  ;;  %1021 = vmatpush2.bf16.msra.mxu1 %v1555_v54  ;;  %v1654_v53 = vld [vmem:[%s2253_s1 + $0x2b4] ss:$8 sps:$4 sm:$0xff]   ;;  %v1649_v54 = vld [vmem:[%s2253_s1 + $0x3c0] ss:$8 sps:$4 sm:$0xff]  }
  0x35   :  { %1022 = vmatprep.subr.bf16.mxu1 %v1559_v55  ;;  %v1657_v55 = vld [vmem:[%s2253_s1 + $0x3b4] ss:$8 sps:$4 sm:$0xff]  }
  0x37   :  { %980 = vmatpush2.bf16.msra.mxu0 %v1558_v56  ;;  %v1652_v56 = vld [vmem:[%s2253_s1 + $0x2b0] ss:$8 sps:$4 sm:$0xff]  }
  0x38   :  { %981 = vmatprep.subr.bf16.mxu0 %v1562_v57  ;;  %1023 = vmatpush2.bf16.msra.mxu1 %v1561_v58  ;;  %v1660_v57 = vld [vmem:[%s2253_s1 + $0x2a4] ss:$8 sps:$4 sm:$0xff]   ;;  %v1655_v58 = vld [vmem:[%s2253_s1 + $0x3b0] ss:$8 sps:$4 sm:$0xff]  }
  0x39   :  { %1024 = vmatprep.subr.bf16.mxu1 %v1565_v59  ;;  %v1663_v59 = vld [vmem:[%s2253_s1 + $0x3a4] ss:$8 sps:$4 sm:$0xff]  }
  0x3b   :  { %982 = vmatpush2.bf16.msra.mxu0 %v1564_v60  ;;  %v1658_v60 = vld [vmem:[%s2253_s1 + $0x2a0] ss:$8 sps:$4 sm:$0xff]  }
  0x3c   :  { %983 = vmatprep.subr.bf16.mxu0 %v1568_v61  ;;  %1025 = vmatpush2.bf16.msra.mxu1 %v1567_v62  ;;  %v1666_v61 = vld [vmem:[%s2253_s1 + $0x294] ss:$8 sps:$4 sm:$0xff]   ;;  %v1661_v62 = vld [vmem:[%s2253_s1 + $0x3a0] ss:$8 sps:$4 sm:$0xff]  }
  0x3d   :  { %1026 = vmatprep.subr.bf16.mxu1 %v1571_v63  ;;  %v1669_v63 = vld [vmem:[%s2253_s1 + $0x394] ss:$8 sps:$4 sm:$0xff]  }
  0x3f   :  { %984 = vmatpush2.bf16.msra.mxu0 %v1570_v0  ;;  %v1664_v0 = vld [vmem:[%s2253_s1 + $0x290] ss:$8 sps:$4 sm:$0xff]  }
  0x40   :  { %1039 = vmatprep.subr.bf16.mxu0 %v1579_v1  ;;  %1027 = vmatpush2.bf16.msra.mxu1 %v1576_v2  ;;  %v1672_v1 = vld [vmem:[%s2253_s1 + $0x284] ss:$8 sps:$4 sm:$0xff]   ;;  %v1667_v2 = vld [vmem:[%s2253_s1 + $0x390] ss:$8 sps:$4 sm:$0xff]  }
  0x41   :  { %1082 = vmatprep.subr.bf16.mxu1 %v1585_v4  ;;  %v1670_v4 = vld [vmem:[%s2253_s1 + $0x280] ss:$8 sps:$4 sm:$0xff]  }
  0x42   :  { %986 = vmatmul.mubr.bf16.vlgmr.msra.gmra.mxu0 %v1573_v3  ;;  %v1675_v3 = vld [vmem:[%s2253_s1 + $0x384] ss:$8 sps:$4 sm:$0xff]  }
  0x43   :  { %1040 = vmatpush1.bf16.msra.mxu0 %v1577_v5  ;;  %1029 = vmatmul.mubr.bf16.vlgmr.msra.gmra.mxu1 %v1580_v6  ;;  %v1681_v5 = vld [vmem:[%s2253_s1 + $0x474] ss:$8 sps:$4 sm:$0xff]   ;;  %v1673_v6 = vld [vmem:[%s2253_s1 + $0x380] ss:$8 sps:$4 sm:$0xff]  }
  0x44   :  { %1041 = vmatprep.subr.bf16.mxu0 %v1588_v7  ;;  %1083 = vmatpush1.bf16.msra.mxu1 %v1583_v8  ;;  %v1676_v7 = vld [vmem:[%s2254_s0 + $0x10] ss:$36 sps:$4 sm:$0xff]  }
  0x45   :  { %1084 = vmatprep.subr.bf16.mxu1 %v1591_v9  ;;  %1071 = vmatprep.mubr.bf16.mxu0 %v1678_v33  ;;  %v1679_v8 = vld [vmem:[%s2253_s1 + $0x470] ss:$8 sps:$4 sm:$0xff]  }
  0x46   :  { %1114 = vmatprep.mubr.bf16.mxu1 %v1684_v36  ;;  %v1682_v9 = vld [vmem:[%s2254_s0 + $0x18] ss:$36 sps:$4 sm:$0xff]  }
  0x47   :  { %1042 = vmatpush1.bf16.msra.mxu0 %v1586_v10  ;;  %v1687_v10 = vld [vmem:[%s2253_s1 + $0x464] ss:$8 sps:$4 sm:$0xff]  }
  0x48   :  { %1043 = vmatprep.subr.bf16.mxu0 %v1594_v11  ;;  %1085 = vmatpush1.bf16.msra.mxu1 %v1589_v12  ;;  %v1685_v11 = vld [vmem:[%s2253_s1 + $0x460] ss:$8 sps:$4 sm:$0xff]   ;;  %v1709_v12 = vmov 0  }
  0x49   :  { %1086 = vmatprep.subr.bf16.mxu1 %v1597_v13  ;;  %v1690_v13 = vld [vmem:[%s2253_s1 + $0x454] ss:$8 sps:$4 sm:$0xff]  }
  0x4b   :  { %1044 = vmatpush1.bf16.msra.mxu0 %v1592_v14  ;;  %v1688_v14 = vld [vmem:[%s2253_s1 + $0x450] ss:$8 sps:$4 sm:$0xff]  }
  0x4c   :  { %1045 = vmatprep.subr.bf16.mxu0 %v1600_v15  ;;  %1087 = vmatpush1.bf16.msra.mxu1 %v1595_v16  ;;  %v1693_v15 = vld [vmem:[%s2253_s1 + $0x444] ss:$8 sps:$4 sm:$0xff]   ;;  %v1691_v16 = vld [vmem:[%s2253_s1 + $0x440] ss:$8 sps:$4 sm:$0xff]  }
  0x4d   :  { %1088 = vmatprep.subr.bf16.mxu1 %v1603_v17  ;;  %v1696_v17 = vld [vmem:[%s2253_s1 + $0x434] ss:$8 sps:$4 sm:$0xff]  }
  0x4f   :  { %1046 = vmatpush1.bf16.msra.mxu0 %v1598_v18  ;;  %v1694_v18 = vld [vmem:[%s2253_s1 + $0x430] ss:$8 sps:$4 sm:$0xff]  }
  0x50   :  { %1047 = vmatprep.subr.bf16.mxu0 %v1606_v19  ;;  %1089 = vmatpush1.bf16.msra.mxu1 %v1601_v20  ;;  %v1699_v19 = vld [vmem:[%s2253_s1 + $0x424] ss:$8 sps:$4 sm:$0xff]   ;;  %v1697_v20 = vld [vmem:[%s2253_s1 + $0x420] ss:$8 sps:$4 sm:$0xff]  }
  0x51   :  { %1090 = vmatprep.subr.bf16.mxu1 %v1609_v21  ;;  %v1702_v21 = vld [vmem:[%s2253_s1 + $0x414] ss:$8 sps:$4 sm:$0xff]  }
  0x53   :  { %1048 = vmatpush1.bf16.msra.mxu0 %v1604_v22  ;;  %v1700_v22 = vld [vmem:[%s2253_s1 + $0x410] ss:$8 sps:$4 sm:$0xff]  }
  0x54   :  { %1049 = vmatprep.subr.bf16.mxu0 %v1612_v23  ;;  %1091 = vmatpush1.bf16.msra.mxu1 %v1607_v24  ;;  %v1705_v23 = vld [vmem:[%s2253_s1 + $0x404] ss:$8 sps:$4 sm:$0xff]   ;;  %v1703_v24 = vld [vmem:[%s2253_s1 + $0x400] ss:$8 sps:$4 sm:$0xff]  }
  0x55   :  { %1092 = vmatprep.subr.bf16.mxu1 %v1615_v25  ;;  %v1706_v25 = vld [vmem:[%s2254_s0 + $0x20] ss:$36 sps:$4 sm:$0xff]   ;;  %s1710_s0 = smov 64  }
  0x57   :  { %1050 = vmatpush1.bf16.msra.mxu0 %v1610_v26 }
  0x58   :  { %1051 = vmatprep.subr.bf16.mxu0 %v1618_v27  ;;  %1093 = vmatpush1.bf16.msra.mxu1 %v1613_v28 }
  0x59   :  { %1094 = vmatprep.subr.bf16.mxu1 %v1621_v29  ;;  %v177_v29 = vlaneseq }
  0x5b   :  { %1052 = vmatpush1.bf16.msra.mxu0 %v1616_v30 }
  0x5c   :  { %1053 = vmatprep.subr.bf16.mxu0 %v1624_v32  ;;  %1095 = vmatpush1.bf16.msra.mxu1 %v1619_v31  ;;  %v178_v32 = vshrl.u32 %v177_v29, 7 }
  0x5d   :  { %1096 = vmatprep.subr.bf16.mxu1 %v1627_v34 }
  0x5e   :  { %v2200_v36 = vsub.s32 0, %v178_v32 }
  0x5f   :  { %1054 = vmatpush1.bf16.msra.mxu0 %v1622_v35 }
  0x60   :  { %1055 = vmatprep.subr.bf16.mxu0 %v1630_v37  ;;  %1097 = vmatpush1.bf16.msra.mxu1 %v1625_v38  ;;  %v175_v37 = vld [vmem:[%s2255_s2] sm:$0x3] }
  0x61   :  { %1098 = vmatprep.subr.bf16.mxu1 %v1633_v39  ;;  %v183_v39 = vsub.s32 1, %v178_v32 }
  0x63   :  { %1056 = vmatpush2.bf16.msra.mxu0 %v1628_v40 }
  0x64   :  { %1057 = vmatprep.subr.bf16.mxu0 %v1636_v41  ;;  %1099 = vmatpush2.bf16.msra.mxu1 %v1631_v42  ;;  %v180_v42 = vrot.slane %v175_v37, %v2200_v36 }
  0x65   :  { %1100 = vmatprep.subr.bf16.mxu1 %v1639_v43  ;;  %v184_v43 = vrot.slane %v175_v37, %v183_v39 }
  0x67   :  { %1058 = vmatpush2.bf16.msra.mxu0 %v1634_v44 }
  0x68   :  { %1059 = vmatprep.subr.bf16.mxu0 %v1642_v45  ;;  %1101 = vmatpush2.bf16.msra.mxu1 %v1637_v46 }
  0x69   :  { %1102 = vmatprep.subr.bf16.mxu1 %v1645_v47 }
  0x6b   :  { %1060 = vmatpush2.bf16.msra.mxu0 %v1640_v48 }
  0x6c   :  { %1061 = vmatprep.subr.bf16.mxu0 %v1648_v49  ;;  %1103 = vmatpush2.bf16.msra.mxu1 %v1643_v50 }
  0x6d   :  { %1104 = vmatprep.subr.bf16.mxu1 %v1651_v51 }
  0x6f   :  { %1062 = vmatpush2.bf16.msra.mxu0 %v1646_v52 }
  0x70   :  { %1063 = vmatprep.subr.bf16.mxu0 %v1654_v53  ;;  %1105 = vmatpush2.bf16.msra.mxu1 %v1649_v54 }
  0x71   :  { %1106 = vmatprep.subr.bf16.mxu1 %v1657_v55 }
  0x73   :  { %1064 = vmatpush2.bf16.msra.mxu0 %v1652_v56 }
  0x74   :  { %1065 = vmatprep.subr.bf16.mxu0 %v1660_v57  ;;  %1107 = vmatpush2.bf16.msra.mxu1 %v1655_v58 }
  0x75   :  { %1108 = vmatprep.subr.bf16.mxu1 %v1663_v59 }
  0x77   :  { %1066 = vmatpush2.bf16.msra.mxu0 %v1658_v60 }
  0x78   :  { %1067 = vmatprep.subr.bf16.mxu0 %v1666_v61  ;;  %1109 = vmatpush2.bf16.msra.mxu1 %v1661_v62 }
  0x79   :  { %1110 = vmatprep.subr.bf16.mxu1 %v1669_v63 }
  0x7b   :  { %1068 = vmatpush2.bf16.msra.mxu0 %v1664_v0 }
  0x7c   :  { %1069 = vmatprep.subr.bf16.mxu0 %v1672_v1  ;;  %1111 = vmatpush2.bf16.msra.mxu1 %v1667_v2 }
  0x7d   :  { %1112 = vmatprep.subr.bf16.mxu1 %v1675_v3 }
  0x7f   :  { %1070 = vmatpush2.bf16.msra.mxu0 %v1670_v4 }
  0x80   :  { %1125 = vmatprep.subr.bf16.mxu0 %v1681_v5  ;;  %1113 = vmatpush2.bf16.msra.mxu1 %v1673_v6 }
  0x82   :  { %1072 = vmatmul.mubr.bf16.vlgmr.msra.gmra.mxu0 %v1676_v7 }
  0x83   :  { %1126 = vmatpush1.bf16.msra.mxu0 %v1679_v8  ;;  %1157 = vmatprep.mubr.bf16.mxu0 %v1709_v12 }
  0x84   :  { %1115 = vmatmul.mubr.bf16.vlgmr.msra.gmra.mxu1 %v1682_v9  ;;  %1127 = vmatprep.subr.bf16.mxu0 %v1687_v10 }
  0x87   :  { %1128 = vmatpush1.bf16.msra.mxu0 %v1685_v11 }
  0x88   :  { %1129 = vmatprep.subr.bf16.mxu0 %v1690_v13 }
  0x8b   :  { %1130 = vmatpush1.bf16.msra.mxu0 %v1688_v14 }
  0x8c   :  { %1131 = vmatprep.subr.bf16.mxu0 %v1693_v15 }
  0x8f   :  { %1132 = vmatpush1.bf16.msra.mxu0 %v1691_v16 }
  0x90   :  { %1133 = vmatprep.subr.bf16.mxu0 %v1696_v17 }
  0x93   :  { %1134 = vmatpush1.bf16.msra.mxu0 %v1694_v18 }
  0x94   :  { %1135 = vmatprep.subr.bf16.mxu0 %v1699_v19 }
  0x97   :  { %1136 = vmatpush1.bf16.msra.mxu0 %v1697_v20 }
  0x98   :  { %1137 = vmatprep.subr.bf16.mxu0 %v1702_v21 }
  0x9b   :  { %1138 = vmatpush1.bf16.msra.mxu0 %v1700_v22 }
  0x9c   :  { %1139 = vmatprep.subr.bf16.mxu0 %v1705_v23 }
  0x9f   :  { %1140 = vmatpush1.bf16.msra.mxu0 %v1703_v24 }
  0xa2   :  { %1158 = vmatmul.mubr.bf16.vlgmr.msra.gmra.mxu0 %v1706_v25 }
 0x102   :  { %v987_v26 = vpop.f32.mrf.mxu0 }
 0x103   :  { %v1030_v28 = vpop.f32.mrf.mxu1  ;;  %v988_v47 = vadd.f32 %v987_v26, %v180_v42 }
 0x104   :  { %v989_v27 = vpop.f32.mrf.mxu0 }
 0x105   :  { %v1032_v31 = vpop.f32.mrf.mxu1  ;;  %v990_v49 = vadd.f32 %v989_v27, %v184_v43  ;;  %v1031_v53 = vadd.f32 %v1030_v28, %v988_v47 }
 0x106   :  { %v991_v30 = vpop.f32.mrf.mxu0 }
 0x107   :  { %v1034_v34 = vpop.f32.mrf.mxu1  ;;  %v992_v44 = vadd.f32 %v991_v30, %v180_v42  ;;  %v1033_v57 = vadd.f32 %v1032_v31, %v990_v49 }
 0x108   :  { %v993_v33 = vpop.f32.mrf.mxu0 }
 0x109   :  { %v1036_v38 = vpop.f32.mrf.mxu1  ;;  %v994_v48 = vadd.f32 %v993_v33, %v184_v43  ;;  %v1035_v50 = vadd.f32 %v1034_v34, %v992_v44 }
 0x10b   :  { %v1037_v54 = vadd.f32 %v1036_v38, %v994_v48 }
 0x142   :  { %v1073_v35 = vpop.f32.mrf.mxu0 }
 0x143   :  { %v1074_v58 = vadd.f32 %v1073_v35, %v1031_v53 }
 0x144   :  { %v1075_v40 = vpop.f32.mrf.mxu0  ;;  %v1116_v41 = vpop.f32.mrf.mxu1 }
 0x145   :  { %v1076_v62 = vadd.f32 %v1075_v40, %v1033_v57  ;;  %v1117_v1 = vadd.f32 %v1116_v41, %v1074_v58 }
 0x146   :  { %v1077_v45 = vpop.f32.mrf.mxu0  ;;  %v1118_v46 = vpop.f32.mrf.mxu1 }
 0x147   :  { %v1078_v55 = vadd.f32 %v1077_v45, %v1035_v50  ;;  %v1119_v5 = vadd.f32 %v1118_v46, %v1076_v62 }
 0x148   :  { %v1079_v51 = vpop.f32.mrf.mxu0  ;;  %v1120_v52 = vpop.f32.mrf.mxu1 }
 0x149   :  { %v1080_v59 = vadd.f32 %v1079_v51, %v1037_v54  ;;  %v1121_v63 = vadd.f32 %v1120_v52, %v1078_v55 }
 0x14a   :  { %v1122_v60 = vpop.f32.mrf.mxu1 }
 0x14b   :  { %v1123_v2 = vadd.f32 %v1122_v60, %v1080_v59 }
 0x162   :  { %v1159_v56 = vpop.f32.mrf.mxu0 }
 0x163   :  { %v2208_v6 = vadd.f32 %v1159_v56, %v1117_v1 }
 0x164   :  { %v1161_v61 = vpop.f32.mrf.mxu0 }
 0x165   :  { %v2213_v9 = vadd.f32 %v1161_v61, %v1119_v5 }
 0x166   :  { %v1163_v0 = vpop.f32.mrf.mxu0 }
 0x167   :  { %v2206_v3 = vadd.f32 %v1163_v0, %v1121_v63 }
 0x168   :  { %v1165_v4 = vpop.f32.mrf.mxu0 }
 0x169   :  { %v1179_v7 = vmul.f32 0.0, %v2206_v3  ;;  %v2211_v8 = vadd.f32 %v1165_v4, %v1123_v2  ;;  %v1258_v2 = vld [vmem:[%s2256_s3] sm:$0x1] }
 0x16b   :  { %v1181_v10 = vadd.f32 %v1179_v7, %v2208_v6  ;;  %v1180_v11 = vmul.f32 0.0, %v2211_v8  ;;  %v1260_v7 = vld [vmem:[%s2257_s4] sm:$0x1] }
 0x16d   :  { %v1188_v12 = vadd.f32 %v1180_v11, %v2213_v9  ;;  %v1182_v13 = vrot.slane %v1181_v10, 4 }
 0x16f   :  { %v1189_v14 = vrot.slane %v1188_v12, 4  ;;  %v1183_v15 = vadd.f32 %v1182_v13, %v1181_v10 }
 0x171   :  { %v1184_v16 = vrot.slane %v1183_v15, 2  ;;  %v1190_v17 = vadd.f32 %v1189_v14, %v1188_v12 }
 0x173   :  { %v1185_v18 = vadd.f32 %v1184_v16, %v1183_v15  ;;  %v1191_v19 = vrot.slane %v1190_v17, 2 }
 0x175   :  { %v1186_v20 = vrot.slane %v1185_v18, 1  ;;  %v1192_v21 = vadd.f32 %v1191_v19, %v1190_v17 }
 0x177   :  { %v1187_v22 = vadd.f32 %v1186_v20, %v1185_v18  ;;  %v1193_v23 = vrot.slane %v1192_v21, 1 }
 0x179   :  { %1196 = vrot.lane.b32.xlu0 %v1187_v22, %s1710_s0  ;;  %v1194_v24 = vadd.f32 %v1193_v23, %v1192_v21 }
 0x17d   :  { %1202 = vrot.lane.b32.xlu0 %v1194_v24, %s1710_s0 }
 0x1eb   :  { %v1197_v25 = vpop.permute.xlu0 %1196 }
 0x1ec   :  { %v1199_v26 = vadd.f32 %v1197_v25, %v1187_v22 }
 0x1ee   :  { %v1200_v27 = vadd.f32 %v1199_v26, %v1194_v24 }
 0x1ef   :  { %v1203_v28 = vpop.permute.xlu0 %1202 }
 0x1f0   :  { %v1205_v29 = vadd.f32 %v1203_v28, %v1200_v27 }
 0x1f2   :  { %v1207_v30 = vmul.f32 0.03125, %v1205_v29 }
 0x1f4   :  { %1209 = vrot.lane.b32.xlu1 %v1207_v30, %s1710_s0 }
 0x266   :  { %v1210_v31 = vpop.permute.xlu1 %1209 }
 0x267   :  { %v1213_v32 = vsel %vm1212_vm0, %v1207_v30, %v1210_v31 }
 0x268   :  { %v1217_v33 = vrot.slane %v1213_v32, %v2200_v36 }
 0x26a   :  { %v1218_v34 = vsub.f32 %v2208_v6, %v1217_v33  ;;  %v1219_v35 = vsub.f32 %v2213_v9, %v1217_v33  ;;  %v1220_v37 = vsub.f32 %v2206_v3, %v1217_v33  ;;  %v1221_v38 = vsub.f32 %v2211_v8, %v1217_v33 }
 0x26c   :  { %v1224_v39 = vmul.f32 0.0, %v1220_v37  ;;  %v1225_v40 = vmul.f32 0.0, %v1221_v38  ;;  %v1226_v41 = vmul.f32 %v1218_v34, %v1218_v34  ;;  %v1227_v42 = vmul.f32 %v1219_v35, %v1219_v35 }
 0x26e   :  { %v1228_v43 = vmul.f32 %v1224_v39, %v1224_v39  ;;  %v1229_v44 = vmul.f32 %v1225_v40, %v1225_v40 }
 0x270   :  { %v1237_v45 = vadd.f32 %v1229_v44, %v1227_v42  ;;  %v1230_v46 = vadd.f32 %v1228_v43, %v1226_v41 }
 0x272   :  { %v1238_v47 = vrot.slane %v1237_v45, 4  ;;  %v1231_v48 = vrot.slane %v1230_v46, 4 }
 0x274   :  { %v1239_v49 = vadd.f32 %v1238_v47, %v1237_v45  ;;  %v1232_v50 = vadd.f32 %v1231_v48, %v1230_v46 }
 0x276   :  { %v1240_v51 = vrot.slane %v1239_v49, 2  ;;  %v1233_v52 = vrot.slane %v1232_v50, 2 }
 0x278   :  { %v1241_v53 = vadd.f32 %v1240_v51, %v1239_v49  ;;  %v1234_v54 = vadd.f32 %v1233_v52, %v1232_v50 }
 0x27a   :  { %v1242_v55 = vrot.slane %v1241_v53, 1  ;;  %v1235_v56 = vrot.slane %v1234_v54, 1 }
 0x27c   :  { %v1243_v57 = vadd.f32 %v1242_v55, %v1241_v53  ;;  %v1236_v58 = vadd.f32 %v1235_v56, %v1234_v54 }
 0x27e   :  { %1251 = vrot.lane.b32.xlu0 %v1243_v57, %s1710_s0  ;;  %1245 = vrot.lane.b32.xlu1 %v1236_v58, %s1710_s0 }
 0x2f0   :  { %v1246_v59 = vpop.permute.xlu1 %1245  ;;  %v1252_v62 = vpop.permute.xlu0 %1251 }
 0x2f1   :  { %v1248_v60 = vadd.f32 %v1246_v59, %v1236_v58 }
 0x2f3   :  { %v1249_v61 = vadd.f32 %v1248_v60, %v1243_v57 }
 0x2f5   :  { %v1254_v63 = vadd.f32 %v1252_v62, %v1249_v61 }
 0x2f7   :  { %v1255_v0 = vmul.f32 0.03125, %v1254_v63 }
 0x2f9   :  { %v1256_v1 = vadd.f32 1e-05, %v1255_v0 }
 0x2fb   :  { %1707 = vrsqrt.f32 %v1256_v1 }
 0x308   :  { %v1708_v4 = vpop.eup %1707 }
 0x309   :  { %v1259_v5 = vmul.f32 %v1708_v4, %v1258_v2 }
 0x30b   :  { %v1267_v10 = vrot.slane %v1259_v5, %v2200_v36  ;;  %v1261_v11 = vmul.f32 %v1259_v5, %v1207_v30 }
 0x30d   :  { %1268 = vrot.lane.b32.xlu1 %v1267_v10, %s1710_s0  ;;  %v1262_v12 = vsub.f32 %v1260_v7, %v1261_v11 }
 0x30f   :  { %v1276_v13 = vrot.slane %v1262_v12, %v2200_v36 }
 0x311   :  { %1277 = vrot.lane.b32.xlu0 %v1276_v13, %s1710_s0 }
 0x37f   :  { %v1269_v14 = vpop.permute.xlu1 %1268 }
 0x380   :  { %v1271_v15 = vsel %vm1212_vm0, %v1259_v5, %v1269_v14 }
 0x381   :  { %v1284_v16 = vrot.slane %v1271_v15, %v2200_v36 }
 0x383   :  { %v1278_v17 = vpop.permute.xlu0 %1277  ;;  %v1285_v18 = vmul.f32 %v1284_v16, %v2208_v6  ;;  %v1286_v20 = vmul.f32 %v1284_v16, %v2213_v9  ;;  %v1287_v21 = vmul.f32 %v1284_v16, %v2206_v3  ;;  %v1288_v22 = vmul.f32 %v1284_v16, %v2211_v8 }
 0x384   :  { %v1280_v19 = vsel %vm1212_vm0, %v1262_v12, %v1278_v17 }
 0x385   :  { %v1292_v23 = vrot.slane %v1280_v19, %v2200_v36 }
 0x387   :  { %v1293_v24 = vadd.f32 %v1292_v23, %v1285_v18  ;;  %v1294_v25 = vadd.f32 %v1292_v23, %v1286_v20  ;;  %v1295_v26 = vadd.f32 %v1292_v23, %v1287_v21  ;;  %v1296_v27 = vadd.f32 %v1292_v23, %v1288_v22 }
 0x389   :  { %v1297_v28 = vmax.f32 %v1293_v24, 0.0  ;;  %v1298_v29 = vmax.f32 %v1294_v25, 0.0  ;;  %v1299_v30 = vmax.f32 %v1295_v26, 0.0  ;;  %v1300_v31 = vmax.f32 %v1296_v27, 0.0 }
 0x38b   :  { %v1474_v32 = vpack.c.bf16 %v1298_v29, %v1297_v28  ;;  %v1475_v6 = vpack.c.bf16 %v1300_v31, %v1299_v30 }
 0x38d   :  { %1313 = vst [vmem:[%s2258_s5] sm:$0xff] %v1474_v32  ;;  %1314 = vst [vmem:[%s2258_s5 + $0x8] sm:$0xff] %v1475_v6 }

// kernel: vae_forward.12
= control target key start
LH: loop header
LB: loop body
LE: loop exit
PB: predicated region body
PF: predicated region fallthrough
CT: control target
= control target key end

     0   :  { %vm378_vm0 = vcmask 523264   ;;  %s890_s11 = smov 64   ;;  %vm566_vm1 = vcmask 261120   ;;  %vm569_vm2 = vcmask 785408   ;;  %s1127_s1 = inlined_call_operand.vmem [shape: bf16[576,128], index: 1, kind: input, shape index: {}]   ;;  %s1128_s0 = inlined_call_operand.vmem [shape: bf16[32,576], index: 0, kind: input, shape index: {}]   ;;  %s1129_s2 = inlined_call_operand.vmem [shape: f32[1,128], index: 2, kind: input, shape index: {}]   ;;  %s1130_s3 = inlined_call_operand.vmem [shape: f32[1,32], index: 3, kind: input, shape index: {}]   ;;  %s1131_s4 = inlined_call_operand.vmem [shape: f32[1,32], index: 4, kind: input, shape index: {}]   ;;  %s1132_s5 = inlined_call_operand.vmem [shape: bf16[32,128], index: 5, kind: output, shape index: {}]  }
   0x1   :  { %v836_v0 = vld [vmem:[%s1127_s1 + $0x78] sm:$0xff]   ;;  %v840_v4 = vld [vmem:[%s1127_s1 + $0x70] sm:$0xff]   ;;  %v844_v8 = vld [vmem:[%s1127_s1 + $0x68] sm:$0xff]  }
   0x2   :  { %v837_v1 = vld [vmem:[%s1127_s1 + $0x38] sm:$0xff]   ;;  %759 = vmatprep.subr.bf16.mxu0 %v836_v0  ;;  %v841_v5 = vld [vmem:[%s1127_s1 + $0x30] sm:$0xff]   ;;  %v845_v9 = vld [vmem:[%s1127_s1 + $0x28] sm:$0xff]  }
   0x3   :  { %v838_v2 = vld [vmem:[%s1127_s1 + $0xf8] sm:$0xff]   ;;  %760 = vmatpush3.bf16.msra.mxu0 %v837_v1  ;;  %v842_v6 = vld [vmem:[%s1127_s1 + $0xf0] sm:$0xff]   ;;  %v846_v10 = vld [vmem:[%s1127_s1 + $0xe8] sm:$0xff]  }
   0x4   :  { %v839_v3 = vld [vmem:[%s1127_s1 + $0xb8] sm:$0xff]   ;;  %787 = vmatprep.subr.bf16.mxu1 %v838_v2  ;;  %761 = vmatprep.subr.bf16.mxu0 %v840_v4  ;;  %v843_v7 = vld [vmem:[%s1127_s1 + $0xb0] sm:$0xff]   ;;  %v847_v11 = vld [vmem:[%s1127_s1 + $0xa8] sm:$0xff]  }
   0x5   :  { %788 = vmatpush3.bf16.msra.mxu1 %v839_v3  ;;  %v848_v12 = vld [vmem:[%s1127_s1 + $0x60] sm:$0xff]   ;;  %v852_v16 = vld [vmem:[%s1127_s1 + $0x58] sm:$0xff]   ;;  %v856_v20 = vld [vmem:[%s1127_s1 + $0x50] sm:$0xff]  }
   0x6   :  { %789 = vmatprep.subr.bf16.mxu1 %v842_v6  ;;  %v849_v13 = vld [vmem:[%s1127_s1 + $0x20] sm:$0xff]   ;;  %v853_v17 = vld [vmem:[%s1127_s1 + $0x18] sm:$0xff]   ;;  %v857_v21 = vld [vmem:[%s1127_s1 + $0x10] sm:$0xff]  }
   0x7   :  { %762 = vmatpush3.bf16.msra.mxu0 %v841_v5  ;;  %v850_v14 = vld [vmem:[%s1127_s1 + $0xe0] sm:$0xff]   ;;  %v854_v18 = vld [vmem:[%s1127_s1 + $0xd8] sm:$0xff]   ;;  %v858_v22 = vld [vmem:[%s1127_s1 + $0xd0] sm:$0xff]  }
   0x8   :  { %763 = vmatprep.subr.bf16.mxu0 %v844_v8  ;;  %v851_v15 = vld [vmem:[%s1127_s1 + $0xa0] sm:$0xff]   ;;  %v855_v19 = vld [vmem:[%s1127_s1 + $0x98] sm:$0xff]   ;;  %v859_v23 = vld [vmem:[%s1127_s1 + $0x90] sm:$0xff]  }
   0x9   :  { %790 = vmatpush3.bf16.msra.mxu1 %v843_v7  ;;  %v860_v24 = vld [vmem:[%s1127_s1 + $0x48] sm:$0xff]   ;;  %v864_v28 = vld [vmem:[%s1127_s1 + $0x40] sm:$0xff]   ;;  %v871_v34 = vld [vmem:[%s1127_s1 + $0x118] sm:$0xff]  }
   0xa   :  { %791 = vmatprep.subr.bf16.mxu1 %v846_v10  ;;  %v861_v25 = vld [vmem:[%s1127_s1 + $0x8] sm:$0xff]   ;;  %v865_v29 = vld [vmem:[%s1127_s1] sm:$0xff]   ;;  %v875_v37 = vld [vmem:[%s1127_s1 + $0x110] sm:$0xff]  }
   0xb   :  { %764 = vmatpush3.bf16.msra.mxu0 %v845_v9  ;;  %v862_v26 = vld [vmem:[%s1127_s1 + $0xc8] sm:$0xff]   ;;  %v866_v30 = vld [vmem:[%s1127_s1 + $0xc0] sm:$0xff]  }
   0xc   :  { %765 = vmatprep.subr.bf16.mxu0 %v848_v12  ;;  %v863_v27 = vld [vmem:[%s1127_s1 + $0x88] sm:$0xff]   ;;  %v867_v31 = vld [vmem:[%s1128_s0] ss:$20 sps:$4 sm:$0xff]   ;;  %v869_v32 = vld [vmem:[%s1128_s0 + $0x4] ss:$20 sps:$4 sm:$0xff]  }
   0xd   :  { %792 = vmatpush3.bf16.msra.mxu1 %v847_v11  ;;  %v870_v33 = vld [vmem:[%s1127_s1 + $0x80] sm:$0xff]   ;;  %417 = vmatprep.mubr.bf16.mxu0 %v869_v32  ;;  %v872_v35 = vld [vmem:[%s1128_s0 + $0x8] ss:$20 sps:$4 sm:$0xff]   ;;  %v885_v45 = vld [vmem:[%s1128_s0 + $0x38] ss:$20 sps:$4 sm:$0xff]  }
   0xe   :  { %793 = vmatprep.subr.bf16.mxu1 %v850_v14  ;;  %v874_v36 = vld [vmem:[%s1128_s0 + $0xc] ss:$20 sps:$4 sm:$0xff]   ;;  %v878_v39 = vld [vmem:[%s1128_s0 + $0x28] ss:$20 sps:$4 sm:$0xff]   ;;  %v882_v42 = vld [vmem:[%s1128_s0 + $0x30] ss:$20 sps:$4 sm:$0xff]  }
   0xf   :  { %766 = vmatpush3.bf16.msra.mxu0 %v849_v13  ;;  %466 = vmatprep.mubr.bf16.mxu1 %v874_v36  ;;  %v876_v38 = vld [vmem:[%s1128_s0 + $0x2c] ss:$20 sps:$4 sm:$0xff]   ;;  %v880_v41 = vld [vmem:[%s1128_s0 + $0x34] ss:$20 sps:$4 sm:$0xff]   ;;  %v884_v44 = vld [vmem:[%s1128_s0 + $0x10] ss:$20 sps:$4 sm:$0xff]  }
  0x10   :  { %767 = vmatprep.subr.bf16.mxu0 %v852_v16  ;;  %v879_v40 = vld [vmem:[%s1127_s1 + $0x108] sm:$0xff]   ;;  %v883_v43 = vld [vmem:[%s1127_s1 + $0x100] sm:$0xff]   ;;  %s888_s0 = smov 32  }
  0x11   :  { %794 = vmatpush3.bf16.msra.mxu1 %v851_v15  ;;  %v691_v60 = vld [vmem:[%s1129_s2] ss:$0 sm:$0xff]  ;;  %s889_s2 = smov 96  }
  0x12   :  { %795 = vmatprep.subr.bf16.mxu1 %v854_v18 }
  0x13   :  { %768 = vmatpush3.bf16.msra.mxu0 %v853_v17 }
  0x14   :  { %769 = vmatprep.subr.bf16.mxu0 %v856_v20 }
  0x15   :  { %796 = vmatpush3.bf16.msra.mxu1 %v855_v19 }
  0x16   :  { %797 = vmatprep.subr.bf16.mxu1 %v858_v22 }
  0x17   :  { %770 = vmatpush3.bf16.msra.mxu0 %v857_v21 }
  0x18   :  { %771 = vmatprep.subr.bf16.mxu0 %v860_v24 }
  0x19   :  { %798 = vmatpush3.bf16.msra.mxu1 %v859_v23 }
  0x1a   :  { %799 = vmatprep.subr.bf16.mxu1 %v862_v26 }
  0x1b   :  { %772 = vmatpush3.bf16.msra.mxu0 %v861_v25 }
  0x1c   :  { %773 = vmatprep.subr.bf16.mxu0 %v864_v28 }
  0x1d   :  { %800 = vmatpush3.bf16.msra.mxu1 %v863_v27 }
  0x1e   :  { %801 = vmatprep.subr.bf16.mxu1 %v866_v30 }
  0x1f   :  { %774 = vmatpush3.bf16.msra.mxu0 %v865_v29 }
  0x20   :  { %821 = vmatprep.subr.bf16.mxu0 %v871_v34 }
  0x21   :  { %802 = vmatpush3.bf16.msra.mxu1 %v870_v33 }
  0x22   :  { %418 = vmatmul.mubr.bf16.vlgmr.msra.gmra.mxu0 %v867_v31 }
  0x23   :  { %822 = vmatpush3.bf16.msra.mxu0 %v871_v34  ;;  %425 = vmatprep.mubr.bf16.mxu0 %v876_v38 }
  0x24   :  { %467 = vmatmul.mubr.bf16.vlgmr.msra.gmra.mxu1 %v872_v35  ;;  %823 = vmatprep.subr.bf16.mxu0 %v875_v37 }
  0x25   :  { %474 = vmatprep.mubr.bf16.mxu1 %v880_v41 }
  0x27   :  { %824 = vmatpush3.bf16.msra.mxu0 %v875_v37 }
  0x28   :  { %825 = vmatprep.subr.bf16.mxu0 %v879_v40 }
  0x2a   :  { %426 = vmatmul.mubr.bf16.gmra.mxu0 %v878_v39  ;;  %v571_v39 = vlaneseq }
  0x2b   :  { %829 = vmatprep.mubr.msk.bf16.mxu0 %vm378_vm0, %v884_v44  ;;  %826 = vmatpush3.bf16.msra.mxu0 %v879_v40 }
  0x2c   :  { %475 = vmatmul.mubr.bf16.gmra.mxu1 %v882_v42  ;;  %827 = vmatprep.subr.bf16.mxu0 %v883_v43  ;;  %v572_v40 = vshrl.u32 %v571_v39, 7 }
  0x2e   :  { %v1083_v44 = vsub.s32 0, %v572_v40 }
  0x2f   :  { %828 = vmatpush3.bf16.msra.mxu0 %v883_v43 }
  0x32   :  { %830 = vmatmul.mubr.msk.bf16.vlgmr.msra.gmra.mxu0 %vm378_vm0, %v885_v45 }
  0xe2   :  { %v775_v46 = vpop.f32.mrf.mxu0 }
  0xe4   :  { %v776_v47 = vpop.f32.mrf.mxu0  ;;  %v803_v48 = vpop.f32.mrf.mxu1 }
  0xe5   :  { %v777_v58 = vadd.f32 %v776_v47, %v775_v46 }
  0xe6   :  { %v778_v49 = vpop.f32.mrf.mxu0  ;;  %v804_v50 = vpop.f32.mrf.mxu1 }
  0xe7   :  { %v420_v2 = vadd.f32 %v777_v58, %v691_v60  ;;  %v805_v3 = vadd.f32 %v804_v50, %v803_v48 }
  0xe8   :  { %v779_v51 = vpop.f32.mrf.mxu0  ;;  %v806_v52 = vpop.f32.mrf.mxu1 }
  0xe9   :  { %v780_v61 = vadd.f32 %v779_v51, %v778_v49  ;;  %v469_v15 = vadd.f32 %v805_v3, %v420_v2 }
  0xea   :  { %v781_v53 = vpop.f32.mrf.mxu0  ;;  %v807_v54 = vpop.f32.mrf.mxu1 }
  0xeb   :  { %v423_v6 = vadd.f32 %v780_v61, %v691_v60  ;;  %v808_v7 = vadd.f32 %v807_v54, %v806_v52 }
  0xec   :  { %v782_v55 = vpop.f32.mrf.mxu0  ;;  %v809_v56 = vpop.f32.mrf.mxu1 }
  0xed   :  { %v783_v62 = vadd.f32 %v782_v55, %v781_v53  ;;  %v472_v16 = vadd.f32 %v808_v7, %v423_v6 }
  0xee   :  { %v784_v57 = vpop.f32.mrf.mxu0  ;;  %v810_v59 = vpop.f32.mrf.mxu1 }
  0xef   :  { %v428_v8 = vadd.f32 %v783_v62, %v691_v60  ;;  %v811_v9 = vadd.f32 %v810_v59, %v809_v56 }
  0xf0   :  { %v785_v63 = vpop.f32.mrf.mxu0  ;;  %v812_v0 = vpop.f32.mrf.mxu1 }
  0xf1   :  { %v786_v1 = vadd.f32 %v785_v63, %v784_v57  ;;  %v477_v14 = vadd.f32 %v811_v9, %v428_v8 }
  0xf2   :  { %v813_v4 = vpop.f32.mrf.mxu1  ;;  %v831_v5 = vpop.f32.mrf.mxu0 }
  0xf3   :  { %v431_v11 = vadd.f32 %v786_v1, %v691_v60  ;;  %v814_v12 = vadd.f32 %v813_v4, %v812_v0  ;;  %v1068_v21 = vadd.f32 %v831_v5, %v477_v14 }
  0xf4   :  { %v517_v10 = vpop.f32.mrf.mxu0 }
  0xf5   :  { %v1064_v18 = vadd.f32 %v517_v10, %v469_v15  ;;  %v480_v19 = vadd.f32 %v814_v12, %v431_v11  ;;  %v608_v10 = vld [vmem:[%s1130_s3] sm:$0x1] }
  0xf6   :  { %v832_v13 = vpop.f32.mrf.mxu0 }
  0xf7   :  { %v1072_v23 = vadd.f32 %v832_v13, %v480_v19  ;;  %v610_v13 = vld [vmem:[%s1131_s4] sm:$0x1] }
  0xf8   :  { %v520_v17 = vpop.f32.mrf.mxu0 }
  0xf9   :  { %v1066_v20 = vadd.f32 %v520_v17, %v472_v16 }
  0xfb   :  { %v532_v22 = vadd.f32 %v1066_v20, %v1064_v18 }
  0xfd   :  { %v533_v24 = vadd.f32 %v532_v22, %v1068_v21 }
  0xff   :  { %v534_v25 = vadd.f32 %v533_v24, %v1072_v23 }
 0x101   :  { %v535_v26 = vrot.slane %v534_v25, 4 }
 0x103   :  { %v536_v27 = vadd.f32 %v535_v26, %v534_v25 }
 0x105   :  { %v537_v28 = vrot.slane %v536_v27, 2 }
 0x107   :  { %v538_v29 = vadd.f32 %v537_v28, %v536_v27 }
 0x109   :  { %v539_v30 = vrot.slane %v538_v29, 1 }
 0x10b   :  { %v540_v31 = vadd.f32 %v539_v30, %v538_v29 }
 0x10d   :  { %550 = vrot.lane.b32.xlu1 %v540_v31, %s888_s0  ;;  %542 = vrot.lane.b32.xlu0 %v540_v31, %s889_s2 }
 0x111   :  { %546 = vrot.lane.b32.xlu0 %v540_v31, %s890_s11 }
 0x17f   :  { %v543_v32 = vpop.permute.xlu0 %542  ;;  %v551_v36 = vpop.permute.xlu1 %550 }
 0x180   :  { %v545_v33 = vadd.f32 %v543_v32, %v540_v31 }
 0x183   :  { %v547_v34 = vpop.permute.xlu0 %546 }
 0x184   :  { %v549_v35 = vadd.f32 %v547_v34, %v545_v33 }
 0x186   :  { %v553_v37 = vadd.f32 %v551_v36, %v549_v35 }
 0x188   :  { %v555_v38 = vmul.f32 0.0078125, %v553_v37 }
 0x18a   :  { %560 = vrot.lane.b32.xlu0 %v555_v38, %s890_s11  ;;  %557 = vrot.lane.b32.xlu1 %v555_v38, %s888_s0 }
 0x18e   :  { %563 = vrot.lane.b32.xlu1 %v555_v38, %s889_s2 }
 0x1fc   :  { %v558_v41 = vpop.permute.xlu1 %557  ;;  %v561_v42 = vpop.permute.xlu0 %560 }
 0x1fd   :  { %v567_v43 = vsel %vm566_vm1, %v555_v38, %v558_v41 }
 0x1fe   :  { %v568_v45 = vsel %vm378_vm0, %v567_v43, %v561_v42 }
 0x200   :  { %v564_v46 = vpop.permute.xlu1 %563 }
 0x201   :  { %v570_v47 = vsel %vm569_vm2, %v568_v45, %v564_v46 }
 0x202   :  { %v574_v48 = vrot.slane %v570_v47, %v1083_v44 }
 0x204   :  { %v575_v49 = vsub.f32 %v1064_v18, %v574_v48  ;;  %v576_v50 = vsub.f32 %v1066_v20, %v574_v48  ;;  %v577_v51 = vsub.f32 %v1068_v21, %v574_v48  ;;  %v578_v52 = vsub.f32 %v1072_v23, %v574_v48 }
 0x206   :  { %v579_v53 = vmul.f32 %v575_v49, %v575_v49  ;;  %v580_v54 = vmul.f32 %v576_v50, %v576_v50  ;;  %v581_v55 = vmul.f32 %v577_v51, %v577_v51  ;;  %v582_v57 = vmul.f32 %v578_v52, %v578_v52 }
 0x208   :  { %v583_v56 = vadd.f32 %v580_v54, %v579_v53 }
 0x20a   :  { %v584_v58 = vadd.f32 %v583_v56, %v581_v55 }
 0x20c   :  { %v585_v59 = vadd.f32 %v584_v58, %v582_v57 }
 0x20e   :  { %v586_v60 = vrot.slane %v585_v59, 4 }
 0x210   :  { %v587_v61 = vadd.f32 %v586_v60, %v585_v59 }
 0x212   :  { %v588_v62 = vrot.slane %v587_v61, 2 }
 0x214   :  { %v589_v63 = vadd.f32 %v588_v62, %v587_v61 }
 0x216   :  { %v590_v0 = vrot.slane %v589_v63, 1 }
 0x218   :  { %v591_v1 = vadd.f32 %v590_v0, %v589_v63 }
 0x21a   :  { %597 = vrot.lane.b32.xlu1 %v591_v1, %s890_s11  ;;  %593 = vrot.lane.b32.xlu0 %v591_v1, %s889_s2 }
 0x21e   :  { %601 = vrot.lane.b32.xlu0 %v591_v1, %s888_s0 }
 0x28c   :  { %v594_v2 = vpop.permute.xlu0 %593  ;;  %v598_v4 = vpop.permute.xlu1 %597 }
 0x28d   :  { %v596_v3 = vadd.f32 %v594_v2, %v591_v1 }
 0x28f   :  { %v600_v5 = vadd.f32 %v598_v4, %v596_v3 }
 0x290   :  { %v602_v6 = vpop.permute.xlu0 %601 }
 0x291   :  { %v604_v7 = vadd.f32 %v602_v6, %v600_v5 }
 0x293   :  { %v605_v8 = vmul.f32 0.0078125, %v604_v7 }
 0x295   :  { %v606_v9 = vadd.f32 1e-05, %v605_v8 }
 0x297   :  { %886 = vrsqrt.f32 %v606_v9 }
 0x2a4   :  { %v887_v11 = vpop.eup %886 }
 0x2a5   :  { %v609_v12 = vmul.f32 %v887_v11, %v608_v10 }
 0x2a7   :  { %v617_v14 = vrot.slane %v609_v12, %v1083_v44  ;;  %v611_v15 = vmul.f32 %v609_v12, %v555_v38 }
 0x2a9   :  { %621 = vrot.lane.b32.xlu0 %v617_v14, %s890_s11  ;;  %618 = vrot.lane.b32.xlu1 %v617_v14, %s888_s0  ;;  %v612_v16 = vsub.f32 %v610_v13, %v611_v15 }
 0x2ab   :  { %v634_v17 = vrot.slane %v612_v16, %v1083_v44 }
 0x2ad   :  { %624 = vrot.lane.b32.xlu1 %v617_v14, %s889_s2  ;;  %635 = vrot.lane.b32.xlu0 %v634_v17, %s888_s0 }
 0x2b1   :  { %638 = vrot.lane.b32.xlu1 %v634_v17, %s890_s11  ;;  %641 = vrot.lane.b32.xlu0 %v634_v17, %s889_s2 }
 0x31b   :  { %v622_v19 = vpop.permute.xlu0 %621  ;;  %v619_v22 = vpop.permute.xlu1 %618 }
 0x31c   :  { %v627_v24 = vsel %vm566_vm1, %v609_v12, %v619_v22 }
 0x31d   :  { %v628_v25 = vsel %vm378_vm0, %v627_v24, %v622_v19 }
 0x31f   :  { %v625_v26 = vpop.permute.xlu1 %624  ;;  %v636_v27 = vpop.permute.xlu0 %635 }
 0x320   :  { %v629_v28 = vsel %vm569_vm2, %v628_v25, %v625_v26  ;;  %v644_v30 = vsel %vm566_vm1, %v612_v16, %v636_v27 }
 0x321   :  { %v650_v29 = vrot.slane %v629_v28, %v1083_v44 }
 0x323   :  { %v639_v31 = vpop.permute.xlu1 %638  ;;  %v642_v32 = vpop.permute.xlu0 %641  ;;  %v651_v34 = vmul.f32 %v650_v29, %v1064_v18  ;;  %v652_v36 = vmul.f32 %v650_v29, %v1066_v20  ;;  %v653_v37 = vmul.f32 %v650_v29, %v1068_v21  ;;  %v654_v38 = vmul.f32 %v650_v29, %v1072_v23 }
 0x324   :  { %v645_v33 = vsel %vm378_vm0, %v644_v30, %v639_v31 }
 0x325   :  { %v646_v35 = vsel %vm569_vm2, %v645_v33, %v642_v32 }
 0x326   :  { %v658_v39 = vrot.slane %v646_v35, %v1083_v44 }
 0x328   :  { %v659_v40 = vadd.f32 %v658_v39, %v651_v34  ;;  %v660_v41 = vadd.f32 %v658_v39, %v652_v36  ;;  %v661_v42 = vadd.f32 %v658_v39, %v653_v37  ;;  %v662_v43 = vadd.f32 %v658_v39, %v654_v38 }
 0x32a   :  { %v663_v45 = vmax.f32 %v659_v40, 0.0  ;;  %v664_v46 = vmax.f32 %v660_v41, 0.0  ;;  %v665_v47 = vmax.f32 %v661_v42, 0.0  ;;  %v666_v48 = vmax.f32 %v662_v43, 0.0 }
 0x32c   :  { %v751_v49 = vpack.c.bf16 %v664_v46, %v663_v45  ;;  %v756_v18 = vpack.c.bf16 %v666_v48, %v665_v47 }
 0x32e   :  { %752 = vst [vmem:[%s1132_s5] sm:$0xff] %v751_v49   ;;  %758 = vst [vmem:[%s1132_s5 + $0x8] sm:$0xff] %v756_v18  }

// kernel: vae_forward.13
= control target key start
LH: loop header
LB: loop body
LE: loop exit
PB: predicated region body
PF: predicated region fallthrough
CT: control target
= control target key end

     0   :  { %vm318_vm0 = vcmask 261120   ;;  %vm633_vm1 = vcmask 97280   ;;  %s1214_s1 = inlined_call_operand.vmem [shape: bf16[288,12], index: 1, kind: input, shape index: {}]   ;;  %s1215_s0 = inlined_call_operand.vmem [shape: bf16[128,288], index: 0, kind: input, shape index: {}]   ;;  %s1216_s2 = inlined_call_operand.vmem [shape: f32[1,12], index: 2, kind: input, shape index: {}]   ;;  %s1217_s3 = inlined_call_operand.vmem [shape: f32[128,12], index: 3, kind: output, shape index: {}]  }
   0x1   :  { %v831_v0 = vld [vmem:[%s1214_s1 + $0x78] sm:$0xff]   ;;  %v833_v2 = vld [vmem:[%s1214_s1 + $0x70] sm:$0xff]   ;;  %v835_v4 = vld [vmem:[%s1214_s1 + $0x68] sm:$0xff]  }
   0x2   :  { %v832_v1 = vld [vmem:[%s1214_s1 + $0x38] sm:$0xff]   ;;  %721 = vmatprep.subr.bf16.mxu0 %v831_v0  ;;  %815 = vmatprep.subr.bf16.mxu1 %v831_v0  ;;  %v834_v3 = vld [vmem:[%s1214_s1 + $0x30] sm:$0xff]   ;;  %v836_v5 = vld [vmem:[%s1214_s1 + $0x28] sm:$0xff]  }
   0x3   :  { %722 = vmatpush3.bf16.msra.mxu0 %v832_v1  ;;  %823 = vmatpush3.bf16.msra.mxu1 %v832_v1  ;;  %v837_v6 = vld [vmem:[%s1214_s1 + $0x60] sm:$0xff]   ;;  %v839_v8 = vld [vmem:[%s1214_s1 + $0x58] sm:$0xff]   ;;  %v841_v10 = vld [vmem:[%s1214_s1 + $0x50] sm:$0xff]  }
   0x4   :  { %723 = vmatprep.subr.bf16.mxu0 %v833_v2  ;;  %816 = vmatprep.subr.bf16.mxu1 %v833_v2  ;;  %v838_v7 = vld [vmem:[%s1214_s1 + $0x20] sm:$0xff]   ;;  %v840_v9 = vld [vmem:[%s1214_s1 + $0x18] sm:$0xff]   ;;  %v842_v13 = vld [vmem:[%s1214_s1 + $0x10] sm:$0xff]  }
   0x5   :  { %v849_v11 = vld [vmem:[%s1215_s0 + $0x4] ss:$12 sps:$4 sm:$0xff]   ;;  %v852_v12 = vld [vmem:[%s1215_s0 + $0x94] ss:$12 sps:$4 sm:$0xff]   ;;  %v843_v14 = vld [vmem:[%s1214_s1 + $0x48] sm:$0xff]  }
   0x6   :  { %375 = vmatprep.mubr.bf16.mxu0 %v849_v11  ;;  %423 = vmatprep.mubr.bf16.mxu1 %v852_v12  ;;  %v844_v15 = vld [vmem:[%s1214_s1 + $0x8] sm:$0xff]   ;;  %v845_v16 = vld [vmem:[%s1214_s1 + $0x40] sm:$0xff]   ;;  %v850_v20 = vld [vmem:[%s1215_s0 + $0x90] ss:$12 sps:$4 sm:$0xff]  }
   0x7   :  { %724 = vmatpush3.bf16.msra.mxu0 %v834_v3  ;;  %824 = vmatpush3.bf16.msra.mxu1 %v834_v3  ;;  %v846_v17 = vld [vmem:[%s1214_s1] sm:$0xff]   ;;  %v853_v19 = vld [vmem:[%s1214_s1 + $0x88] sm:$0xff]   ;;  %v864_v28 = vld [vmem:[%s1215_s0 + $0x30] ss:$12 sps:$4 sm:$0xff]  }
   0x8   :  { %725 = vmatprep.subr.bf16.mxu0 %v835_v4  ;;  %817 = vmatprep.subr.bf16.mxu1 %v835_v4  ;;  %v847_v18 = vld [vmem:[%s1215_s0] ss:$12 sps:$4 sm:$0xff]   ;;  %v854_v21 = vld [vmem:[%s1215_s0 + $0x1c] ss:$12 sps:$4 sm:$0xff]   ;;  %v858_v24 = vld [vmem:[%s1215_s0 + $0x18] ss:$12 sps:$4 sm:$0xff]  }
   0x9   :  { %v856_v22 = vld [vmem:[%s1215_s0 + $0xac] ss:$12 sps:$4 sm:$0xff]   ;;  %v860_v23 = vld [vmem:[%s1214_s1 + $0x80] sm:$0xff]   ;;  %v859_v25 = vld [vmem:[%s1215_s0 + $0xa8] ss:$12 sps:$4 sm:$0xff]  }
   0xa   :  { %v861_v26 = vld [vmem:[%s1215_s0 + $0x34] ss:$12 sps:$4 sm:$0xff]   ;;  %v866_v30 = vld [vmem:[%s1215_s0 + $0x4c] ss:$12 sps:$4 sm:$0xff]   ;;  %v870_v33 = vld [vmem:[%s1215_s0 + $0x50] ss:$12 sps:$4 sm:$0xff]  }
   0xb   :  { %726 = vmatpush3.bf16.msra.mxu0 %v836_v5  ;;  %825 = vmatpush3.bf16.msra.mxu1 %v836_v5  ;;  %v863_v27 = vld [vmem:[%s1215_s0 + $0x8] ss:$12 sps:$4 sm:$0xff]   ;;  %v865_v29 = vld [vmem:[%s1215_s0 + $0x20] ss:$12 sps:$4 sm:$0xff]   ;;  %v868_v31 = vld [vmem:[%s1215_s0 + $0x38] ss:$12 sps:$4 sm:$0xff]  }
   0xc   :  { %727 = vmatprep.subr.bf16.mxu0 %v837_v6  ;;  %818 = vmatprep.subr.bf16.mxu1 %v837_v6  ;;  %v869_v32 = vld [vmem:[%s1215_s0 + $0x48] ss:$12 sps:$4 sm:$0xff]   ;;  %v871_v34 = vld [vmem:[%s1215_s0 + $0x64] ss:$12 sps:$4 sm:$0xff]   ;;  %v874_v36 = vld [vmem:[%s1215_s0 + $0x60] ss:$12 sps:$4 sm:$0xff]  }
   0xd   :  { %v873_v35 = vld [vmem:[%s1215_s0 + $0x68] ss:$12 sps:$4 sm:$0xff]   ;;  %v875_v37 = vld [vmem:[%s1215_s0 + $0x80] ss:$12 sps:$4 sm:$0xff]   ;;  %v878_v39 = vld [vmem:[%s1215_s0 + $0x98] ss:$12 sps:$4 sm:$0xff]  }
   0xe   :  { %v876_v38 = vld [vmem:[%s1215_s0 + $0x7c] ss:$12 sps:$4 sm:$0xff]   ;;  %v879_v40 = vld [vmem:[%s1215_s0 + $0x78] ss:$12 sps:$4 sm:$0xff]   ;;  %v1118_v60 = vld [vmem:[%s1216_s2] ss:$0 sm:$0xff] }
   0xf   :  { %728 = vmatpush3.bf16.msra.mxu0 %v838_v7  ;;  %826 = vmatpush3.bf16.msra.mxu1 %v838_v7  ;;  %v880_v41 = vld [vmem:[%s1215_s0 + $0xb0] ss:$12 sps:$4 sm:$0xff]  }
  0x10   :  { %729 = vmatprep.subr.bf16.mxu0 %v839_v8  ;;  %819 = vmatprep.subr.bf16.mxu1 %v839_v8 }
  0x13   :  { %730 = vmatpush3.bf16.msra.mxu0 %v840_v9  ;;  %827 = vmatpush3.bf16.msra.mxu1 %v840_v9 }
  0x14   :  { %731 = vmatprep.subr.bf16.mxu0 %v841_v10  ;;  %820 = vmatprep.subr.bf16.mxu1 %v841_v10 }
  0x17   :  { %732 = vmatpush3.bf16.msra.mxu0 %v842_v13  ;;  %828 = vmatpush3.bf16.msra.mxu1 %v842_v13 }
  0x18   :  { %733 = vmatprep.subr.bf16.mxu0 %v843_v14  ;;  %821 = vmatprep.subr.bf16.mxu1 %v843_v14 }
  0x1b   :  { %734 = vmatpush3.bf16.msra.mxu0 %v844_v15  ;;  %829 = vmatpush3.bf16.msra.mxu1 %v844_v15 }
  0x1c   :  { %735 = vmatprep.subr.bf16.mxu0 %v845_v16  ;;  %822 = vmatprep.subr.bf16.mxu1 %v845_v16 }
  0x1f   :  { %736 = vmatpush3.bf16.msra.mxu0 %v846_v17  ;;  %830 = vmatpush3.bf16.msra.mxu1 %v846_v17 }
  0x20   :  { %795 = vmatprep.subr.bf16.mxu1 %v853_v19 }
  0x22   :  { %376 = vmatmul.mubr.bf16.vlgmr.msra.gmra.mxu0 %v847_v18  ;;  %424 = vmatmul.mubr.bf16.vlgmr.msra.gmra.mxu1 %v850_v20 }
  0x23   :  { %796 = vmatpush3.bf16.msra.mxu1 %v853_v19  ;;  %383 = vmatprep.mubr.bf16.mxu0 %v854_v21 }
  0x24   :  { %431 = vmatprep.mubr.bf16.mxu1 %v856_v22  ;;  %797 = vmatprep.subr.bf16.mxu1 %v860_v23 }
  0x27   :  { %798 = vmatpush3.bf16.msra.mxu1 %v860_v23 }
  0x2a   :  { %384 = vmatmul.mubr.bf16.gmra.mxu0 %v858_v24  ;;  %432 = vmatmul.mubr.bf16.gmra.mxu1 %v859_v25 }
  0x2b   :  { %391 = vmatprep.mubr.bf16.mxu0 %v861_v26  ;;  %799 = vmatprep.mubr.msk.bf16.mxu1 %vm318_vm0, %v863_v27 }
  0x32   :  { %392 = vmatmul.mubr.bf16.gmra.mxu0 %v864_v28  ;;  %800 = vmatmul.mubr.msk.bf16.vlgmr.msra.gmra.mxu1 %vm318_vm0, %v865_v29 }
  0x33   :  { %399 = vmatprep.mubr.bf16.mxu0 %v866_v30  ;;  %803 = vmatprep.mubr.msk.bf16.mxu1 %vm318_vm0, %v868_v31 }
  0x3a   :  { %400 = vmatmul.mubr.bf16.gmra.mxu0 %v869_v32  ;;  %804 = vmatmul.mubr.msk.bf16.gmra.mxu1 %vm318_vm0, %v870_v33 }
  0x3b   :  { %407 = vmatprep.mubr.bf16.mxu0 %v871_v34  ;;  %807 = vmatprep.mubr.msk.bf16.mxu1 %vm318_vm0, %v873_v35 }
  0x42   :  { %408 = vmatmul.mubr.bf16.gmra.mxu0 %v874_v36  ;;  %808 = vmatmul.mubr.msk.bf16.gmra.mxu1 %vm318_vm0, %v875_v37 }
  0x43   :  { %415 = vmatprep.mubr.bf16.mxu0 %v876_v38  ;;  %811 = vmatprep.mubr.msk.bf16.mxu1 %vm318_vm0, %v878_v39 }
  0x4a   :  { %416 = vmatmul.mubr.bf16.gmra.mxu0 %v879_v40  ;;  %812 = vmatmul.mubr.msk.bf16.gmra.mxu1 %vm318_vm0, %v880_v41 }
  0xe2   :  { %v737_v42 = vpop.f32.mrf.mxu0  ;;  %v1099_v43 = vpop.f32.mrf.mxu1 }
  0xe4   :  { %v738_v44 = vpop.f32.mrf.mxu0  ;;  %v1101_v45 = vpop.f32.mrf.mxu1 }
  0xe5   :  { %v739_v57 = vadd.f32 %v738_v44, %v737_v42 }
  0xe6   :  { %v740_v46 = vpop.f32.mrf.mxu0  ;;  %v1103_v47 = vpop.f32.mrf.mxu1 }
  0xe7   :  { %v378_v3 = vadd.f32 %v739_v57, %v1118_v60 }
  0xe8   :  { %v741_v48 = vpop.f32.mrf.mxu0  ;;  %v1105_v49 = vpop.f32.mrf.mxu1 }
  0xe9   :  { %v742_v63 = vadd.f32 %v741_v48, %v740_v46  ;;  %v775_v46 = vadd.f32 %v1101_v45, %v1099_v43 }
  0xea   :  { %v743_v50 = vpop.f32.mrf.mxu0  ;;  %v1107_v51 = vpop.f32.mrf.mxu1 }
  0xeb   :  { %v381_v11 = vadd.f32 %v742_v63, %v1118_v60 }
  0xec   :  { %v744_v52 = vpop.f32.mrf.mxu0  ;;  %v1109_v53 = vpop.f32.mrf.mxu1 }
  0xed   :  { %v745_v54 = vadd.f32 %v744_v52, %v743_v50 }
  0xee   :  { %v746_v55 = vpop.f32.mrf.mxu0  ;;  %v1111_v56 = vpop.f32.mrf.mxu1 }
  0xef   :  { %v386_v62 = vadd.f32 %v745_v54, %v1118_v60 }
  0xf0   :  { %v747_v58 = vpop.f32.mrf.mxu0  ;;  %v1113_v59 = vpop.f32.mrf.mxu1 }
  0xf1   :  { %v748_v61 = vadd.f32 %v747_v58, %v746_v55  ;;  %v781_v58 = vadd.f32 %v1109_v53, %v1107_v51  ;;  %v778_v51 = vadd.f32 %v1105_v49, %v1103_v47  ;;  %v784_v53 = vadd.f32 %v1113_v59, %v1111_v56 }
  0xf2   :  { %v749_v0 = vpop.f32.mrf.mxu0  ;;  %v801_v1 = vpop.f32.mrf.mxu1 }
  0xf3   :  { %v483_v2 = vadd.f32 %v801_v1, %v386_v62  ;;  %v389_v8 = vadd.f32 %v748_v61, %v1118_v60 }
  0xf4   :  { %v750_v4 = vpop.f32.mrf.mxu0  ;;  %v474_v5 = vpop.f32.mrf.mxu1 }
  0xf5   :  { %v707_v6 = vmul.f32 -1.442695, %v483_v2  ;;  %v475_v7 = vadd.f32 %v474_v5, %v378_v3  ;;  %v751_v12 = vadd.f32 %v750_v4, %v749_v0  ;;  %v426_v3 = vadd.f32 %v775_v46, %v1118_v60 }
  0xf6   :  { %v752_v9 = vpop.f32.mrf.mxu0  ;;  %v802_v10 = vpop.f32.mrf.mxu1 }
  0xf7   :  { %881 = vpow2.f32 %v707_v6  ;;  %v705_v13 = vmul.f32 -1.442695, %v475_v7  ;;  %v486_v14 = vadd.f32 %v802_v10, %v389_v8  ;;  %v394_v23 = vadd.f32 %v751_v12, %v1118_v60 }
  0xf8   :  { %v753_v15 = vpop.f32.mrf.mxu0  ;;  %v477_v16 = vpop.f32.mrf.mxu1 }
  0xf9   :  { %883 = vpow2.f32 %v705_v13  ;;  %v708_v17 = vmul.f32 -1.442695, %v486_v14  ;;  %v478_v18 = vadd.f32 %v477_v16, %v381_v11  ;;  %v754_v21 = vadd.f32 %v753_v15, %v752_v9 }
  0xfa   :  { %v755_v19 = vpop.f32.mrf.mxu0  ;;  %v805_v20 = vpop.f32.mrf.mxu1  ;;  %v434_v9 = vadd.f32 %v781_v58, %v1118_v60 }
  0xfb   :  { %885 = vpow2.f32 %v708_v17  ;;  %v706_v22 = vmul.f32 -1.442695, %v478_v18  ;;  %v397_v32 = vadd.f32 %v754_v21, %v1118_v60  ;;  %v429_v21 = vadd.f32 %v778_v51, %v1118_v60 }
  0xfc   :  { %v756_v24 = vpop.f32.mrf.mxu0  ;;  %v490_v25 = vpop.f32.mrf.mxu1 }
  0xfd   :  { %887 = vpow2.f32 %v706_v22  ;;  %v757_v26 = vadd.f32 %v756_v24, %v755_v19  ;;  %v491_v27 = vadd.f32 %v490_v25, %v394_v23  ;;  %v437_v19 = vadd.f32 %v784_v53, %v1118_v60 }
  0xfe   :  { %v758_v28 = vpop.f32.mrf.mxu0  ;;  %v806_v29 = vpop.f32.mrf.mxu1 }
  0xff   :  { %v402_v30 = vadd.f32 %v757_v26, %v1118_v60  ;;  %v709_v31 = vmul.f32 -1.442695, %v491_v27 }
 0x100   :  { %v759_v33 = vpop.f32.mrf.mxu0  ;;  %v493_v34 = vpop.f32.mrf.mxu1 }
 0x101   :  { %v499_v35 = vadd.f32 %v805_v20, %v402_v30  ;;  %889 = vpow2.f32 %v709_v31  ;;  %v760_v36 = vadd.f32 %v759_v33, %v758_v28  ;;  %v494_v37 = vadd.f32 %v493_v34, %v397_v32 }
 0x102   :  { %v761_v38 = vpop.f32.mrf.mxu0  ;;  %v1127_v39 = vpop.f32.mrf.mxu1 }
 0x103   :  { %v711_v40 = vmul.f32 -1.442695, %v499_v35  ;;  %v405_v41 = vadd.f32 %v760_v36, %v1118_v60  ;;  %v710_v42 = vmul.f32 -1.442695, %v494_v37 }
 0x104   :  { %v882_v44 = vpop.eup %881  ;;  %v762_v48 = vpop.f32.mrf.mxu0 }
 0x105   :  { %v506_v50 = vpop.f32.mrf.mxu1  ;;  %v587_v52 = vadd.f32 1.0, %v882_v44  ;;  %891 = vpow2.f32 %v711_v40  ;;  %v502_v54 = vadd.f32 %v806_v29, %v405_v41  ;;  %v763_v55 = vadd.f32 %v762_v48, %v761_v38 }
 0x106   :  { %v884_v57 = vpop.eup %883  ;;  %893 = vpow2.f32 %v710_v42  ;;  %v764_v61 = vpop.f32.mrf.mxu0 }
 0x107   :  { %v1134_v62 = vpop.f32.mrf.mxu1  ;;  %895 = vrcp.f32 %v587_v52  ;;  %v585_v63 = vadd.f32 1.0, %v884_v57  ;;  %v712_v0 = vmul.f32 -1.442695, %v502_v54  ;;  %v410_v1 = vadd.f32 %v763_v55, %v1118_v60 }
 0x108   :  { %v886_v43 = vpop.eup %885  ;;  %v765_v45 = vpop.f32.mrf.mxu0 }
 0x109   :  { %v509_v2 = vpop.f32.mrf.mxu1  ;;  %897 = vrcp.f32 %v585_v63  ;;  %v588_v4 = vadd.f32 1.0, %v886_v43  ;;  %v507_v5 = vadd.f32 %v506_v50, %v410_v1  ;;  %v766_v6 = vadd.f32 %v765_v45, %v764_v61 }
 0x10a   :  { %v888_v7 = vpop.eup %887  ;;  %899 = vpow2.f32 %v712_v0  ;;  %v767_v8 = vpop.f32.mrf.mxu0 }
 0x10b   :  { %v813_v10 = vpop.f32.mrf.mxu1  ;;  %901 = vrcp.f32 %v588_v4  ;;  %v586_v11 = vadd.f32 1.0, %v888_v7  ;;  %v713_v12 = vmul.f32 -1.442695, %v507_v5  ;;  %v413_v13 = vadd.f32 %v766_v6, %v1118_v60 }
 0x10c   :  { %v531_v14 = vadd.f32 %v813_v10, %v434_v9  ;;  %v768_v15 = vpop.f32.mrf.mxu0 }
 0x10d   :  { %v522_v16 = vpop.f32.mrf.mxu1  ;;  %903 = vrcp.f32 %v586_v11  ;;  %v510_v17 = vadd.f32 %v509_v2, %v413_v13  ;;  %v769_v18 = vadd.f32 %v768_v15, %v767_v8 }
 0x10e   :  { %v523_v47 = vadd.f32 %v522_v16, %v426_v3  ;;  %v890_v49 = vpop.eup %889  ;;  %905 = vpow2.f32 %v713_v12  ;;  %v719_v56 = vmul.f32 -1.442695, %v531_v14  ;;  %v770_v59 = vpop.f32.mrf.mxu0 }
 0x10f   :  { %v814_v20 = vpop.f32.mrf.mxu1  ;;  %v589_v22 = vadd.f32 1.0, %v890_v49  ;;  %v714_v23 = vmul.f32 -1.442695, %v510_v17  ;;  %v418_v24 = vadd.f32 %v769_v18, %v1118_v60 }
 0x110   :  { %v717_v25 = vmul.f32 -1.442695, %v523_v47  ;;  %907 = vpow2.f32 %v719_v56  ;;  %v534_v26 = vadd.f32 %v814_v20, %v437_v19  ;;  %v771_v27 = vpop.f32.mrf.mxu0 }
 0x111   :  { %v525_v28 = vpop.f32.mrf.mxu1  ;;  %909 = vrcp.f32 %v589_v22  ;;  %v515_v29 = vadd.f32 %v1127_v39, %v418_v24  ;;  %v772_v30 = vadd.f32 %v771_v27, %v770_v59 }
 0x112   :  { %v526_v31 = vadd.f32 %v525_v28, %v429_v21  ;;  %v892_v32 = vpop.eup %891  ;;  %911 = vpow2.f32 %v714_v23  ;;  %v720_v33 = vmul.f32 -1.442695, %v534_v26 }
 0x113   :  { %v894_v34 = vpop.eup %893  ;;  %v591_v35 = vadd.f32 1.0, %v892_v32  ;;  %v715_v36 = vmul.f32 -1.442695, %v515_v29  ;;  %913 = vpow2.f32 %v717_v25  ;;  %v421_v37 = vadd.f32 %v772_v30, %v1118_v60 }
 0x114   :  { %v896_v38 = vpop.eup %895  ;;  %v590_v40 = vadd.f32 1.0, %v894_v34  ;;  %915 = vpow2.f32 %v720_v33  ;;  %v718_v41 = vmul.f32 -1.442695, %v526_v31 }
 0x115   :  { %636 = vst.msk [vmem:[%s1217_s3 + $0x10] sm:$0xff] %vm633_vm1, %v896_v38  ;;  %917 = vrcp.f32 %v591_v35  ;;  %v518_v39 = vadd.f32 %v1134_v62, %v421_v37 }
 0x116   :  { %v898_v42 = vpop.eup %897  ;;  %919 = vrcp.f32 %v590_v40 }
 0x117   :  { %v900_v44 = vpop.eup %899  ;;  %634 = vst.msk [vmem:[%s1217_s3] sm:$0xff] %vm633_vm1, %v898_v42  ;;  %921 = vpow2.f32 %v715_v36  ;;  %v716_v60 = vmul.f32 -1.442695, %v518_v39 }
 0x118   :  { %v902_v46 = vpop.eup %901  ;;  %v592_v48 = vadd.f32 1.0, %v900_v44  ;;  %923 = vpow2.f32 %v718_v41 }
 0x119   :  { %637 = vst.msk [vmem:[%s1217_s3 + $0x18] sm:$0xff] %vm633_vm1, %v902_v46  ;;  %925 = vpow2.f32 %v716_v60 }
 0x11a   :  { %v904_v50 = vpop.eup %903  ;;  %927 = vrcp.f32 %v592_v48 }
 0x11b   :  { %v906_v52 = vpop.eup %905  ;;  %635 = vst.msk [vmem:[%s1217_s3 + $0x8] sm:$0xff] %vm633_vm1, %v904_v50 }
 0x11c   :  { %v593_v54 = vadd.f32 1.0, %v906_v52 }
 0x11d   :  { %v908_v55 = vpop.eup %907 }
 0x11e   :  { %v910_v57 = vpop.eup %909  ;;  %929 = vrcp.f32 %v593_v54  ;;  %v599_v58 = vadd.f32 1.0, %v908_v55 }
 0x11f   :  { %v912_v61 = vpop.eup %911  ;;  %638 = vst.msk [vmem:[%s1217_s3 + $0x20] sm:$0xff] %vm633_vm1, %v910_v57 }
 0x120   :  { %v914_v62 = vpop.eup %913  ;;  %v594_v63 = vadd.f32 1.0, %v912_v61  ;;  %931 = vrcp.f32 %v599_v58 }
 0x121   :  { %v916_v0 = vpop.eup %915  ;;  %v597_v1 = vadd.f32 1.0, %v914_v62 }
 0x122   :  { %v918_v43 = vpop.eup %917  ;;  %933 = vrcp.f32 %v594_v63  ;;  %v600_v45 = vadd.f32 1.0, %v916_v0 }
 0x123   :  { %v920_v2 = vpop.eup %919  ;;  %640 = vst.msk [vmem:[%s1217_s3 + $0x30] sm:$0xff] %vm633_vm1, %v918_v43  ;;  %935 = vrcp.f32 %v597_v1 }
 0x124   :  { %v922_v3 = vpop.eup %921  ;;  %639 = vst.msk [vmem:[%s1217_s3 + $0x28] sm:$0xff] %vm633_vm1, %v920_v2  ;;  %937 = vrcp.f32 %v600_v45 }
 0x125   :  { %v924_v4 = vpop.eup %923  ;;  %v595_v5 = vadd.f32 1.0, %v922_v3 }
 0x126   :  { %v926_v6 = vpop.eup %925  ;;  %v598_v7 = vadd.f32 1.0, %v924_v4 }
 0x127   :  { %v928_v51 = vpop.eup %927  ;;  %939 = vrcp.f32 %v595_v5  ;;  %v596_v53 = vadd.f32 1.0, %v926_v6 }
 0x128   :  { %641 = vst.msk [vmem:[%s1217_s3 + $0x38] sm:$0xff] %vm633_vm1, %v928_v51  ;;  %941 = vrcp.f32 %v598_v7 }
 0x129   :  { %943 = vrcp.f32 %v596_v53 }
 0x12b   :  { %v930_v8 = vpop.eup %929 }
 0x12c   :  { %642 = vst.msk [vmem:[%s1217_s3 + $0x40] sm:$0xff] %vm633_vm1, %v930_v8 }
 0x12d   :  { %v932_v9 = vpop.eup %931 }
 0x12e   :  { %648 = vst.msk [vmem:[%s1217_s3 + $0x70] sm:$0xff] %vm633_vm1, %v932_v9 }
 0x12f   :  { %v934_v10 = vpop.eup %933 }
 0x130   :  { %v936_v11 = vpop.eup %935  ;;  %643 = vst.msk [vmem:[%s1217_s3 + $0x48] sm:$0xff] %vm633_vm1, %v934_v10 }
 0x131   :  { %v938_v12 = vpop.eup %937  ;;  %646 = vst.msk [vmem:[%s1217_s3 + $0x60] sm:$0xff] %vm633_vm1, %v936_v11 }
 0x132   :  { %649 = vst.msk [vmem:[%s1217_s3 + $0x78] sm:$0xff] %vm633_vm1, %v938_v12 }
 0x134   :  { %v940_v13 = vpop.eup %939 }
 0x135   :  { %v942_v14 = vpop.eup %941  ;;  %644 = vst.msk [vmem:[%s1217_s3 + $0x50] sm:$0xff] %vm633_vm1, %v940_v13 }
 0x136   :  { %v944_v15 = vpop.eup %943  ;;  %647 = vst.msk [vmem:[%s1217_s3 + $0x68] sm:$0xff] %vm633_vm1, %v942_v14 }
 0x137   :  { %645 = vst.msk [vmem:[%s1217_s3 + $0x58] sm:$0xff] %vm633_vm1, %v944_v15 }

</bundles_post_ra>
